<compile_context>
chip_gen: v7x
topology: tpu7x:2x2x1
jax: 0.10.0
libtpu: 0.0.40
codegen_flags: <defaults>
</compile_context>

<pallas_src>
import functools
import math

import jax
import jax.numpy as jnp
from jax import lax
from jax.experimental import pallas as pl
from jax.experimental.pallas import tpu as pltpu

LANE = 128
# Largest padded N for which the VMEM-resident (fused) path is used:
# A_hat bf16 (budgeted x2 for buffering) + S2 scratch must fit well inside the
# 32 MiB scoped-VMEM default (and leave headroom on v7x's 64 MiB physical VMEM).
_FUSED_MAX_N = 2048


def _round_up(x, m):
    return (x + m - 1) // m * m


def _masked_log_softmax(z, num_classes):
    """Row-wise log_softmax over the first `num_classes` (un-padded) columns."""
    col = lax.broadcasted_iota(jnp.int32, z.shape, 1)
    zm = jnp.where(col < num_classes, z, -1e30)
    m = jnp.max(zm, axis=1, keepdims=True)
    lse = jnp.log(jnp.sum(jnp.exp(zm - m), axis=1, keepdims=True)) + m
    return z - lse


# ---------------- fused single-call kernel (A_hat VMEM-resident) ----------------
def fused_gcn_kernel(a_ref, x_ref, w1_ref, b1_ref, w2_ref, b2_ref, o_ref, s2_ref,
                     *, num_classes, tm):
    phase = pl.program_id(0)
    i = pl.program_id(1)
    row0 = pl.multiple_of(i * tm, tm)
    a_tile = a_ref[pl.ds(row0, tm), :]                       # (tm, N_pad) bf16

    @pl.when(phase == 0)
    def _():
        # layer 1 (reassociated): H1 = relu((A @ X) @ W1 + b1), f32 accumulate
        ax = jnp.dot(a_tile, x_ref[...], preferred_element_type=jnp.float32)
        h1 = jnp.maximum(
            jnp.dot(ax.astype(jnp.bfloat16), w1_ref[...],
                    preferred_element_type=jnp.float32) + b1_ref[...], 0.0)
        # dropout: inference-mode identity (see TODO at top of file).
        s2_ref[pl.ds(row0, tm), :] = jnp.dot(
            h1.astype(jnp.bfloat16), w2_ref[...],
            preferred_element_type=jnp.float32)
        # keep the (revisited) output block defined; phase 1 overwrites it
        o_ref[...] = jnp.zeros_like(o_ref)

    @pl.when(phase == 1)
    def _():
        z = jnp.dot(a_tile, s2_ref[...].astype(jnp.bfloat16),
                    preferred_element_type=jnp.float32) + b2_ref[...]
        o_ref[...] = _masked_log_softmax(z, num_classes)


# ---------------- tiled fallback (row + K tiling, VMEM bounded for any N) -------
def s2_tiled_kernel(a_ref, x_ref, w1_ref, b1_ref, w2_ref, s2_ref, acc_ref):
    k = pl.program_id(1)

    @pl.when(k == 0)
    def _():
        acc_ref[...] = jnp.zeros_like(acc_ref)

    acc_ref[...] += jnp.dot(a_ref[...], x_ref[...],
                            preferred_element_type=jnp.float32)

    @pl.when(k == pl.num_programs(1) - 1)
    def _():
        h1 = jnp.maximum(
            jnp.dot(acc_ref[...].astype(jnp.bfloat16), w1_ref[...],
                    preferred_element_type=jnp.float32) + b1_ref[...], 0.0)
        # dropout: inference-mode identity.
        s2_ref[...] = jnp.dot(h1.astype(jnp.bfloat16), w2_ref[...],
                              preferred_element_type=jnp.float32
                              ).astype(s2_ref.dtype)


def out_tiled_kernel(a_ref, s2_ref, b2_ref, o_ref, acc_ref, *, num_classes):
    k = pl.program_id(1)

    @pl.when(k == 0)
    def _():
        acc_ref[...] = jnp.zeros_like(acc_ref)

    acc_ref[...] += jnp.dot(a_ref[...], s2_ref[...],
                            preferred_element_type=jnp.float32)

    @pl.when(k == pl.num_programs(1) - 1)
    def _():
        z = acc_ref[...] + b2_ref[...]
        o_ref[...] = _masked_log_softmax(z, num_classes)


# ---------------- wrapper --------------------------------------------------------
def gcn_forward(a_hat, x, w1, b1, w2, b2, *, block_rows=256, block_k=512,
                force_tiled=False, vmem_limit_bytes=None):
    N, F_in = x.shape
    H = w1.shape[1]
    C = w2.shape[1]
    H_pad = _round_up(H, LANE)
    C_pad = _round_up(C, LANE)

    # --- pad the node dimension up to a tile multiple (no silent tm = N fallback) ---
    N_pad = _round_up(N, LANE)
    use_fused = (not force_tiled) and N_pad <= _FUSED_MAX_N
    if use_fused:
        tm = min(block_rows, N_pad)
        N_pad = _round_up(N_pad, tm)
        tk = N_pad  # unused on this path
    else:
        tm = min(block_rows, N_pad)
        tk = min(block_k, N_pad)
        N_pad = _round_up(N_pad, math.lcm(tm, tk))
    assert N_pad % tm == 0 and N_pad % tk == 0, (N_pad, tm, tk)

    # --- padded bf16 MXU operands, f32 biases (lane-dense 128-wide H / C) ---
    a_p = jnp.zeros((N_pad, N_pad), jnp.bfloat16).at[:N, :N].set(a_hat.astype(jnp.bfloat16))
    x_p = jnp.zeros((N_pad, F_in), jnp.bfloat16).at[:N, :].set(x.astype(jnp.bfloat16))
    w1_p = jnp.zeros((F_in, H_pad), jnp.bfloat16).at[:, :H].set(w1.astype(jnp.bfloat16))
    b1_p = jnp.zeros((1, H_pad), jnp.float32).at[:, :H].set(b1.astype(jnp.float32))
    w2_p = jnp.zeros((H_pad, C_pad), jnp.bfloat16).at[:H, :C].set(w2.astype(jnp.bfloat16))
    b2_p = jnp.zeros((1, C_pad), jnp.float32).at[:, :C].set(b2.astype(jnp.float32))

    def cparams(dim_sem):
        kwargs = dict(dimension_semantics=dim_sem)
        if vmem_limit_bytes is not None:
            kwargs["vmem_limit_bytes"] = vmem_limit_bytes
        return pltpu.CompilerParams(**kwargs)

    # advisory cost numbers for XLA's scheduler
    a_bytes = N_pad * N_pad * 2
    small_bytes = (N_pad * F_in * 2 + F_in * H_pad * 2 + H_pad * C_pad * 2
                   + (H_pad + C_pad) * 4 + N_pad * C_pad * 4)
    flops_l1 = (2 * N_pad * N_pad * F_in + 2 * N_pad * F_in * H_pad
                + 2 * N_pad * H_pad * C_pad)
    flops_l2 = 2 * N_pad * N_pad * C_pad

    if use_fused:
        grid = (2, N_pad // tm)
        out_p = pl.pallas_call(
            functools.partial(fused_gcn_kernel, num_classes=C, tm=tm),
            out_shape=jax.ShapeDtypeStruct((N_pad, C_pad), jnp.float32),
            grid=grid,
            in_specs=[
                pl.BlockSpec((N_pad, N_pad), lambda p, i: (0, 0)),  # A: VMEM-resident, DMA'd once
                pl.BlockSpec((N_pad, F_in), lambda p, i: (0, 0)),
                pl.BlockSpec((F_in, H_pad), lambda p, i: (0, 0)),
                pl.BlockSpec((1, H_pad), lambda p, i: (0, 0)),
                pl.BlockSpec((H_pad, C_pad), lambda p, i: (0, 0)),
                pl.BlockSpec((1, C_pad), lambda p, i: (0, 0)),
            ],
            out_specs=pl.BlockSpec((tm, C_pad), lambda p, i: (i, 0)),
            scratch_shapes=[pltpu.VMEM((N_pad, C_pad), jnp.float32)],  # S2, f32
            compiler_params=cparams(("arbitrary", "arbitrary")),
            cost_estimate=pl.CostEstimate(
                flops=flops_l1 + flops_l2,
                transcendentals=N_pad * (C_pad + 1),
                bytes_accessed=a_bytes + small_bytes),
        )(a_p, x_p, w1_p, b1_p, w2_p, b2_p)
        return out_p[:N, :C]

    # ---- fallback: two row+K-tiled passes (A streamed, bounded VMEM) -----------
    grid = (N_pad // tm, N_pad // tk)

    s2 = pl.pallas_call(
        s2_tiled_kernel,
        out_shape=jax.ShapeDtypeStruct((N_pad, C_pad), jnp.bfloat16),
        grid=grid,
        in_specs=[
            pl.BlockSpec((tm, tk), lambda i, k: (i, k)),
            pl.BlockSpec((tk, F_in), lambda i, k: (k, 0)),
            pl.BlockSpec((F_in, H_pad), lambda i, k: (0, 0)),
            pl.BlockSpec((1, H_pad), lambda i, k: (0, 0)),
            pl.BlockSpec((H_pad, C_pad), lambda i, k: (0, 0)),
        ],
        out_specs=pl.BlockSpec((tm, C_pad), lambda i, k: (i, 0)),
        scratch_shapes=[pltpu.VMEM((tm, F_in), jnp.float32)],
        compiler_params=cparams(("parallel", "arbitrary")),
        cost_estimate=pl.CostEstimate(
            flops=flops_l1, transcendentals=0,
            bytes_accessed=a_bytes + small_bytes),
    )(a_p, x_p, w1_p, b1_p, w2_p)

    out_p = pl.pallas_call(
        functools.partial(out_tiled_kernel, num_classes=C),
        out_shape=jax.ShapeDtypeStruct((N_pad, C_pad), jnp.float32),
        grid=grid,
        in_specs=[
            pl.BlockSpec((tm, tk), lambda i, k: (i, k)),
            pl.BlockSpec((tk, C_pad), lambda i, k: (k, 0)),
            pl.BlockSpec((1, C_pad), lambda i, k: (0, 0)),
        ],
        out_specs=pl.BlockSpec((tm, C_pad), lambda i, k: (i, 0)),
        scratch_shapes=[pltpu.VMEM((tm, C_pad), jnp.float32)],
        compiler_params=cparams(("parallel", "arbitrary")),
        cost_estimate=pl.CostEstimate(
            flops=flops_l2, transcendentals=N_pad * (C_pad + 1),
            bytes_accessed=a_bytes + N_pad * C_pad * (2 + 4)),
    )(a_p, s2, b2_p)

    return out_p[:N, :C]


# ---------------- plain-JAX glue + references ------------------------------------
def normalized_adjacency(edge_src, edge_dst, num_nodes):
    """GCN normalization: A_hat = D^{-1/2} (A + I) D^{-1/2}."""
    a = jnp.zeros((num_nodes, num_nodes), jnp.float32)
    a = a.at[edge_src, edge_dst].set(1.0)
    a = a + jnp.eye(num_nodes, dtype=jnp.float32)   # self-loops
    deg = jnp.sum(a, axis=1)
    dinv = jax.lax.rsqrt(deg)
    return a * dinv[:, None] * dinv[None, :]


def gcn_reference_recipe(a_hat, x, w1, b1, w2, b2):
    """Plain-JAX reference using the kernel's bf16-MXU / f32-accumulate recipe."""
    a = a_hat.astype(jnp.bfloat16)
    ax = jnp.dot(a, x.astype(jnp.bfloat16), preferred_element_type=jnp.float32)
    h1 = jnp.maximum(
        jnp.dot(ax.astype(jnp.bfloat16), w1.astype(jnp.bfloat16),
                preferred_element_type=jnp.float32) + b1, 0.0)
    s2 = jnp.dot(h1.astype(jnp.bfloat16), w2.astype(jnp.bfloat16),
                 preferred_element_type=jnp.float32)
    z = jnp.dot(a, s2.astype(jnp.bfloat16),
                preferred_element_type=jnp.float32) + b2
    return jax.nn.log_softmax(z, axis=1)


def gcn_reference_f32(a_hat, x, w1, b1, w2, b2):
    """Pure-f32 reference matching the PyTorch module's eval-mode forward."""
    h1 = jnp.maximum(a_hat @ (x @ w1) + b1, 0.0)
    z = a_hat @ (h1 @ w2) + b2
    return jax.nn.log_softmax(z, axis=1)


if __name__ == "__main__":
    # Small, deterministic synthetic graph / node-classification problem.
    N = 300          # deliberately NOT a tile multiple -> exercises node padding
    F_IN = 16        # num_node_features
    HIDDEN = 16      # GCNConv hidden size (fixed at 16 in the module)
    C = 8            # num_classes

    key = jax.random.PRNGKey(0)
    k_x, k_w1, k_w2 = jax.random.split(key, 3)

    x = jax.random.normal(k_x, (N, F_IN), dtype=jnp.float32)

    # deterministic undirected ring graph (both directions, like PyG edge_index)
    src = jnp.arange(N, dtype=jnp.int32)
    dst = (src + 1) % N
    edge_src = jnp.concatenate([src, dst])
    edge_dst = jnp.concatenate([dst, src])
    a_hat = normalized_adjacency(edge_src, edge_dst, N)

    # deterministic parameter init (glorot-ish scaling), zero biases
    w1 = jax.random.normal(k_w1, (F_IN, HIDDEN), dtype=jnp.float32) / jnp.sqrt(F_IN)
    b1 = jnp.zeros((1, HIDDEN), dtype=jnp.float32)
    w2 = jax.random.normal(k_w2, (HIDDEN, C), dtype=jnp.float32) / jnp.sqrt(HIDDEN)
    b2 = jnp.zeros((1, C), dtype=jnp.float32)

    ref_recipe = gcn_reference_recipe(a_hat, x, w1, b1, w2, b2)
    ref_f32 = gcn_reference_f32(a_hat, x, w1, b1, w2, b2)

    # --- fused single-call path (A read from HBM once, S2 in VMEM scratch) ---
    out = gcn_forward(a_hat, x, w1, b1, w2, b2)
    jax.block_until_ready(out)
    assert out.shape == (N, C)
    assert bool(jnp.allclose(jnp.sum(jnp.exp(out), axis=1), 1.0, atol=1e-4))
    assert bool(jnp.allclose(out, ref_recipe, atol=2e-2)), \
        float(jnp.max(jnp.abs(out - ref_recipe)))
    assert bool(jnp.allclose(out, ref_f32, atol=1e-1)), \
        float(jnp.max(jnp.abs(out - ref_f32)))

    # --- row + K tiled fallback (for graphs whose A_hat does not fit in VMEM) ---
    out_t = gcn_forward(a_hat, x, w1, b1, w2, b2,
                        block_rows=128, block_k=128, force_tiled=True)
    jax.block_until_ready(out_t)
    assert out_t.shape == (N, C)
    assert bool(jnp.allclose(out_t, ref_recipe, atol=2e-2)), \
        float(jnp.max(jnp.abs(out_t - ref_recipe)))

    print("KERNEL_OK")
</pallas_src>

<mosaic_0001>
module attributes {stable_mosaic.version = 11 : i64} {
  func.func @fused_gcn_kernel(%arg0: i32, %arg1: i32, %arg2: memref<512x512xbf16, #tpu.memory_space<vmem>>, %arg3: memref<512x16xbf16, #tpu.memory_space<vmem>>, %arg4: memref<16x128xbf16, #tpu.memory_space<vmem>>, %arg5: memref<1x128xf32, #tpu.memory_space<vmem>>, %arg6: memref<128x128xbf16, #tpu.memory_space<vmem>>, %arg7: memref<1x128xf32, #tpu.memory_space<vmem>>, %arg8: memref<256x128xf32, #tpu.memory_space<vmem>>, %arg9: memref<512x128xf32, #tpu.memory_space<vmem>>) attributes {dimension_semantics = [#tpu.dimension_semantics<arbitrary>, #tpu.dimension_semantics<arbitrary>], iteration_bounds = array<i64: 2, 2>, scalar_prefetch = 0 : i64, scratch_operands = 1 : i64, tpu.core_type = #tpu.core_type<tc>, window_params = [{pipeline_mode = #tpu.pipeline_mode<synchronous>, transform_indices = @transform_0, window_bounds = array<i64: 512, 512>}, {pipeline_mode = #tpu.pipeline_mode<synchronous>, transform_indices = @transform_1, window_bounds = array<i64: 512, 16>}, {pipeline_mode = #tpu.pipeline_mode<synchronous>, transform_indices = @transform_2, window_bounds = array<i64: 16, 128>}, {pipeline_mode = #tpu.pipeline_mode<synchronous>, transform_indices = @transform_3, window_bounds = array<i64: 1, 128>}, {pipeline_mode = #tpu.pipeline_mode<synchronous>, transform_indices = @transform_4, window_bounds = array<i64: 128, 128>}, {pipeline_mode = #tpu.pipeline_mode<synchronous>, transform_indices = @transform_5, window_bounds = array<i64: 1, 128>}, {transform_indices = @transform_6, window_bounds = array<i64: 256, 128>}]} {
    %c256_i32 = arith.constant 256 : i32
    %0 = arith.muli %arg1, %c256_i32 : i32
    %1 = tpu.assume_multiple %0, 256 : i32
    %2 = arith.index_cast %1 : i32 to index
    %c0 = arith.constant 0 : index
    %3 = vector.load %arg2[%2, %c0] : memref<512x512xbf16, #tpu.memory_space<vmem>>, vector<256x512xbf16>
    %c0_i32 = arith.constant 0 : i32
    %4 = arith.cmpi eq, %arg0, %c0_i32 : i32
    %5 = arith.extui %4 : i1 to i32
    %c0_i32_0 = arith.constant 0 : i32
    %6 = arith.cmpi ne, %5, %c0_i32_0 : i32
    scf.if %6 {
      %c0_2 = arith.constant 0 : index
      %c0_3 = arith.constant 0 : index
      %10 = vector.load %arg3[%c0_2, %c0_3] : memref<512x16xbf16, #tpu.memory_space<vmem>>, vector<512x16xbf16>
      %cst = arith.constant dense<0.000000e+00> : vector<256x16xf32>
      %11 = tpu.matmul %3, %10, %cst {dimension_numbers = #tpu.dot_dimension_numbers<[1], [0], [0], [1], [0, 0, 1, 1], [], []>} : vector<256x512xbf16>, vector<512x16xbf16>, vector<256x16xf32> -> vector<256x16xf32>
      %12 = arith.truncf %11 : vector<256x16xf32> to vector<256x16xbf16>
      %c0_4 = arith.constant 0 : index
      %c0_5 = arith.constant 0 : index
      %13 = vector.load %arg4[%c0_4, %c0_5] : memref<16x128xbf16, #tpu.memory_space<vmem>>, vector<16x128xbf16>
      %cst_6 = arith.constant dense<0.000000e+00> : vector<256x128xf32>
      %14 = tpu.matmul %12, %13, %cst_6 {dimension_numbers = #tpu.dot_dimension_numbers<[1], [0], [0], [1], [0, 0, 1, 1], [], []>} : vector<256x16xbf16>, vector<16x128xbf16>, vector<256x128xf32> -> vector<256x128xf32>
      %c0_7 = arith.constant 0 : index
      %c0_8 = arith.constant 0 : index
      %15 = vector.load %arg5[%c0_7, %c0_8] : memref<1x128xf32, #tpu.memory_space<vmem>>, vector<1x128xf32>
      %16 = vector.broadcast %15 : vector<1x128xf32> to vector<256x128xf32>
      %17 = arith.addf %14, %16 : vector<256x128xf32>
      %cst_9 = arith.constant 0.000000e+00 : f32
      %18 = vector.broadcast %cst_9 : f32 to vector<256x128xf32>
      %19 = arith.maximumf %17, %18 : vector<256x128xf32>
      %20 = arith.truncf %19 : vector<256x128xf32> to vector<256x128xbf16>
      %c0_10 = arith.constant 0 : index
      %c0_11 = arith.constant 0 : index
      %21 = vector.load %arg6[%c0_10, %c0_11] : memref<128x128xbf16, #tpu.memory_space<vmem>>, vector<128x128xbf16>
      %cst_12 = arith.constant dense<0.000000e+00> : vector<256x128xf32>
      %22 = tpu.matmul %20, %21, %cst_12 {dimension_numbers = #tpu.dot_dimension_numbers<[1], [0], [0], [1], [0, 0, 1, 1], [], []>} : vector<256x128xbf16>, vector<128x128xbf16>, vector<256x128xf32> -> vector<256x128xf32>
      %23 = arith.index_cast %1 : i32 to index
      %c0_13 = arith.constant 0 : index
      %24 = vector.load %arg9[%23, %c0_13] : memref<512x128xf32, #tpu.memory_space<vmem>>, vector<256x128xf32>
      tpu.vector_store %arg9[%23, %c0_13], %22 {strides = array<i32>} : memref<512x128xf32, #tpu.memory_space<vmem>>, vector<256x128xf32>,
      %cst_14 = arith.constant 0.000000e+00 : f32
      %25 = vector.broadcast %cst_14 : f32 to vector<256x128xf32>
      %c0_15 = arith.constant 0 : index
      %c0_16 = arith.constant 0 : index
      %26 = vector.load %arg8[%c0_15, %c0_16] : memref<256x128xf32, #tpu.memory_space<vmem>>, vector<256x128xf32>
      tpu.vector_store %arg8[%c0_15, %c0_16], %25 {strides = array<i32>} : memref<256x128xf32, #tpu.memory_space<vmem>>, vector<256x128xf32>,
    } else {
    }
    %c1_i32 = arith.constant 1 : i32
    %7 = arith.cmpi eq, %arg0, %c1_i32 : i32
    %8 = arith.extui %7 : i1 to i32
    %c0_i32_1 = arith.constant 0 : i32
    %9 = arith.cmpi ne, %8, %c0_i32_1 : i32
    scf.if %9 {
      %c0_2 = arith.constant 0 : index
      %c0_3 = arith.constant 0 : index
      %10 = vector.load %arg9[%c0_2, %c0_3] : memref<512x128xf32, #tpu.memory_space<vmem>>, vector<512x128xf32>
      %11 = arith.truncf %10 : vector<512x128xf32> to vector<512x128xbf16>
      %cst = arith.constant dense<0.000000e+00> : vector<256x128xf32>
      %12 = tpu.matmul %3, %11, %cst {dimension_numbers = #tpu.dot_dimension_numbers<[1], [0], [0], [1], [0, 0, 1, 1], [], []>} : vector<256x512xbf16>, vector<512x128xbf16>, vector<256x128xf32> -> vector<256x128xf32>
      %c0_4 = arith.constant 0 : index
      %c0_5 = arith.constant 0 : index
      %13 = vector.load %arg7[%c0_4, %c0_5] : memref<1x128xf32, #tpu.memory_space<vmem>>, vector<1x128xf32>
      %14 = vector.broadcast %13 : vector<1x128xf32> to vector<256x128xf32>
      %15 = arith.addf %12, %14 : vector<256x128xf32>
      %16 = tpu.iota {dimensions = array<i32: 1>} : vector<256x128xi32>
      %c8_i32 = arith.constant 8 : i32
      %17 = vector.broadcast %c8_i32 : i32 to vector<256x128xi32>
      %18 = arith.cmpi slt, %16, %17 : vector<256x128xi32>
      %cst_6 = arith.constant -1.000000e+30 : f32
      %19 = vector.broadcast %cst_6 : f32 to vector<256x128xf32>
      %20 = arith.select %18, %15, %19 : vector<256x128xi1>, vector<256x128xf32>
      %cst_7 = arith.constant dense<0xFF800000> : vector<256xf32>
      %21 = vector.multi_reduction <maximumf>, %20, %cst_7 [1] : vector<256x128xf32> to vector<256xf32>
      %22 = vector.shape_cast %21 : vector<256xf32> to vector<256x1xf32>
      %23 = vector.broadcast %22 : vector<256x1xf32> to vector<256x128xf32>
      %24 = arith.subf %20, %23 : vector<256x128xf32>
      %25 = math.exp %24 : vector<256x128xf32>
      %cst_8 = arith.constant dense<0.000000e+00> : vector<256xf32>
      %26 = vector.multi_reduction <add>, %25, %cst_8 [1] : vector<256x128xf32> to vector<256xf32>
      %27 = vector.shape_cast %26 : vector<256xf32> to vector<256x1xf32>
      %28 = math.log %27 : vector<256x1xf32>
      %29 = arith.addf %28, %22 : vector<256x1xf32>
      %30 = vector.broadcast %29 : vector<256x1xf32> to vector<256x128xf32>
      %31 = arith.subf %15, %30 : vector<256x128xf32>
      %c0_9 = arith.constant 0 : index
      %c0_10 = arith.constant 0 : index
      %32 = vector.load %arg8[%c0_9, %c0_10] : memref<256x128xf32, #tpu.memory_space<vmem>>, vector<256x128xf32>
      tpu.vector_store %arg8[%c0_9, %c0_10], %31 {strides = array<i32>} : memref<256x128xf32, #tpu.memory_space<vmem>>, vector<256x128xf32>,
    } else {
    }
    return
  }
  func.func @transform_0(%arg0: i32, %arg1: i32) -> (i32, i32) {
    %c0_i32 = arith.constant 0 : i32
    %c0_i32_0 = arith.constant 0 : i32
    %c0_i32_1 = arith.constant 0 : i32
    return %c0_i32, %c0_i32_0 : i32, i32
  }
  func.func @transform_1(%arg0: i32, %arg1: i32) -> (i32, i32) {
    %c0_i32 = arith.constant 0 : i32
    %c0_i32_0 = arith.constant 0 : i32
    %c0_i32_1 = arith.constant 0 : i32
    return %c0_i32, %c0_i32_0 : i32, i32
  }
  func.func @transform_2(%arg0: i32, %arg1: i32) -> (i32, i32) {
    %c0_i32 = arith.constant 0 : i32
    %c0_i32_0 = arith.constant 0 : i32
    %c0_i32_1 = arith.constant 0 : i32
    return %c0_i32, %c0_i32_0 : i32, i32
  }
  func.func @transform_3(%arg0: i32, %arg1: i32) -> (i32, i32) {
    %c0_i32 = arith.constant 0 : i32
    %c0_i32_0 = arith.constant 0 : i32
    %c0_i32_1 = arith.constant 0 : i32
    return %c0_i32, %c0_i32_0 : i32, i32
  }
  func.func @transform_4(%arg0: i32, %arg1: i32) -> (i32, i32) {
    %c0_i32 = arith.constant 0 : i32
    %c0_i32_0 = arith.constant 0 : i32
    %c0_i32_1 = arith.constant 0 : i32
    return %c0_i32, %c0_i32_0 : i32, i32
  }
  func.func @transform_5(%arg0: i32, %arg1: i32) -> (i32, i32) {
    %c0_i32 = arith.constant 0 : i32
    %c0_i32_0 = arith.constant 0 : i32
    %c0_i32_1 = arith.constant 0 : i32
    return %c0_i32, %c0_i32_0 : i32, i32
  }
  func.func @transform_6(%arg0: i32, %arg1: i32) -> (i32, i32) {
    %c0_i32 = arith.constant 0 : i32
    %c0_i32_0 = arith.constant 0 : i32
    return %arg1, %c0_i32 : i32, i32
  }
}

</mosaic_0001>

<bundles_post_ra>
// kernel: tpu_custom_call.1
= control target key start
LH: loop header
LB: loop body
LE: loop exit
PB: predicated region body
PF: predicated region fallthrough
CT: control target
= control target key end

     0   :  { %11 = vsyncpa [#allocation4], 0  ;;  %s5669_s0 = inlined_call_operand.hbm [shape: bf16[512,512], index: 0, kind: input, shape index: {}]   ;;  %s5670_s1 = inlined_call_operand.vmem [shape: bf16[512,16], index: 1, kind: input, shape index: {}]   ;;  %s5671_s2 = inlined_call_operand.vmem [shape: bf16[16,128], index: 2, kind: input, shape index: {}]   ;;  %s5672_s3 = inlined_call_operand.vmem [shape: f32[1,128], index: 3, kind: input, shape index: {}]   ;;  %s5673_s4 = inlined_call_operand.vmem [shape: bf16[128,128], index: 4, kind: input, shape index: {}]   ;;  %s5674_s5 = inlined_call_operand.vmem [shape: f32[1,128], index: 5, kind: input, shape index: {}]   ;;  %s5675_s6 = inlined_call_operand.hbm [shape: f32[512,128], index: 6, kind: output, shape index: {}]  }
   0x1   :  { %12 = vsyncpa [#allocation5], 0 }
   0x2   :  { %14 = vsyncpa [#allocation5 + $0x1], 0  ;;  %s4272_s21 = smov 0   ;;  %s4274_s22 = smov 0  }
   0x3   :  { %s4276_s23 = smov 0   ;;  %s4278_s24 = smov 0  }
   0x4   :  { %s4280_s25 = smov 0   ;;  %s4282_s26 = smov 0  }
   0x5   :  { %s4284_s27 = smov 0   ;;  %s4286_s28 = smov 0  }
   0x6 LB: > { %s3069_s29 = sadd.s32 4294967295, %s4228_s28   ;;  %s3070_s30 = sadd.s32 4294967294, %s4228_s28   ;;  %s4228_s28 = sphi %s4286_s28, %s20_s28   ;;  %s4224_s27 = sphi %s4284_s27, %s5853_s27   ;;  %s4220_s26 = sphi %s4282_s26, %s5852_s26   ;;  %s4216_s25 = sphi %s4280_s25, %s5851_s25   ;;  %s4212_s24 = sphi %s4278_s24, %s5850_s24   ;;  %s4208_s23 = sphi %s4276_s23, %s5849_s23   ;;  %s4204_s22 = sphi %s4274_s22, %s5848_s22   ;;  %s4200_s21 = sphi %s4272_s21, %s5847_s21  }
   0x7   : > { %s29_s7 = sadd.s32 1, %s4220_s26  ;;  %s32_s8 = sadd.s32 1, %s4224_s27 }
   0x8   : > { %p30_p0 = scmp.ge.s32.totalorder %s29_s7, 2  ;;  %s165_s9 = sadd.s32 1, %s4208_s23 }
   0x9   : > { %p175_p1 = scmp.ne.s32.totalorder %s4208_s23, %s4204_s22  ;;  %p176_p2 = scmp.eq.s32.totalorder %s3069_s29, 3 }
   0xa   : > { %s5855_s7 = smov (%p30_p0, %s29_s7), 0  ;;  %s5857_s8 = smov (!%p30_p0, %s32_s8), %s4224_s27 }
   0xb   : > { %s162_s10 = ssub.s32 %s4220_s26, %s5855_s7  ;;  %p4324_p3 = por %p176_p2, %p175_p1 }
   0xc   : > { %p34_p4 = scmp.ge.s32.totalorder %s5857_s8, 2  ;;  %p163_p5 = scmp.eq.s32.totalorder %s162_s10, 0 }
   0xd   : > { %s5748_s11 = scalar_select %p4324_p3, 1, 0 }
   0xe   : > { %p181_p6 = scmp.ne.s32.totalorder %s4204_s22, %s4200_s21  ;;  %p182_p7 = scmp.eq.s32.totalorder %s3070_s30, 3 }
   0xf   : > { %s5859_s8 = smov (%p34_p4, %s5857_s8), 0  ;;  %p3071_p9 = scmp.ge.s32.totalorder %s4228_s28, 1 }
  0x10   : > { %5749 = sst [smem:[#allocation9_spill]] %s5859_s8  ;;  %p4335_p8 = por %p182_p7, %p181_p6 }
  0x11   : > { %s4333_s12 = scalar_select %p163_p5, %s4208_s23, %s165_s9  }
  0x12   : > { %s5750_s13 = scalar_select %p4335_p8, 1, 0 }
  0x13   : > { %p189_p10 = scmp.lt.s32.totalorder %s4228_s28, 5  ;;  %p4341_p11 = scmp.eq.s32.totalorder %s3069_s29, 0 }
  0x14   : > { %s4230_s16 = smov [#allocation3]   ;;  %s4102_s29 = scalar_lea.hbm %s5669_s0, 16384 }
  0x15   : > { %s5751_s14 = scalar_select %p4341_p11, 1, 0 }
  0x16   : > { %p4345_p12 = pnand %p3071_p9, %p189_p10  ;;  %s201_s17 = sshll.u32 %s4230_s16, 4  ;;  %s202_s17 = int_to_ptr.vmem [resolvable:$true] %s201_s17 }
  0x17   : > { %p4103_p1 = scmp.ne.s32.totalorder %s5669_s0, %s4102_s29  ;;  %p4109_p6 = scmp.lt.u32.totalorder %s4102_s29, %s5669_s0 }
  0x18   : > { %s5752_s15 = scalar_select %p4345_p12, 1, 0 }
  0x19   : > { %p3852_p13 = pneg %p4345_p12 }
  0x1b   : > { %p4353_p0 = pnand %p4341_p11, %p3852_p13 }
  0x1d   : > { %p4104_p2 = pneg %p4353_p0 }
  0x1f   : > { %p4105_p4 = pnand %p4104_p2, %p4103_p1 }
  0x21   : > { %p4106_p5 = pneg %p4105_p4 }
  0x23   : > { %p4111_p7 = pnand %p4109_p6, %p4106_p5 }
  0x25   : > { %4114 = shalt.err (!%p4111_p7)
}
  0x26   : > { %s4115_s8 = scalar_lea.vmem %s202_s17, 16384  ;;  %p4123_p8 = scmp.lt.s32.totalorder %s202_s17, %s202_s17 }
  0x27   : > { %p4116_p9 = scmp.ne.s32.totalorder %s202_s17, %s4115_s8  ;;  %p4124_p3 = scmp.lt.s32.totalorder %s4115_s8, %s4115_s8 }
  0x29   : > { %p4118_p10 = pnand %p4116_p9, %p4104_p2  ;;  %p4125_p11 = por %p4124_p3, %p4123_p8 }
  0x2b   : > { %p4119_p13 = pneg %p4118_p10 }
  0x2d   : > { %p4126_p12 = pnand %p4125_p11, %p4119_p13 }
  0x2f   : > { %4129 = shalt.err (!%p4126_p12)
}
  0x30   : > { %s4231_s19 = smov 256   ;;  %s4232_s20 = smov 16  }
  0x31   : > { %3855 = dma.hbm_to_vmem [thread:$0]  (!%p4353_p0), %s5669_s0, 16384, %s202_s17, [#allocation4], %s4231_s19, %s4231_s19, %s4232_s20  }
  0x32   : > { %p5754_p1 = scmp.ne.s32.totalorder %s5752_s15, 0 }
  0x34   : > { %232 = sbr.rel (%p5754_p1) target bundleno = 1637 (0x665), region = 44 }
  0x3b   : > { %p5755_p4 = scmp.ne.s32.totalorder %s5751_s14, 0 }
  0x3d   : > { %4191 = dma.done.wait (%p5755_p4), [#allocation4], 16384  }
  0x3e   : > { %4193 = vsyncadd (%p5755_p4), [#allocation4], 4294950912  ;;  %s5694_s8 = sand.u32 1, %s4204_s22   ;;  %s3076_s29 = sshll.u32 %s4212_s24, 8 }
  0x3f   : > { %s4383_s18 = sshll.u32 %s5694_s8, 8  ;;  %s260_s17 = sshra.s32 %s3076_s29, 3 }
  0x40   : > { %s3273_s10 = sshll.u32 %s260_s17, 4  ;;  %s4582_s14 = scalar_lea.vmem [#allocation6], %s4383_s18 }
  0x41   : > { %s4387_s15 = scalar_lea.vmem [#allocation3], %s3273_s10  ;;  %p3079_p3 = scmp.ne.s32.totalorder %s4216_s25, 0 }
  0x42   : > { %v4390_v0 = vld [vmem:[%s4387_s15] sm:$0xff]  ;;  %v4393_v1 = vld [vmem:[%s4387_s15 + $0x8] sm:$0xff]  ;;  %v4396_v2 = vld [vmem:[%s4387_s15 + $0x10] sm:$0xff]  ;;  %vm1262_vm0 = vcmask (!%p3079_p3), 130048   ;;  %s4923_s18 = scalar_lea.vmem (!%p3079_p3), [#allocation2], %s3076_s29 }
  0x43   : > { %5756 = vst [vmem:[#allocation10_spill] sm:$0xff] %v4393_v1  ;;  %v4399_v3 = vld [vmem:[%s4387_s15 + $0x18] sm:$0xff]  ;;  %v4402_v4 = vld [vmem:[%s4387_s15 + $0x20] sm:$0xff]  ;;  %v4405_v5 = vld [vmem:[%s4387_s15 + $0x28] sm:$0xff] }
  0x44   : > { %5757 = vst [vmem:[#allocation11_spill] sm:$0xff] %v4399_v3  ;;  %v4408_v6 = vld [vmem:[%s4387_s15 + $0x30] sm:$0xff]  ;;  %v4411_v7 = vld [vmem:[%s4387_s15 + $0x38] sm:$0xff]  ;;  %v4414_v8 = vld [vmem:[%s4387_s15 + $0x40] sm:$0xff] }
  0x45   : > { %v4417_v9 = vld [vmem:[%s4387_s15 + $0x48] sm:$0xff]  ;;  %v4420_v10 = vld [vmem:[%s4387_s15 + $0x50] sm:$0xff]  ;;  %v4423_v11 = vld [vmem:[%s4387_s15 + $0x58] sm:$0xff] }
  0x46   : > { %v4426_v12 = vld [vmem:[%s4387_s15 + $0x60] sm:$0xff]  ;;  %v4429_v13 = vld [vmem:[%s4387_s15 + $0x68] sm:$0xff]  ;;  %v4432_v14 = vld [vmem:[%s4387_s15 + $0x70] sm:$0xff] }
  0x47   : > { %v4435_v15 = vld [vmem:[%s4387_s15 + $0x78] sm:$0xff]  ;;  %v4438_v16 = vld [vmem:[%s4387_s15 + $0x80] sm:$0xff]  ;;  %v4441_v17 = vld [vmem:[%s4387_s15 + $0x88] sm:$0xff] }
  0x48   : > { %v4444_v18 = vld [vmem:[%s4387_s15 + $0x90] sm:$0xff]  ;;  %v4447_v19 = vld [vmem:[%s4387_s15 + $0x98] sm:$0xff]  ;;  %v4450_v20 = vld [vmem:[%s4387_s15 + $0xa0] sm:$0xff] }
  0x49   : > { %v4453_v21 = vld [vmem:[%s4387_s15 + $0xa8] sm:$0xff]  ;;  %v4456_v22 = vld [vmem:[%s4387_s15 + $0xb0] sm:$0xff]  ;;  %v4459_v23 = vld [vmem:[%s4387_s15 + $0xb8] sm:$0xff] }
  0x4a   : > { %v4462_v24 = vld [vmem:[%s4387_s15 + $0xc0] sm:$0xff]  ;;  %v4465_v25 = vld [vmem:[%s4387_s15 + $0xc8] sm:$0xff]  ;;  %v4468_v26 = vld [vmem:[%s4387_s15 + $0xd0] sm:$0xff] }
  0x4b   : > { %v4471_v27 = vld [vmem:[%s4387_s15 + $0xd8] sm:$0xff]  ;;  %v4474_v28 = vld [vmem:[%s4387_s15 + $0xe0] sm:$0xff]  ;;  %v4477_v29 = vld [vmem:[%s4387_s15 + $0xe8] sm:$0xff] }
  0x4c   : > { %v4480_v30 = vld [vmem:[%s4387_s15 + $0xf0] sm:$0xff]  ;;  %v4483_v31 = vld [vmem:[%s4387_s15 + $0xf8] sm:$0xff]  ;;  %v4486_v32 = vld [vmem:[%s4387_s15 + $0x100] sm:$0xff] }
  0x4d   : > { %v4489_v33 = vld [vmem:[%s4387_s15 + $0x108] sm:$0xff]  ;;  %v4492_v34 = vld [vmem:[%s4387_s15 + $0x110] sm:$0xff]  ;;  %v4495_v35 = vld [vmem:[%s4387_s15 + $0x118] sm:$0xff] }
  0x4e   : > { %v4498_v36 = vld [vmem:[%s4387_s15 + $0x120] sm:$0xff]  ;;  %v4501_v37 = vld [vmem:[%s4387_s15 + $0x128] sm:$0xff]  ;;  %v4504_v38 = vld [vmem:[%s4387_s15 + $0x130] sm:$0xff] }
  0x4f   : > { %5758 = vst [vmem:[#allocation12_spill] sm:$0xff] %v4501_v37  ;;  %v4507_v39 = vld [vmem:[%s4387_s15 + $0x138] sm:$0xff]  ;;  %v4510_v40 = vld [vmem:[%s4387_s15 + $0x140] sm:$0xff]  ;;  %v4513_v41 = vld [vmem:[%s4387_s15 + $0x148] sm:$0xff] }
  0x50   : > { %5759 = vst [vmem:[#allocation13_spill] sm:$0xff] %v4510_v40  ;;  %5760 = vst [vmem:[#allocation14_spill] sm:$0xff] %v4513_v41  ;;  %v4516_v42 = vld [vmem:[%s4387_s15 + $0x150] sm:$0xff]  ;;  %v4519_v43 = vld [vmem:[%s4387_s15 + $0x158] sm:$0xff] }
  0x51   : > { %5761 = vst [vmem:[#allocation15_spill] sm:$0xff] %v4516_v42  ;;  %5762 = vst [vmem:[#allocation16_spill] sm:$0xff] %v4519_v43  ;;  %v4522_v44 = vld [vmem:[%s4387_s15 + $0x160] sm:$0xff]  ;;  %v4525_v45 = vld [vmem:[%s4387_s15 + $0x168] sm:$0xff] }
  0x52   : > { %5763 = vst [vmem:[#allocation17_spill] sm:$0xff] %v4522_v44  ;;  %5764 = vst [vmem:[#allocation18_spill] sm:$0xff] %v4525_v45  ;;  %v4528_v46 = vld [vmem:[%s4387_s15 + $0x170] sm:$0xff]  ;;  %v4531_v47 = vld [vmem:[%s4387_s15 + $0x178] sm:$0xff] }
  0x53   : > { %5765 = vst [vmem:[#allocation19_spill] sm:$0xff] %v4528_v46  ;;  %5766 = vst [vmem:[#allocation20_spill] sm:$0xff] %v4531_v47  ;;  %v4534_v48 = vld [vmem:[%s4387_s15 + $0x180] sm:$0xff]  ;;  %v4537_v49 = vld [vmem:[%s4387_s15 + $0x188] sm:$0xff] }
  0x54   : > { %5767 = vst [vmem:[#allocation21_spill] sm:$0xff] %v4534_v48  ;;  %5768 = vst [vmem:[#allocation22_spill] sm:$0xff] %v4537_v49  ;;  %v4540_v50 = vld [vmem:[%s4387_s15 + $0x190] sm:$0xff]  ;;  %v4543_v51 = vld [vmem:[%s4387_s15 + $0x198] sm:$0xff] }
  0x55   : > { %5769 = vst [vmem:[#allocation23_spill] sm:$0xff] %v4540_v50  ;;  %5770 = vst [vmem:[#allocation24_spill] sm:$0xff] %v4543_v51  ;;  %v4546_v52 = vld [vmem:[%s4387_s15 + $0x1a0] sm:$0xff]  ;;  %v4549_v53 = vld [vmem:[%s4387_s15 + $0x1a8] sm:$0xff]  ;;  %332 = sbr.rel (%p3079_p3) target bundleno = 905 (0x389), region = 52 }
  0x56   : > { %5771 = vst [vmem:[#allocation25_spill] sm:$0xff] %v4546_v52  ;;  %5772 = vst [vmem:[#allocation26_spill] sm:$0xff] %v4549_v53  ;;  %v4552_v54 = vld [vmem:[%s4387_s15 + $0x1b0] sm:$0xff]  ;;  %v4555_v55 = vld [vmem:[%s4387_s15 + $0x1b8] sm:$0xff] }
  0x57   : > { %5773 = vst [vmem:[#allocation27_spill] sm:$0xff] %v4552_v54  ;;  %5774 = vst [vmem:[#allocation28_spill] sm:$0xff] %v4555_v55  ;;  %v4558_v56 = vld [vmem:[%s4387_s15 + $0x1c0] sm:$0xff]  ;;  %v4561_v57 = vld [vmem:[%s4387_s15 + $0x1c8] sm:$0xff] }
  0x58   : > { %5775 = vst [vmem:[#allocation29_spill] sm:$0xff] %v4558_v56  ;;  %5776 = vst [vmem:[#allocation30_spill] sm:$0xff] %v4561_v57  ;;  %v4564_v58 = vld [vmem:[%s4387_s15 + $0x1d0] sm:$0xff]  ;;  %v4567_v59 = vld [vmem:[%s4387_s15 + $0x1d8] sm:$0xff] }
  0x59   : > { %5777 = vst [vmem:[#allocation31_spill] sm:$0xff] %v4564_v58  ;;  %5778 = vst [vmem:[#allocation32_spill] sm:$0xff] %v4567_v59  ;;  %v4570_v60 = vld [vmem:[%s4387_s15 + $0x1e0] sm:$0xff]  ;;  %v4573_v61 = vld [vmem:[%s4387_s15 + $0x1e8] sm:$0xff]  ;;  %v3081_v59 = vcombine.high (!%p3079_p3), %v4390_v0, %v4396_v2 }
  0x5a   : > { %5779 = vst [vmem:[#allocation33_spill] sm:$0xff] %v4570_v60  ;;  %5780 = vst [vmem:[#allocation34_spill] sm:$0xff] %v4573_v61  ;;  %v4576_v62 = vld [vmem:[%s4387_s15 + $0x1f0] sm:$0xff]  ;;  %v4579_v63 = vld [vmem:[%s4387_s15 + $0x1f8] sm:$0xff]  ;;  %v3083_v60 = vcombine.high (!%p3079_p3), %v4393_v1, %v4399_v3 }
  0x5b   : > { %5781 = vst [vmem:[#allocation35_spill] sm:$0xff] %v4576_v62  ;;  %5782 = vst [vmem:[#allocation36_spill] sm:$0xff] %v4579_v63  ;;  %v3933_v57 = vld [vmem:[%s5670_s1 + $0x40] sm:$0xff] (!%p3079_p3)   ;;  %941 = vmatprep.mubr.bf16.mxu0 (!%p3079_p3), %v3081_v59  ;;  %v3937_v56 = vld [vmem:[%s5670_s1 + $0x48] sm:$0xff] (!%p3079_p3)  }
  0x5c   : > { %v3934_v61 = vld [vmem:[%s5670_s1 + $0xc0] sm:$0xff]   ;;  %3275 = vmatprep.subr.bf16.mxu0 %v3933_v57  ;;  %1102 = vmatprep.mubr.bf16.mxu1 %v3083_v60  ;;  %v3938_v57 = vld [vmem:[%s5670_s1 + $0xc8] sm:$0xff]  }
  0x5d   : > { %v3935_v63 = vld [vmem:[%s5670_s1] sm:$0xff]   ;;  %3387 = vmatprep.subr.bf16.mxu1 %v3934_v61  ;;  %v3939_v59 = vld [vmem:[%s5670_s1 + $0x8] sm:$0xff]   ;;  %v3941_v61 = vld [vmem:[%s5670_s1 + $0x50] sm:$0xff]  }
  0x5e   : > { %v3936_v62 = vld [vmem:[%s5670_s1 + $0x80] sm:$0xff]   ;;  %3276 = vmatpush3.bf16.msra.mxu0 %v3935_v63  ;;  %v3940_v60 = vld [vmem:[%s5670_s1 + $0x88] sm:$0xff]   ;;  %v3944_v63 = vld [vmem:[%s5670_s1 + $0x90] sm:$0xff]  }
  0x5f   : > { %3388 = vmatpush3.bf16.msra.mxu1 %v3936_v62  ;;  %3277 = vmatprep.subr.bf16.mxu0 %v3937_v56  ;;  %v3942_v62 = vld [vmem:[%s5670_s1 + $0xd0] sm:$0xff]  }
  0x60   : > { %3389 = vmatprep.subr.bf16.mxu1 %v3938_v57  ;;  %v3943_v56 = vld [vmem:[%s5670_s1 + $0x10] sm:$0xff]   ;;  %v3945_v57 = vld [vmem:[%s5670_s1 + $0x58] sm:$0xff]  }
  0x62   : > { %3278 = vmatpush3.bf16.msra.mxu0 %v3939_v59  ;;  %v3946_v59 = vld [vmem:[%s5670_s1 + $0xd8] sm:$0xff]  }
  0x63   : > { %3390 = vmatpush3.bf16.msra.mxu1 %v3940_v60  ;;  %3279 = vmatprep.subr.bf16.mxu0 %v3941_v61  ;;  %v3947_v60 = vld [vmem:[%s5670_s1 + $0x18] sm:$0xff]  }
  0x64   : > { %3391 = vmatprep.subr.bf16.mxu1 %v3942_v62  ;;  %v3948_v61 = vld [vmem:[%s5670_s1 + $0x98] sm:$0xff]   ;;  %v3949_v62 = vld [vmem:[%s5670_s1 + $0x60] sm:$0xff]  }
  0x66   : > { %3280 = vmatpush3.bf16.msra.mxu0 %v3943_v56  ;;  %v3950_v56 = vld [vmem:[%s5670_s1 + $0xe0] sm:$0xff]  }
  0x67   : > { %3392 = vmatpush3.bf16.msra.mxu1 %v3944_v63  ;;  %3281 = vmatprep.subr.bf16.mxu0 %v3945_v57  ;;  %v3951_v63 = vld [vmem:[%s5670_s1 + $0x20] sm:$0xff]  }
  0x68   : > { %3393 = vmatprep.subr.bf16.mxu1 %v3946_v59  ;;  %v3952_v57 = vld [vmem:[%s5670_s1 + $0xa0] sm:$0xff]   ;;  %v3953_v59 = vld [vmem:[%s5670_s1 + $0x68] sm:$0xff]  }
  0x6a   : > { %3282 = vmatpush3.bf16.msra.mxu0 %v3947_v60  ;;  %v3954_v60 = vld [vmem:[%s5670_s1 + $0xe8] sm:$0xff]  }
  0x6b   : > { %3394 = vmatpush3.bf16.msra.mxu1 %v3948_v61  ;;  %3283 = vmatprep.subr.bf16.mxu0 %v3949_v62  ;;  %v3955_v61 = vld [vmem:[%s5670_s1 + $0x28] sm:$0xff]  }
  0x6c   : > { %3395 = vmatprep.subr.bf16.mxu1 %v3950_v56  ;;  %v3956_v62 = vld [vmem:[%s5670_s1 + $0xa8] sm:$0xff]   ;;  %v3957_v56 = vld [vmem:[%s5670_s1 + $0x70] sm:$0xff]  }
  0x6e   : > { %3284 = vmatpush3.bf16.msra.mxu0 %v3951_v63  ;;  %v3958_v63 = vld [vmem:[%s5670_s1 + $0xf0] sm:$0xff]  }
  0x6f   : > { %3396 = vmatpush3.bf16.msra.mxu1 %v3952_v57  ;;  %3285 = vmatprep.subr.bf16.mxu0 %v3953_v59  ;;  %v3959_v57 = vld [vmem:[%s5670_s1 + $0x30] sm:$0xff]  }
  0x70   : > { %3397 = vmatprep.subr.bf16.mxu1 %v3954_v60  ;;  %v3960_v59 = vld [vmem:[%s5670_s1 + $0xb0] sm:$0xff]   ;;  %v3961_v60 = vld [vmem:[%s5670_s1 + $0x78] sm:$0xff]  }
  0x72   : > { %3286 = vmatpush3.bf16.msra.mxu0 %v3955_v61  ;;  %v3962_v61 = vld [vmem:[%s5670_s1 + $0xf8] sm:$0xff]  }
  0x73   : > { %3398 = vmatpush3.bf16.msra.mxu1 %v3956_v62  ;;  %3287 = vmatprep.subr.bf16.mxu0 %v3957_v56  ;;  %v3963_v62 = vld [vmem:[%s5670_s1 + $0x38] sm:$0xff]  }
  0x74   : > { %3399 = vmatprep.subr.bf16.mxu1 %v3958_v63  ;;  %v3964_v56 = vld [vmem:[%s5670_s1 + $0xb8] sm:$0xff]   ;;  %v3080_v63 = vcombine.low %v4390_v0, %v4396_v2 }
  0x76   : > { %3288 = vmatpush3.bf16.msra.mxu0 %v3959_v57  ;;  %v3082_v57 = vcombine.low %v4393_v1, %v4399_v3  ;;  %v3086_v1 = vcombine.low %v4405_v5, %v4411_v7  ;;  %v3089_v3 = vcombine.high %v4414_v8, %v4420_v10 }
  0x77   : > { %3400 = vmatpush3.bf16.msra.mxu1 %v3960_v59  ;;  %3289 = vmatprep.subr.bf16.mxu0 %v3961_v60  ;;  %v3085_v59 = vcombine.high %v4402_v4, %v4408_v6  ;;  %v3965_v60 = vld [vmem:[%s5671_s2] sm:$0xff]  }
  0x78   : > { %3401 = vmatprep.subr.bf16.mxu1 %v3962_v61  ;;  %v3087_v61 = vcombine.high %v4405_v5, %v4411_v7 }
  0x7a   : > { %3290 = vmatpush3.bf16.msra.mxu0 %v3963_v62  ;;  %v3084_v62 = vcombine.low %v4402_v4, %v4408_v6 }
  0x7b   : > { %3402 = vmatpush3.bf16.msra.mxu1 %v3964_v56  ;;  %3764 = vmatprep.subr.bf16.mxu0 %v3965_v60  ;;  %v3091_v56 = vcombine.high %v4417_v9, %v4423_v11 }
  0x7d   : > { %942 = vmatmul.mubr.bf16.vlgmr.msra.gmra.mrb[0].mxu0 %v3080_v63  ;;  %v3088_v63 = vcombine.low %v4414_v8, %v4420_v10 }
  0x7e   : > { %1103 = vmatmul.mubr.bf16.vlgmr.msra.gmra.mrb[0].mxu1 %v3082_v57  ;;  %949 = vmatprep.mubr.bf16.mxu0 %v3085_v59  ;;  %v3090_v57 = vcombine.low %v4417_v9, %v4423_v11  ;;  %v3093_v59 = vcombine.high %v4426_v12, %v4432_v14 }
  0x7f   : > { %1110 = vmatprep.mubr.bf16.mxu1 %v3087_v61  ;;  %3765 = vmatpush3.bf16.msra.mxu0 %v3965_v60  ;;  %v3095_v60 = vcombine.high %v4429_v13, %v4435_v15  ;;  %v3097_v61 = vcombine.high %v4438_v16, %v4444_v18 }
  0x85   : > { %950 = vmatmul.mubr.bf16.gmra.mrb[4].mxu0 %v3084_v62  ;;  %v3099_v62 = vcombine.high %v4441_v17, %v4447_v19 }
  0x86   : > { %1111 = vmatmul.mubr.bf16.gmra.mrb[4].mxu1 %v3086_v1  ;;  %957 = vmatprep.mubr.bf16.mxu0 %v3089_v3  ;;  %v3092_v1 = vcombine.low %v4426_v12, %v4432_v14  ;;  %v3094_v3 = vcombine.low %v4429_v13, %v4435_v15 }
  0x87   : > { %1118 = vmatprep.mubr.bf16.mxu1 %v3091_v56  ;;  %v3096_v56 = vcombine.low %v4438_v16, %v4444_v18 }
  0x8d   : > { %958 = vmatmul.mubr.bf16.gmra.mrb[8].mxu0 %v3088_v63  ;;  %v3098_v63 = vcombine.low %v4441_v17, %v4447_v19 }
  0x8e   : > { %1119 = vmatmul.mubr.bf16.gmra.mrb[8].mxu1 %v3090_v57  ;;  %965 = vmatprep.mubr.bf16.mxu0 %v3093_v59  ;;  %v3101_v57 = vcombine.high %v4450_v20, %v4456_v22  ;;  %v3103_v59 = vcombine.high %v4453_v21, %v4459_v23 }
  0x8f   : > { %1126 = vmatprep.mubr.bf16.mxu1 %v3095_v60  ;;  %v3100_v60 = vcombine.low %v4450_v20, %v4456_v22 }
  0x95   : > { %966 = vmatmul.mubr.bf16.gmra.mrb[12].mxu0 %v3092_v1  ;;  %v3102_v1 = vcombine.low %v4453_v21, %v4459_v23 }
  0x96   : > { %1127 = vmatmul.mubr.bf16.gmra.mrb[12].mxu1 %v3094_v3  ;;  %973 = vmatprep.mubr.bf16.mxu0 %v3097_v61  ;;  %v3105_v3 = vcombine.high %v4462_v24, %v4468_v26  ;;  %v3107_v61 = vcombine.high %v4465_v25, %v4471_v27 }
  0x97   : > { %1134 = vmatprep.mubr.bf16.mxu1 %v3099_v62  ;;  %v3104_v62 = vcombine.low %v4462_v24, %v4468_v26 }
  0x9d   : > { %974 = vmatmul.mubr.bf16.gmra.mrb[16].mxu0 %v3096_v56  ;;  %v3106_v56 = vcombine.low %v4465_v25, %v4471_v27 }
  0x9e   : > { %1135 = vmatmul.mubr.bf16.gmra.mrb[16].mxu1 %v3098_v63  ;;  %981 = vmatprep.mubr.bf16.mxu0 %v3101_v57  ;;  %v3109_v63 = vcombine.high %v4474_v28, %v4480_v30  ;;  %v3111_v57 = vcombine.high %v4477_v29, %v4483_v31 }
  0x9f   : > { %1142 = vmatprep.mubr.bf16.mxu1 %v3103_v59  ;;  %v3108_v59 = vcombine.low %v4474_v28, %v4480_v30 }
  0xa5   : > { %982 = vmatmul.mubr.bf16.gmra.mrb[20].mxu0 %v3100_v60  ;;  %v3110_v60 = vcombine.low %v4477_v29, %v4483_v31 }
  0xa6   : > { %1143 = vmatmul.mubr.bf16.gmra.mrb[20].mxu1 %v3102_v1  ;;  %989 = vmatprep.mubr.bf16.mxu0 %v3105_v3  ;;  %v3113_v1 = vcombine.high %v4486_v32, %v4492_v34  ;;  %v3115_v3 = vcombine.high %v4489_v33, %v4495_v35 }
  0xa7   : > { %1150 = vmatprep.mubr.bf16.mxu1 %v3107_v61  ;;  %v3112_v61 = vcombine.low %v4486_v32, %v4492_v34 }
  0xad   : > { %990 = vmatmul.mubr.bf16.gmra.mrb[24].mxu0 %v3104_v62  ;;  %v3114_v62 = vcombine.low %v4489_v33, %v4495_v35 }
  0xae   : > { %1151 = vmatmul.mubr.bf16.gmra.mrb[24].mxu1 %v3106_v56  ;;  %997 = vmatprep.mubr.bf16.mxu0 %v3109_v63  ;;  %v3117_v56 = vcombine.high %v4498_v36, %v4504_v38  ;;  %v3119_v63 = vcombine.high %v4501_v37, %v4507_v39 }
  0xaf   : > { %1158 = vmatprep.mubr.bf16.mxu1 %v3111_v57  ;;  %v3116_v57 = vcombine.low %v4498_v36, %v4504_v38 }
  0xb5   : > { %998 = vmatmul.mubr.bf16.gmra.mrb[28].mxu0 %v3108_v59  ;;  %v3118_v59 = vcombine.low %v4501_v37, %v4507_v39 }
  0xb6   : > { %1159 = vmatmul.mubr.bf16.gmra.mrb[28].mxu1 %v3110_v60  ;;  %1005 = vmatprep.mubr.bf16.mxu0 %v3113_v1  ;;  %v3121_v60 = vcombine.high %v4510_v40, %v4516_v42  ;;  %v3123_v1 = vcombine.high %v4513_v41, %v4519_v43 }
  0xb7   : > { %1166 = vmatprep.mubr.bf16.mxu1 %v3115_v3  ;;  %v3120_v3 = vcombine.low %v4510_v40, %v4516_v42 }
  0xbd   : > { %1006 = vmatmul.mubr.bf16.gmra.mrb[32].mxu0 %v3112_v61  ;;  %v3122_v61 = vcombine.low %v4513_v41, %v4519_v43 }
  0xbe   : > { %1167 = vmatmul.mubr.bf16.gmra.mrb[32].mxu1 %v3114_v62  ;;  %1013 = vmatprep.mubr.bf16.mxu0 %v3117_v56  ;;  %v3125_v62 = vcombine.high %v4522_v44, %v4528_v46  ;;  %v3127_v56 = vcombine.high %v4525_v45, %v4531_v47 }
  0xbf   : > { %1174 = vmatprep.mubr.bf16.mxu1 %v3119_v63  ;;  %v3124_v63 = vcombine.low %v4522_v44, %v4528_v46 }
  0xc5   : > { %1014 = vmatmul.mubr.bf16.gmra.mrb[36].mxu0 %v3116_v57  ;;  %v3126_v57 = vcombine.low %v4525_v45, %v4531_v47 }
  0xc6   : > { %1175 = vmatmul.mubr.bf16.gmra.mrb[36].mxu1 %v3118_v59  ;;  %1021 = vmatprep.mubr.bf16.mxu0 %v3121_v60  ;;  %v3129_v59 = vcombine.high %v4534_v48, %v4540_v50  ;;  %v3131_v60 = vcombine.high %v4537_v49, %v4543_v51 }
  0xc7   : > { %1182 = vmatprep.mubr.bf16.mxu1 %v3123_v1  ;;  %v3128_v1 = vcombine.low %v4534_v48, %v4540_v50 }
  0xcd   : > { %1022 = vmatmul.mubr.bf16.gmra.mrb[40].mxu0 %v3120_v3  ;;  %v3130_v3 = vcombine.low %v4537_v49, %v4543_v51  ;;  %v5785_v49 = vld [vmem:[#allocation30_spill] sm:$0xff] }
  0xce   : > { %1183 = vmatmul.mubr.bf16.gmra.mrb[40].mxu1 %v3122_v61  ;;  %1029 = vmatprep.mubr.bf16.mxu0 %v3125_v62  ;;  %v3133_v61 = vcombine.high %v4546_v52, %v4552_v54  ;;  %v3135_v62 = vcombine.high %v4549_v53, %v4555_v55 }
  0xcf   : > { %1190 = vmatprep.mubr.bf16.mxu1 %v3127_v56  ;;  %v3132_v56 = vcombine.low %v4546_v52, %v4552_v54 }
  0xd5   : > { %1030 = vmatmul.mubr.bf16.gmra.mrb[44].mxu0 %v3124_v63  ;;  %v3134_v63 = vcombine.low %v4549_v53, %v4555_v55  ;;  %v5788_v53 = vld [vmem:[#allocation36_spill] sm:$0xff]  ;;  %v5789_v55 = vld [vmem:[#allocation34_spill] sm:$0xff] }
  0xd6   : > { %1191 = vmatmul.mubr.bf16.gmra.mrb[44].mxu1 %v3126_v57  ;;  %1037 = vmatprep.mubr.bf16.mxu0 %v3129_v59  ;;  %v5783_v57 = vld [vmem:[#allocation29_spill] sm:$0xff]  ;;  %v3143_v54 = vcombine.high %v5789_v55, %v5788_v53 }
  0xd7   : > { %1198 = vmatprep.mubr.bf16.mxu1 %v3131_v60  ;;  %v3137_v59 = vcombine.high %v5783_v57, %v4564_v58  ;;  %v5784_v60 = vld [vmem:[#allocation32_spill] sm:$0xff] }
  0xd8   : > { %v3139_v51 = vcombine.high %v5785_v49, %v5784_v60 }
  0xdd   : > { %1038 = vmatmul.mubr.bf16.gmra.mrb[48].mxu0 %v3128_v1  ;;  %v3136_v1 = vcombine.low %v5783_v57, %v4564_v58 }
  0xde   : > { %1199 = vmatmul.mubr.bf16.gmra.mrb[48].mxu1 %v3130_v3  ;;  %1045 = vmatprep.mubr.bf16.mxu0 %v3133_v61  ;;  %v3138_v3 = vcombine.low %v5785_v49, %v5784_v60  ;;  %v5786_v61 = vld [vmem:[#allocation35_spill] sm:$0xff] }
  0xdf   : > { %1206 = vmatprep.mubr.bf16.mxu1 %v3135_v62  ;;  %v5787_v62 = vld [vmem:[#allocation33_spill] sm:$0xff] }
  0xe0   : > { %v3141_v52 = vcombine.high %v5787_v62, %v5786_v61 }
  0xe5   : > { %1046 = vmatmul.mubr.bf16.gmra.mrb[52].mxu0 %v3132_v56  ;;  %v3140_v56 = vcombine.low %v5787_v62, %v5786_v61 }
  0xe6   : > { %1207 = vmatmul.mubr.bf16.gmra.mrb[52].mxu1 %v3134_v63  ;;  %1053 = vmatprep.mubr.bf16.mxu0 %v3137_v59 }
  0xe7   : > { %1214 = vmatprep.mubr.bf16.mxu1 %v3139_v51  ;;  %v3142_v51 = vcombine.low %v5789_v55, %v5788_v53 }
  0xed   : > { %1054 = vmatmul.mubr.bf16.gmra.mrb[56].mxu0 %v3136_v1 }
  0xee   : > { %1215 = vmatmul.mubr.bf16.gmra.mrb[56].mxu1 %v3138_v3  ;;  %1061 = vmatprep.mubr.bf16.mxu0 %v3141_v52  ;;  %v3966_v52 = vld [vmem:[%s5673_s4] sm:$0xff]  }
  0xef   : > { %1222 = vmatprep.mubr.bf16.mxu1 %v3143_v54  ;;  %v3967_v54 = vld [vmem:[%s5673_s4 + $0x8] sm:$0xff]   ;;  %3798 = vmatprep.subr.bf16.mxu1 %v3966_v52 }
  0xf0   : > { %3799 = vmatpush3.bf16.msra.mxu1 %v3966_v52 }
  0xf1   : > { %3800 = vmatprep.subr.bf16.mxu1 %v3967_v54 }
  0xf4   : > { %3801 = vmatpush3.bf16.msra.mxu1 %v3967_v54 }
  0xf5   : > { %1062 = vmatmul.mubr.bf16.gmra.mrb[60].mxu0 %v3140_v56  ;;  %v3968_v56 = vld [vmem:[%s5673_s4 + $0x10] sm:$0xff]  }
  0xf6   : > { %1223 = vmatmul.mubr.bf16.gmra.mrb[60].mxu1 %v3142_v51  ;;  %3802 = vmatprep.subr.bf16.mxu1 %v3968_v56 }
  0xf8   : > { %3803 = vmatpush3.bf16.msra.mxu1 %v3968_v56  ;;  %v3971_v56 = vld [vmem:[%s5673_s4 + $0x28] sm:$0xff]  }
 0x150   : > { %v3291_v63 = vpop.f32.mrb[0].mxu0 }
 0x151   : > { %v3403_v49 = vpop.f32.mrb[0].mxu1  ;;  %v3292_v57 = vpop.f32.mrb[1].mxu0 }
 0x152   : > { %v3293_v59 = vadd.f32 %v3292_v57, %v3291_v63  ;;  %v3404_v60 = vpop.f32.mrb[1].mxu1  ;;  %v3294_v58 = vpop.f32.mrb[2].mxu0 }
 0x153   : > { %v3405_v48 = vadd.f32 %v3404_v60, %v3403_v49  ;;  %v3406_v50 = vpop.f32.mrb[2].mxu1  ;;  %v3295_v1 = vpop.f32.mrb[3].mxu0 }
 0x154   : > { %v3296_v53 = vadd.f32 %v3295_v1, %v3294_v58  ;;  %v3407_v55 = vpop.f32.mrb[3].mxu1 }
 0x155   : > { %v1105_v3 = vadd.f32 %v3405_v48, %v3293_v59  ;;  %v3408_v61 = vadd.f32 %v3407_v55, %v3406_v50  ;;  %v3969_v59 = vld [vmem:[%s5673_s4 + $0x18] sm:$0xff]  }
 0x156   : > { %3804 = vmatprep.subr.bf16.mxu1 %v3969_v59 }
 0x157   : > { %v1108_v62 = vadd.f32 %v3408_v61, %v3296_v53  ;;  %3805 = vmatpush3.bf16.msra.mxu1 %v3969_v59 }
 0x158   : > { %v3297_v51 = vpop.f32.mrb[4].mxu0 }
 0x159   : > { %v1231_v63 = vpack.c.bf16 %v1108_v62, %v1105_v3  ;;  %v3409_v49 = vpop.f32.mrb[4].mxu1  ;;  %v3298_v57 = vpop.f32.mrb[5].mxu0 }
 0x15a   : > { %v3299_v60 = vadd.f32 %v3298_v57, %v3297_v51  ;;  %v3410_v45 = vpop.f32.mrb[5].mxu1  ;;  %v3300_v47 = vpop.f32.mrb[6].mxu0 }
 0x15b   : > { %v3411_v58 = vadd.f32 %v3410_v45, %v3409_v49  ;;  %v3412_v48 = vpop.f32.mrb[6].mxu1  ;;  %3766 = vmatprep.mubr.msk.bf16.mxu0 %vm1262_vm0, %v1231_v63  ;;  %v3301_v50 = vpop.f32.mrb[7].mxu0  ;;  %v3970_v45 = vld [vmem:[%s5673_s4 + $0x20] sm:$0xff]  }
 0x15c   : > { %v3302_v1 = vadd.f32 %v3301_v50, %v3300_v47  ;;  %v3413_v52 = vpop.f32.mrb[7].mxu1  ;;  %3806 = vmatprep.subr.bf16.mxu1 %v3970_v45 }
 0x15d   : > { %v1113_v53 = vadd.f32 %v3411_v58, %v3299_v60  ;;  %v3414_v55 = vadd.f32 %v3413_v52, %v3412_v48  ;;  %3807 = vmatpush3.bf16.msra.mxu1 %v3970_v45 }
 0x15e   : > { %3808 = vmatprep.subr.bf16.mxu1 %v3971_v56 }
 0x15f   : > { %v1116_v3 = vadd.f32 %v3414_v55, %v3302_v1 }
 0x160   : > { %v3303_v54 = vpop.f32.mrb[8].mxu0 }
 0x161   : > { %v1232_v61 = vpack.c.bf16 %v1116_v3, %v1113_v53  ;;  %v3415_v62 = vpop.f32.mrb[8].mxu1  ;;  %v3304_v51 = vpop.f32.mrb[9].mxu0  ;;  %3809 = vmatpush3.bf16.msra.mxu1 %v3971_v56 }
 0x162   : > { %v3305_v63 = vadd.f32 %v3304_v51, %v3303_v54  ;;  %v3416_v49 = vpop.f32.mrb[9].mxu1  ;;  %v3306_v57 = vpop.f32.mrb[10].mxu0 }
 0x163   : > { %v3417_v44 = vadd.f32 %v3416_v49, %v3415_v62  ;;  %v3418_v47 = vpop.f32.mrb[10].mxu1  ;;  %3767 = vmatmul.mubr.msk.bf16.vlgmr.msra.gmra.mrb[64].mxu0 %vm1262_vm0, %v1232_v61  ;;  %v3307_v60 = vpop.f32.mrb[11].mxu0 }
 0x164   : > { %v3308_v58 = vadd.f32 %v3307_v60, %v3306_v57  ;;  %v3419_v48 = vpop.f32.mrb[11].mxu1 }
 0x165   : > { %v1121_v50 = vadd.f32 %v3417_v44, %v3305_v63  ;;  %v3420_v1 = vadd.f32 %v3419_v48, %v3418_v47 }
 0x167   : > { %v1124_v52 = vadd.f32 %v3420_v1, %v3308_v58 }
 0x168   : > { %v3309_v53 = vpop.f32.mrb[12].mxu0 }
 0x169   : > { %v1233_v55 = vpack.c.bf16 %v1124_v52, %v1121_v50  ;;  %v3421_v59 = vpop.f32.mrb[12].mxu1  ;;  %v3310_v3 = vpop.f32.mrb[13].mxu0 }
 0x16a   : > { %v3311_v54 = vadd.f32 %v3310_v3, %v3309_v53  ;;  %v3422_v62 = vpop.f32.mrb[13].mxu1  ;;  %v3312_v61 = vpop.f32.mrb[14].mxu0 }
 0x16b   : > { %v3423_v51 = vadd.f32 %v3422_v62, %v3421_v59  ;;  %v3424_v49 = vpop.f32.mrb[14].mxu1  ;;  %3770 = vmatprep.mubr.msk.bf16.mxu0 %vm1262_vm0, %v1233_v55  ;;  %v3313_v46 = vpop.f32.mrb[15].mxu0 }
 0x16c   : > { %v3314_v57 = vadd.f32 %v3313_v46, %v3312_v61  ;;  %v3425_v60 = vpop.f32.mrb[15].mxu1 }
 0x16d   : > { %v1129_v44 = vadd.f32 %v3423_v51, %v3311_v54  ;;  %v3426_v63 = vadd.f32 %v3425_v60, %v3424_v49 }
 0x16f   : > { %v1132_v45 = vadd.f32 %v3426_v63, %v3314_v57 }
 0x170   : > { %v3315_v47 = vpop.f32.mrb[16].mxu0 }
 0x171   : > { %v1234_v58 = vpack.c.bf16 %v1132_v45, %v1129_v44  ;;  %v3427_v48 = vpop.f32.mrb[16].mxu1  ;;  %v3316_v50 = vpop.f32.mrb[17].mxu0 }
 0x172   : > { %v3317_v1 = vadd.f32 %v3316_v50, %v3315_v47  ;;  %v3428_v52 = vpop.f32.mrb[17].mxu1  ;;  %v3318_v53 = vpop.f32.mrb[18].mxu0 }
 0x173   : > { %v3429_v3 = vadd.f32 %v3428_v52, %v3427_v48  ;;  %v3430_v41 = vpop.f32.mrb[18].mxu1  ;;  %3771 = vmatmul.mubr.msk.bf16.gmra.mrb[68].mxu0 %vm1262_vm0, %v1234_v58  ;;  %v3319_v56 = vpop.f32.mrb[19].mxu0 }
 0x174   : > { %v3320_v59 = vadd.f32 %v3319_v56, %v3318_v53  ;;  %v3431_v55 = vpop.f32.mrb[19].mxu1 }
 0x175   : > { %v1137_v62 = vadd.f32 %v3429_v3, %v3317_v1  ;;  %v3432_v46 = vadd.f32 %v3431_v55, %v3430_v41 }
 0x177   : > { %v1140_v61 = vadd.f32 %v3432_v46, %v3320_v59 }
 0x178   : > { %v3321_v54 = vpop.f32.mrb[20].mxu0 }
 0x179   : > { %v1235_v51 = vpack.c.bf16 %v1140_v61, %v1137_v62  ;;  %v3433_v49 = vpop.f32.mrb[20].mxu1  ;;  %v3322_v57 = vpop.f32.mrb[21].mxu0 }
 0x17a   : > { %v3323_v60 = vadd.f32 %v3322_v57, %v3321_v54  ;;  %v3434_v44 = vpop.f32.mrb[21].mxu1  ;;  %v3324_v63 = vpop.f32.mrb[22].mxu0 }
 0x17b   : > { %v3435_v45 = vadd.f32 %v3434_v44, %v3433_v49  ;;  %v3436_v47 = vpop.f32.mrb[22].mxu1  ;;  %3774 = vmatprep.mubr.msk.bf16.mxu0 %vm1262_vm0, %v1235_v51  ;;  %v3325_v48 = vpop.f32.mrb[23].mxu0 }
 0x17c   : > { %v3326_v50 = vadd.f32 %v3325_v48, %v3324_v63  ;;  %v3437_v58 = vpop.f32.mrb[23].mxu1 }
 0x17d   : > { %v1145_v52 = vadd.f32 %v3435_v45, %v3323_v60  ;;  %v3438_v53 = vadd.f32 %v3437_v58, %v3436_v47 }
 0x17f   : > { %v1148_v56 = vadd.f32 %v3438_v53, %v3326_v50 }
 0x180   : > { %v3327_v1 = vpop.f32.mrb[24].mxu0 }
 0x181   : > { %v1236_v41 = vpack.c.bf16 %v1148_v56, %v1145_v52  ;;  %v3439_v3 = vpop.f32.mrb[24].mxu1  ;;  %v3328_v59 = vpop.f32.mrb[25].mxu0 }
 0x182   : > { %v3329_v55 = vadd.f32 %v3328_v59, %v3327_v1  ;;  %v3440_v62 = vpop.f32.mrb[25].mxu1  ;;  %v3330_v46 = vpop.f32.mrb[26].mxu0 }
 0x183   : > { %v3441_v61 = vadd.f32 %v3440_v62, %v3439_v3  ;;  %v3442_v54 = vpop.f32.mrb[26].mxu1  ;;  %3775 = vmatmul.mubr.msk.bf16.gmra.mrb[72].mxu0 %vm1262_vm0, %v1236_v41  ;;  %v3331_v49 = vpop.f32.mrb[27].mxu0 }
 0x184   : > { %v3332_v57 = vadd.f32 %v3331_v49, %v3330_v46  ;;  %v3443_v51 = vpop.f32.mrb[27].mxu1 }
 0x185   : > { %v1153_v44 = vadd.f32 %v3441_v61, %v3329_v55  ;;  %v3444_v63 = vadd.f32 %v3443_v51, %v3442_v54 }
 0x187   : > { %v1156_v48 = vadd.f32 %v3444_v63, %v3332_v57 }
 0x188   : > { %v3333_v60 = vpop.f32.mrb[28].mxu0 }
 0x189   : > { %v1237_v45 = vpack.c.bf16 %v1156_v48, %v1153_v44  ;;  %v3445_v47 = vpop.f32.mrb[28].mxu1  ;;  %v3334_v50 = vpop.f32.mrb[29].mxu0 }
 0x18a   : > { %v3335_v58 = vadd.f32 %v3334_v50, %v3333_v60  ;;  %v3446_v52 = vpop.f32.mrb[29].mxu1  ;;  %v3336_v53 = vpop.f32.mrb[30].mxu0 }
 0x18b   : > { %v3447_v56 = vadd.f32 %v3446_v52, %v3445_v47  ;;  %v3448_v1 = vpop.f32.mrb[30].mxu1  ;;  %3778 = vmatprep.mubr.msk.bf16.mxu0 %vm1262_vm0, %v1237_v45  ;;  %v3337_v3 = vpop.f32.mrb[31].mxu0 }
 0x18c   : > { %v3338_v59 = vadd.f32 %v3337_v3, %v3336_v53  ;;  %v3449_v41 = vpop.f32.mrb[31].mxu1 }
 0x18d   : > { %v1161_v62 = vadd.f32 %v3447_v56, %v3335_v58  ;;  %v3450_v46 = vadd.f32 %v3449_v41, %v3448_v1 }
 0x18f   : > { %v1164_v49 = vadd.f32 %v3450_v46, %v3338_v59 }
 0x190   : > { %v3339_v55 = vpop.f32.mrb[32].mxu0 }
 0x191   : > { %v1238_v61 = vpack.c.bf16 %v1164_v49, %v1161_v62  ;;  %v3451_v54 = vpop.f32.mrb[32].mxu1  ;;  %v3340_v57 = vpop.f32.mrb[33].mxu0 }
 0x192   : > { %v3341_v51 = vadd.f32 %v3340_v57, %v3339_v55  ;;  %v3452_v44 = vpop.f32.mrb[33].mxu1  ;;  %v3342_v63 = vpop.f32.mrb[34].mxu0 }
 0x193   : > { %v3453_v48 = vadd.f32 %v3452_v44, %v3451_v54  ;;  %v3454_v60 = vpop.f32.mrb[34].mxu1  ;;  %3779 = vmatmul.mubr.msk.bf16.gmra.mrb[76].mxu0 %vm1262_vm0, %v1238_v61  ;;  %v3343_v47 = vpop.f32.mrb[35].mxu0 }
 0x194   : > { %v3344_v50 = vadd.f32 %v3343_v47, %v3342_v63  ;;  %v3455_v45 = vpop.f32.mrb[35].mxu1 }
 0x195   : > { %v1169_v52 = vadd.f32 %v3453_v48, %v3341_v51  ;;  %v3456_v53 = vadd.f32 %v3455_v45, %v3454_v60 }
 0x197   : > { %v1172_v3 = vadd.f32 %v3456_v53, %v3344_v50 }
 0x198   : > { %v3345_v58 = vpop.f32.mrb[36].mxu0 }
 0x199   : > { %v1239_v56 = vpack.c.bf16 %v1172_v3, %v1169_v52  ;;  %v3457_v1 = vpop.f32.mrb[36].mxu1  ;;  %v3346_v59 = vpop.f32.mrb[37].mxu0 }
 0x19a   : > { %v3347_v41 = vadd.f32 %v3346_v59, %v3345_v58  ;;  %v3458_v62 = vpop.f32.mrb[37].mxu1  ;;  %v3348_v46 = vpop.f32.mrb[38].mxu0 }
 0x19b   : > { %v3459_v49 = vadd.f32 %v3458_v62, %v3457_v1  ;;  %v3460_v55 = vpop.f32.mrb[38].mxu1  ;;  %3782 = vmatprep.mubr.msk.bf16.mxu0 %vm1262_vm0, %v1239_v56  ;;  %v3349_v54 = vpop.f32.mrb[39].mxu0 }
 0x19c   : > { %v3350_v57 = vadd.f32 %v3349_v54, %v3348_v46  ;;  %v3461_v61 = vpop.f32.mrb[39].mxu1 }
 0x19d   : > { %v1177_v44 = vadd.f32 %v3459_v49, %v3347_v41  ;;  %v3462_v63 = vadd.f32 %v3461_v61, %v3460_v55 }
 0x19f   : > { %v1180_v47 = vadd.f32 %v3462_v63, %v3350_v57 }
 0x1a0   : > { %v3351_v51 = vpop.f32.mrb[40].mxu0 }
 0x1a1   : > { %v1240_v48 = vpack.c.bf16 %v1180_v47, %v1177_v44  ;;  %v3463_v60 = vpop.f32.mrb[40].mxu1  ;;  %v3352_v50 = vpop.f32.mrb[41].mxu0 }
 0x1a2   : > { %v3353_v45 = vadd.f32 %v3352_v50, %v3351_v51  ;;  %v3464_v52 = vpop.f32.mrb[41].mxu1  ;;  %v3354_v53 = vpop.f32.mrb[42].mxu0 }
 0x1a3   : > { %v3465_v3 = vadd.f32 %v3464_v52, %v3463_v60  ;;  %v3466_v58 = vpop.f32.mrb[42].mxu1  ;;  %3783 = vmatmul.mubr.msk.bf16.gmra.mrb[80].mxu0 %vm1262_vm0, %v1240_v48  ;;  %v3355_v1 = vpop.f32.mrb[43].mxu0 }
 0x1a4   : > { %v3356_v59 = vadd.f32 %v3355_v1, %v3354_v53  ;;  %v3467_v56 = vpop.f32.mrb[43].mxu1 }
 0x1a5   : > { %v1185_v62 = vadd.f32 %v3465_v3, %v3353_v45  ;;  %v3468_v46 = vadd.f32 %v3467_v56, %v3466_v58 }
 0x1a7   : > { %v1188_v54 = vadd.f32 %v3468_v46, %v3356_v59 }
 0x1a8   : > { %v3357_v41 = vpop.f32.mrb[44].mxu0 }
 0x1a9   : > { %v1241_v49 = vpack.c.bf16 %v1188_v54, %v1185_v62  ;;  %v3469_v55 = vpop.f32.mrb[44].mxu1  ;;  %v3358_v57 = vpop.f32.mrb[45].mxu0 }
 0x1aa   : > { %v3359_v61 = vadd.f32 %v3358_v57, %v3357_v41  ;;  %v3470_v44 = vpop.f32.mrb[45].mxu1  ;;  %v3360_v63 = vpop.f32.mrb[46].mxu0 }
 0x1ab   : > { %v3471_v47 = vadd.f32 %v3470_v44, %v3469_v55  ;;  %v3472_v51 = vpop.f32.mrb[46].mxu1  ;;  %3786 = vmatprep.mubr.msk.bf16.mxu0 %vm1262_vm0, %v1241_v49  ;;  %v3361_v60 = vpop.f32.mrb[47].mxu0 }
 0x1ac   : > { %v3362_v50 = vadd.f32 %v3361_v60, %v3360_v63  ;;  %v3473_v48 = vpop.f32.mrb[47].mxu1 }
 0x1ad   : > { %v1193_v52 = vadd.f32 %v3471_v47, %v3359_v61  ;;  %v3474_v53 = vadd.f32 %v3473_v48, %v3472_v51  ;;  %v3972_v61 = vld [vmem:[%s5673_s4 + $0x30] sm:$0xff]  }
 0x1ae   : > { %3810 = vmatprep.subr.bf16.mxu1 %v3972_v61 }
 0x1af   : > { %v1196_v1 = vadd.f32 %v3474_v53, %v3362_v50  ;;  %3811 = vmatpush3.bf16.msra.mxu1 %v3972_v61 }
 0x1b0   : > { %v3363_v45 = vpop.f32.mrb[48].mxu0 }
 0x1b1   : > { %v1242_v3 = vpack.c.bf16 %v1196_v1, %v1193_v52  ;;  %v3475_v58 = vpop.f32.mrb[48].mxu1  ;;  %v3364_v59 = vpop.f32.mrb[49].mxu0 }
 0x1b2   : > { %v3365_v56 = vadd.f32 %v3364_v59, %v3363_v45  ;;  %v3476_v62 = vpop.f32.mrb[49].mxu1  ;;  %v3366_v46 = vpop.f32.mrb[50].mxu0  ;;  %v3973_v59 = vld [vmem:[%s5673_s4 + $0x38] sm:$0xff]  }
 0x1b3   : > { %v3477_v54 = vadd.f32 %v3476_v62, %v3475_v58  ;;  %v3478_v41 = vpop.f32.mrb[50].mxu1  ;;  %3787 = vmatmul.mubr.msk.bf16.gmra.mrb[84].mxu0 %vm1262_vm0, %v1242_v3  ;;  %v3367_v55 = vpop.f32.mrb[51].mxu0  ;;  %3812 = vmatprep.subr.bf16.mxu1 %v3973_v59 }
 0x1b4   : > { %v3368_v57 = vadd.f32 %v3367_v55, %v3366_v46  ;;  %v3479_v49 = vpop.f32.mrb[51].mxu1  ;;  %3813 = vmatpush3.bf16.msra.mxu1 %v3973_v59 }
 0x1b5   : > { %v1201_v44 = vadd.f32 %v3477_v54, %v3365_v56  ;;  %v3480_v63 = vadd.f32 %v3479_v49, %v3478_v41 }
 0x1b7   : > { %v1204_v60 = vadd.f32 %v3480_v63, %v3368_v57 }
 0x1b8   : > { %v3369_v47 = vpop.f32.mrb[52].mxu0 }
 0x1b9   : > { %v1243_v51 = vpack.c.bf16 %v1204_v60, %v1201_v44  ;;  %v3481_v50 = vpop.f32.mrb[52].mxu1  ;;  %v3370_v48 = vpop.f32.mrb[53].mxu0 }
 0x1ba   : > { %v3371_v52 = vadd.f32 %v3370_v48, %v3369_v47  ;;  %v3482_v53 = vpop.f32.mrb[53].mxu1  ;;  %v3372_v1 = vpop.f32.mrb[54].mxu0 }
 0x1bb   : > { %v3483_v45 = vadd.f32 %v3482_v53, %v3481_v50  ;;  %v3484_v3 = vpop.f32.mrb[54].mxu1  ;;  %3790 = vmatprep.mubr.msk.bf16.mxu0 %vm1262_vm0, %v1243_v51  ;;  %v3373_v58 = vpop.f32.mrb[55].mxu0 }
 0x1bc   : > { %v3374_v56 = vadd.f32 %v3373_v58, %v3372_v1  ;;  %v3485_v62 = vpop.f32.mrb[55].mxu1 }
 0x1bd   : > { %v1209_v46 = vadd.f32 %v3483_v45, %v3371_v52  ;;  %v3486_v54 = vadd.f32 %v3485_v62, %v3484_v3 }
 0x1bf   : > { %v1212_v41 = vadd.f32 %v3486_v54, %v3374_v56 }
 0x1c0   : > { %v3375_v55 = vpop.f32.mrb[56].mxu0 }
 0x1c1   : > { %v1244_v57 = vpack.c.bf16 %v1212_v41, %v1209_v46  ;;  %v3487_v49 = vpop.f32.mrb[56].mxu1  ;;  %v3376_v44 = vpop.f32.mrb[57].mxu0 }
 0x1c2   : > { %v3377_v63 = vadd.f32 %v3376_v44, %v3375_v55  ;;  %v3488_v60 = vpop.f32.mrb[57].mxu1  ;;  %v3378_v61 = vpop.f32.mrb[58].mxu0 }
 0x1c3   : > { %v3489_v47 = vadd.f32 %v3488_v60, %v3487_v49  ;;  %v3490_v51 = vpop.f32.mrb[58].mxu1  ;;  %3791 = vmatmul.mubr.msk.bf16.gmra.mrb[88].mxu0 %vm1262_vm0, %v1244_v57  ;;  %v3379_v50 = vpop.f32.mrb[59].mxu0 }
 0x1c4   : > { %v3380_v48 = vadd.f32 %v3379_v50, %v3378_v61  ;;  %v3491_v53 = vpop.f32.mrb[59].mxu1 }
 0x1c5   : > { %v1217_v1 = vadd.f32 %v3489_v47, %v3377_v63  ;;  %v3492_v52 = vadd.f32 %v3491_v53, %v3490_v51  ;;  %v4855_v47 = vld [vmem:[%s5672_s3] ss:$0 sm:$0xff] }
 0x1c7   : > { %v1220_v45 = vadd.f32 %v3492_v52, %v3380_v48 }
 0x1c8   : > { %v3381_v3 = vpop.f32.mrb[60].mxu0 }
 0x1c9   : > { %v1245_v58 = vpack.c.bf16 %v1220_v45, %v1217_v1  ;;  %v3493_v59 = vpop.f32.mrb[60].mxu1  ;;  %v3382_v56 = vpop.f32.mrb[61].mxu0 }
 0x1ca   : > { %v3383_v62 = vadd.f32 %v3382_v56, %v3381_v3  ;;  %v3494_v46 = vpop.f32.mrb[61].mxu1  ;;  %v3384_v54 = vpop.f32.mrb[62].mxu0 }
 0x1cb   : > { %v3495_v41 = vadd.f32 %v3494_v46, %v3493_v59  ;;  %v3496_v55 = vpop.f32.mrb[62].mxu1  ;;  %3794 = vmatprep.mubr.msk.bf16.mxu0 %vm1262_vm0, %v1245_v58  ;;  %v3385_v49 = vpop.f32.mrb[63].mxu0 }
 0x1cc   : > { %v3386_v44 = vadd.f32 %v3385_v49, %v3384_v54  ;;  %v3497_v57 = vpop.f32.mrb[63].mxu1 }
 0x1cd   : > { %v1225_v60 = vadd.f32 %v3495_v41, %v3383_v62  ;;  %v3498_v61 = vadd.f32 %v3497_v57, %v3496_v55 }
 0x1cf   : > { %v1228_v50 = vadd.f32 %v3498_v61, %v3386_v44 }
 0x1d1   : > { %v1246_v63 = vpack.c.bf16 %v1228_v50, %v1225_v60 }
 0x1d3   : > { %3795 = vmatmul.mubr.msk.bf16.gmra.mrb[92].mxu0 %vm1262_vm0, %v1246_v63 }
 0x236   : > { %v3768_v51 = vpop.f32.mrb[64].mxu0 }
 0x237   : > { %v1354_v48 = vadd.f32 %v3768_v51, %v4855_v47  ;;  %v1345_v53 = vpop.f32.mrb[65].mxu0 }
 0x238   : > { %v1346_v1 = vadd.f32 %v4855_v47, %v1345_v53  ;;  %v3769_v52 = vpop.f32.mrb[66].mxu0 }
 0x239   : > { %v1357_v45 = vadd.f32 %v3769_v52, %v4855_v47  ;;  %v1348_v3 = vpop.f32.mrb[67].mxu0  ;;  %v1474_v59 = vmax.f32 %v1354_v48, 0.0 }
 0x23a   : > { %v1349_v58 = vadd.f32 %v4855_v47, %v1348_v3  ;;  %v1472_v62 = vmax.f32 %v1346_v1, 0.0 }
 0x23b   : > { %v1475_v56 = vmax.f32 %v1357_v45, 0.0 }
 0x23c   : > { %v1473_v46 = vmax.f32 %v1349_v58, 0.0 }
 0x23d   : > { %v1505_v54 = vpack.c.bf16 %v1475_v56, %v1474_v59 }
 0x23e   : > { %v1504_v41 = vpack.c.bf16 %v1473_v46, %v1472_v62 }
 0x240   : > { %3814 = vmatprep.mubr.bf16.mxu1 %v1504_v41 }
 0x241   : > { %3815 = vmatmul.mubr.bf16.vlgmr.msra.gmra.mrb[64].mxu1 %v1505_v54 }
 0x246   : > { %v3772_v55 = vpop.f32.mrb[68].mxu0 }
 0x247   : > { %v1370_v49 = vadd.f32 %v3772_v55, %v4855_v47  ;;  %v1361_v44 = vpop.f32.mrb[69].mxu0 }
 0x248   : > { %v1362_v57 = vadd.f32 %v4855_v47, %v1361_v44  ;;  %v3773_v60 = vpop.f32.mrb[70].mxu0 }
 0x249   : > { %v1373_v61 = vadd.f32 %v3773_v60, %v4855_v47  ;;  %v1364_v50 = vpop.f32.mrb[71].mxu0  ;;  %v1478_v51 = vmax.f32 %v1370_v49, 0.0 }
 0x24a   : > { %v1365_v63 = vadd.f32 %v4855_v47, %v1364_v50  ;;  %v1476_v53 = vmax.f32 %v1362_v57, 0.0 }
 0x24b   : > { %v1479_v48 = vmax.f32 %v1373_v61, 0.0 }
 0x24c   : > { %v1477_v1 = vmax.f32 %v1365_v63, 0.0 }
 0x24d   : > { %v1507_v52 = vpack.c.bf16 %v1479_v48, %v1478_v51 }
 0x24e   : > { %v1506_v45 = vpack.c.bf16 %v1477_v1, %v1476_v53 }
 0x250   : > { %3818 = vmatprep.mubr.bf16.mxu1 %v1506_v45 }
 0x251   : > { %3819 = vmatmul.mubr.bf16.gmra.mrb[68].mxu1 %v1507_v52 }
 0x256   : > { %v3776_v3 = vpop.f32.mrb[72].mxu0 }
 0x257   : > { %v1386_v58 = vadd.f32 %v3776_v3, %v4855_v47  ;;  %v1377_v59 = vpop.f32.mrb[73].mxu0 }
 0x258   : > { %v1378_v56 = vadd.f32 %v4855_v47, %v1377_v59  ;;  %v3777_v62 = vpop.f32.mrb[74].mxu0 }
 0x259   : > { %v1389_v46 = vadd.f32 %v3777_v62, %v4855_v47  ;;  %v1380_v54 = vpop.f32.mrb[75].mxu0  ;;  %v1482_v55 = vmax.f32 %v1386_v58, 0.0 }
 0x25a   : > { %v1381_v41 = vadd.f32 %v4855_v47, %v1380_v54  ;;  %v1480_v44 = vmax.f32 %v1378_v56, 0.0 }
 0x25b   : > { %v1483_v49 = vmax.f32 %v1389_v46, 0.0 }
 0x25c   : > { %v1481_v57 = vmax.f32 %v1381_v41, 0.0 }
 0x25d   : > { %v1509_v60 = vpack.c.bf16 %v1483_v49, %v1482_v55 }
 0x25e   : > { %v1508_v61 = vpack.c.bf16 %v1481_v57, %v1480_v44 }
 0x260   : > { %3822 = vmatprep.mubr.bf16.mxu1 %v1508_v61 }
 0x261   : > { %3823 = vmatmul.mubr.bf16.gmra.mrb[72].mxu1 %v1509_v60 }
 0x266   : > { %v3780_v50 = vpop.f32.mrb[76].mxu0 }
 0x267   : > { %v1402_v63 = vadd.f32 %v3780_v50, %v4855_v47  ;;  %v1393_v51 = vpop.f32.mrb[77].mxu0 }
 0x268   : > { %v1394_v48 = vadd.f32 %v4855_v47, %v1393_v51  ;;  %v3781_v53 = vpop.f32.mrb[78].mxu0 }
 0x269   : > { %v1405_v1 = vadd.f32 %v3781_v53, %v4855_v47  ;;  %v1396_v52 = vpop.f32.mrb[79].mxu0  ;;  %v1486_v3 = vmax.f32 %v1402_v63, 0.0 }
 0x26a   : > { %v1397_v45 = vadd.f32 %v4855_v47, %v1396_v52  ;;  %v1484_v59 = vmax.f32 %v1394_v48, 0.0 }
 0x26b   : > { %v1487_v58 = vmax.f32 %v1405_v1, 0.0 }
 0x26c   : > { %v1485_v56 = vmax.f32 %v1397_v45, 0.0 }
 0x26d   : > { %v1511_v62 = vpack.c.bf16 %v1487_v58, %v1486_v3 }
 0x26e   : > { %v1510_v46 = vpack.c.bf16 %v1485_v56, %v1484_v59 }
 0x270   : > { %3826 = vmatprep.mubr.bf16.mxu1 %v1510_v46 }
 0x271   : > { %3827 = vmatmul.mubr.bf16.gmra.mrb[76].mxu1 %v1511_v62 }
 0x276   : > { %v3784_v54 = vpop.f32.mrb[80].mxu0 }
 0x277   : > { %v1418_v41 = vadd.f32 %v3784_v54, %v4855_v47  ;;  %v1409_v55 = vpop.f32.mrb[81].mxu0 }
 0x278   : > { %v1410_v49 = vadd.f32 %v4855_v47, %v1409_v55  ;;  %v3785_v44 = vpop.f32.mrb[82].mxu0 }
 0x279   : > { %v1421_v57 = vadd.f32 %v3785_v44, %v4855_v47  ;;  %v1412_v60 = vpop.f32.mrb[83].mxu0  ;;  %v1490_v50 = vmax.f32 %v1418_v41, 0.0 }
 0x27a   : > { %v1413_v61 = vadd.f32 %v4855_v47, %v1412_v60  ;;  %v1488_v51 = vmax.f32 %v1410_v49, 0.0 }
 0x27b   : > { %v1491_v63 = vmax.f32 %v1421_v57, 0.0 }
 0x27c   : > { %v1489_v48 = vmax.f32 %v1413_v61, 0.0 }
 0x27d   : > { %v1513_v53 = vpack.c.bf16 %v1491_v63, %v1490_v50 }
 0x27e   : > { %v1512_v1 = vpack.c.bf16 %v1489_v48, %v1488_v51 }
 0x280   : > { %3830 = vmatprep.mubr.bf16.mxu1 %v1512_v1 }
 0x281   : > { %3831 = vmatmul.mubr.bf16.gmra.mrb[80].mxu1 %v1513_v53 }
 0x286   : > { %v3788_v52 = vpop.f32.mrb[84].mxu0 }
 0x287   : > { %v1434_v45 = vadd.f32 %v3788_v52, %v4855_v47  ;;  %v1425_v3 = vpop.f32.mrb[85].mxu0 }
 0x288   : > { %v1426_v58 = vadd.f32 %v4855_v47, %v1425_v3  ;;  %v3789_v59 = vpop.f32.mrb[86].mxu0 }
 0x289   : > { %v1437_v56 = vadd.f32 %v3789_v59, %v4855_v47  ;;  %v1428_v62 = vpop.f32.mrb[87].mxu0  ;;  %v1494_v54 = vmax.f32 %v1434_v45, 0.0 }
 0x28a   : > { %v1429_v46 = vadd.f32 %v4855_v47, %v1428_v62  ;;  %v1492_v55 = vmax.f32 %v1426_v58, 0.0 }
 0x28b   : > { %v1495_v41 = vmax.f32 %v1437_v56, 0.0 }
 0x28c   : > { %v1493_v49 = vmax.f32 %v1429_v46, 0.0 }
 0x28d   : > { %v1515_v44 = vpack.c.bf16 %v1495_v41, %v1494_v54 }
 0x28e   : > { %v1514_v57 = vpack.c.bf16 %v1493_v49, %v1492_v55 }
 0x290   : > { %3834 = vmatprep.mubr.bf16.mxu1 %v1514_v57 }
 0x291   : > { %3835 = vmatmul.mubr.bf16.gmra.mrb[84].mxu1 %v1515_v44 }
 0x296   : > { %v3792_v60 = vpop.f32.mrb[88].mxu0 }
 0x297   : > { %v1450_v61 = vadd.f32 %v3792_v60, %v4855_v47  ;;  %v1441_v50 = vpop.f32.mrb[89].mxu0 }
 0x298   : > { %v1442_v63 = vadd.f32 %v4855_v47, %v1441_v50  ;;  %v3793_v51 = vpop.f32.mrb[90].mxu0 }
 0x299   : > { %v1453_v48 = vadd.f32 %v3793_v51, %v4855_v47  ;;  %v1444_v53 = vpop.f32.mrb[91].mxu0  ;;  %v1498_v52 = vmax.f32 %v1450_v61, 0.0 }
 0x29a   : > { %v1445_v1 = vadd.f32 %v4855_v47, %v1444_v53  ;;  %v1496_v3 = vmax.f32 %v1442_v63, 0.0  ;;  %v4233_v53 = vmov 0.0  }
 0x29b   : > { %v1499_v45 = vmax.f32 %v1453_v48, 0.0  ;;  %1778 = vst [vmem:[%s4582_s14] sm:$0xff] %v4233_v53  ;;  %1779 = vst [vmem:[%s4582_s14 + $0x8] sm:$0xff] %v4233_v53 }
 0x29c   : > { %v1497_v58 = vmax.f32 %v1445_v1, 0.0  ;;  %1780 = vst [vmem:[%s4582_s14 + $0x10] sm:$0xff] %v4233_v53  ;;  %1781 = vst [vmem:[%s4582_s14 + $0x18] sm:$0xff] %v4233_v53 }
 0x29d   : > { %v1517_v59 = vpack.c.bf16 %v1499_v45, %v1498_v52  ;;  %1782 = vst [vmem:[%s4582_s14 + $0x20] sm:$0xff] %v4233_v53  ;;  %1783 = vst [vmem:[%s4582_s14 + $0x28] sm:$0xff] %v4233_v53 }
 0x29e   : > { %v1516_v56 = vpack.c.bf16 %v1497_v58, %v1496_v3  ;;  %1784 = vst [vmem:[%s4582_s14 + $0x30] sm:$0xff] %v4233_v53  ;;  %1785 = vst [vmem:[%s4582_s14 + $0x38] sm:$0xff] %v4233_v53 }
 0x29f   : > { %1786 = vst [vmem:[%s4582_s14 + $0x40] sm:$0xff] %v4233_v53  ;;  %1787 = vst [vmem:[%s4582_s14 + $0x48] sm:$0xff] %v4233_v53 }
 0x2a0   : > { %3838 = vmatprep.mubr.bf16.mxu1 %v1516_v56  ;;  %1788 = vst [vmem:[%s4582_s14 + $0x50] sm:$0xff] %v4233_v53  ;;  %1789 = vst [vmem:[%s4582_s14 + $0x58] sm:$0xff] %v4233_v53 }
 0x2a1   : > { %3839 = vmatmul.mubr.bf16.gmra.mrb[88].mxu1 %v1517_v59  ;;  %1790 = vst [vmem:[%s4582_s14 + $0x60] sm:$0xff] %v4233_v53  ;;  %1791 = vst [vmem:[%s4582_s14 + $0x68] sm:$0xff] %v4233_v53 }
 0x2a2   : > { %1792 = vst [vmem:[%s4582_s14 + $0x70] sm:$0xff] %v4233_v53  ;;  %1793 = vst [vmem:[%s4582_s14 + $0x78] sm:$0xff] %v4233_v53 }
 0x2a3   : > { %1794 = vst [vmem:[%s4582_s14 + $0x80] sm:$0xff] %v4233_v53  ;;  %1795 = vst [vmem:[%s4582_s14 + $0x88] sm:$0xff] %v4233_v53 }
 0x2a4   : > { %1796 = vst [vmem:[%s4582_s14 + $0x90] sm:$0xff] %v4233_v53  ;;  %1797 = vst [vmem:[%s4582_s14 + $0x98] sm:$0xff] %v4233_v53 }
 0x2a5   : > { %1798 = vst [vmem:[%s4582_s14 + $0xa0] sm:$0xff] %v4233_v53  ;;  %1799 = vst [vmem:[%s4582_s14 + $0xa8] sm:$0xff] %v4233_v53 }
 0x2a6   : > { %v3796_v62 = vpop.f32.mrb[92].mxu0  ;;  %1800 = vst [vmem:[%s4582_s14 + $0xb0] sm:$0xff] %v4233_v53  ;;  %1801 = vst [vmem:[%s4582_s14 + $0xb8] sm:$0xff] %v4233_v53 }
 0x2a7   : > { %v1466_v46 = vadd.f32 %v3796_v62, %v4855_v47  ;;  %v1457_v54 = vpop.f32.mrb[93].mxu0  ;;  %1802 = vst [vmem:[%s4582_s14 + $0xc0] sm:$0xff] %v4233_v53  ;;  %1803 = vst [vmem:[%s4582_s14 + $0xc8] sm:$0xff] %v4233_v53 }
 0x2a8   : > { %v1458_v41 = vadd.f32 %v4855_v47, %v1457_v54  ;;  %v3797_v55 = vpop.f32.mrb[94].mxu0  ;;  %1804 = vst [vmem:[%s4582_s14 + $0xd0] sm:$0xff] %v4233_v53  ;;  %1805 = vst [vmem:[%s4582_s14 + $0xd8] sm:$0xff] %v4233_v53 }
 0x2a9   : > { %v1469_v49 = vadd.f32 %v3797_v55, %v4855_v47  ;;  %v1460_v44 = vpop.f32.mrb[95].mxu0  ;;  %v1502_v60 = vmax.f32 %v1466_v46, 0.0  ;;  %1806 = vst [vmem:[%s4582_s14 + $0xe0] sm:$0xff] %v4233_v53  ;;  %1807 = vst [vmem:[%s4582_s14 + $0xe8] sm:$0xff] %v4233_v53 }
 0x2aa   : > { %v1461_v57 = vadd.f32 %v4855_v47, %v1460_v44  ;;  %v1500_v50 = vmax.f32 %v1458_v41, 0.0  ;;  %1808 = vst [vmem:[%s4582_s14 + $0xf0] sm:$0xff] %v4233_v53  ;;  %1809 = vst [vmem:[%s4582_s14 + $0xf8] sm:$0xff] %v4233_v53 }
 0x2ab   : > { %v1503_v61 = vmax.f32 %v1469_v49, 0.0 }
 0x2ac   : > { %v1501_v63 = vmax.f32 %v1461_v57, 0.0 }
 0x2ad   : > { %v1519_v51 = vpack.c.bf16 %v1503_v61, %v1502_v60 }
 0x2ae   : > { %v1518_v48 = vpack.c.bf16 %v1501_v63, %v1500_v50 }
 0x2b0   : > { %3842 = vmatprep.mubr.bf16.mxu1 %v1518_v48 }
 0x2b1   : > { %3843 = vmatmul.mubr.bf16.gmra.mrb[92].mxu1 %v1519_v51 }
 0x314   : > { %v3816_v47 = vpop.f32.mrb[64].mxu1 }
 0x315   : > { %1748 = vst [vmem:[%s4923_s18 + $0x10] sm:$0xff] %v3816_v47  ;;  %v1618_v1 = vpop.f32.mrb[65].mxu1 }
 0x316   : > { %1746 = vst [vmem:[%s4923_s18] sm:$0xff] %v1618_v1  ;;  %v3817_v52 = vpop.f32.mrb[66].mxu1 }
 0x317   : > { %1749 = vst [vmem:[%s4923_s18 + $0x18] sm:$0xff] %v3817_v52  ;;  %v1621_v45 = vpop.f32.mrb[67].mxu1 }
 0x318   : > { %1747 = vst [vmem:[%s4923_s18 + $0x8] sm:$0xff] %v1621_v45 }
 0x324   : > { %v3820_v3 = vpop.f32.mrb[68].mxu1 }
 0x325   : > { %1752 = vst [vmem:[%s4923_s18 + $0x30] sm:$0xff] %v3820_v3  ;;  %v1634_v58 = vpop.f32.mrb[69].mxu1 }
 0x326   : > { %1750 = vst [vmem:[%s4923_s18 + $0x20] sm:$0xff] %v1634_v58  ;;  %v3821_v59 = vpop.f32.mrb[70].mxu1 }
 0x327   : > { %1753 = vst [vmem:[%s4923_s18 + $0x38] sm:$0xff] %v3821_v59  ;;  %v1637_v56 = vpop.f32.mrb[71].mxu1 }
 0x328   : > { %1751 = vst [vmem:[%s4923_s18 + $0x28] sm:$0xff] %v1637_v56 }
 0x334   : > { %v3824_v62 = vpop.f32.mrb[72].mxu1 }
 0x335   : > { %1756 = vst [vmem:[%s4923_s18 + $0x50] sm:$0xff] %v3824_v62  ;;  %v1650_v46 = vpop.f32.mrb[73].mxu1 }
 0x336   : > { %1754 = vst [vmem:[%s4923_s18 + $0x40] sm:$0xff] %v1650_v46  ;;  %v3825_v54 = vpop.f32.mrb[74].mxu1 }
 0x337   : > { %1757 = vst [vmem:[%s4923_s18 + $0x58] sm:$0xff] %v3825_v54  ;;  %v1653_v41 = vpop.f32.mrb[75].mxu1 }
 0x338   : > { %1755 = vst [vmem:[%s4923_s18 + $0x48] sm:$0xff] %v1653_v41 }
 0x344   : > { %v3828_v55 = vpop.f32.mrb[76].mxu1 }
 0x345   : > { %1760 = vst [vmem:[%s4923_s18 + $0x70] sm:$0xff] %v3828_v55  ;;  %v1666_v49 = vpop.f32.mrb[77].mxu1 }
 0x346   : > { %1758 = vst [vmem:[%s4923_s18 + $0x60] sm:$0xff] %v1666_v49  ;;  %v3829_v44 = vpop.f32.mrb[78].mxu1 }
 0x347   : > { %1761 = vst [vmem:[%s4923_s18 + $0x78] sm:$0xff] %v3829_v44  ;;  %v1669_v57 = vpop.f32.mrb[79].mxu1 }
 0x348   : > { %1759 = vst [vmem:[%s4923_s18 + $0x68] sm:$0xff] %v1669_v57 }
 0x354   : > { %v3832_v60 = vpop.f32.mrb[80].mxu1 }
 0x355   : > { %1764 = vst [vmem:[%s4923_s18 + $0x90] sm:$0xff] %v3832_v60  ;;  %v1682_v61 = vpop.f32.mrb[81].mxu1 }
 0x356   : > { %1762 = vst [vmem:[%s4923_s18 + $0x80] sm:$0xff] %v1682_v61  ;;  %v3833_v50 = vpop.f32.mrb[82].mxu1 }
 0x357   : > { %1765 = vst [vmem:[%s4923_s18 + $0x98] sm:$0xff] %v3833_v50  ;;  %v1685_v63 = vpop.f32.mrb[83].mxu1 }
 0x358   : > { %1763 = vst [vmem:[%s4923_s18 + $0x88] sm:$0xff] %v1685_v63 }
 0x364   : > { %v3836_v51 = vpop.f32.mrb[84].mxu1 }
 0x365   : > { %1768 = vst [vmem:[%s4923_s18 + $0xb0] sm:$0xff] %v3836_v51  ;;  %v1698_v48 = vpop.f32.mrb[85].mxu1 }
 0x366   : > { %1766 = vst [vmem:[%s4923_s18 + $0xa0] sm:$0xff] %v1698_v48  ;;  %v3837_v53 = vpop.f32.mrb[86].mxu1 }
 0x367   : > { %1769 = vst [vmem:[%s4923_s18 + $0xb8] sm:$0xff] %v3837_v53  ;;  %v1701_v47 = vpop.f32.mrb[87].mxu1 }
 0x368   : > { %1767 = vst [vmem:[%s4923_s18 + $0xa8] sm:$0xff] %v1701_v47 }
 0x374   : > { %v3840_v1 = vpop.f32.mrb[88].mxu1 }
 0x375   : > { %1772 = vst [vmem:[%s4923_s18 + $0xd0] sm:$0xff] %v3840_v1  ;;  %v1714_v52 = vpop.f32.mrb[89].mxu1 }
 0x376   : > { %1770 = vst [vmem:[%s4923_s18 + $0xc0] sm:$0xff] %v1714_v52  ;;  %v3841_v45 = vpop.f32.mrb[90].mxu1 }
 0x377   : > { %1773 = vst [vmem:[%s4923_s18 + $0xd8] sm:$0xff] %v3841_v45  ;;  %v1717_v3 = vpop.f32.mrb[91].mxu1 }
 0x378   : > { %1771 = vst [vmem:[%s4923_s18 + $0xc8] sm:$0xff] %v1717_v3 }
 0x384   : > { %v3844_v58 = vpop.f32.mrb[92].mxu1 }
 0x385   : > { %1776 = vst [vmem:[%s4923_s18 + $0xf0] sm:$0xff] %v3844_v58  ;;  %v1730_v59 = vpop.f32.mrb[93].mxu1 }
 0x386   : > { %1774 = vst [vmem:[%s4923_s18 + $0xe0] sm:$0xff] %v1730_v59  ;;  %v3845_v56 = vpop.f32.mrb[94].mxu1 }
 0x387   : > { %1777 = vst [vmem:[%s4923_s18 + $0xf8] sm:$0xff] %v3845_v56  ;;  %v1733_v62 = vpop.f32.mrb[95].mxu1 }
 0x388   : > { %1775 = vst [vmem:[%s4923_s18 + $0xe8] sm:$0xff] %v1733_v62 }
 0x389 PF: > { %p3202_p8 = scmp.ne.s32.totalorder %s4216_s25, 1 }
 0x38b   : > { %1813 = sbr.rel (%p3202_p8) target bundleno = 1610 (0x64a), region = 56 }
 0x392   : > { %v1830_v46 = vld [vmem:[#allocation2 + $0x80] sm:$0xff]  ;;  %v1831_v54 = vld [vmem:[#allocation2 + $0x88] sm:$0xff]  ;;  %v3205_v55 = vcombine.high %v4390_v0, %v4396_v2  ;;  %v1832_v1 = vld [vmem:[#allocation2 + $0x90] sm:$0xff] }
 0x393   : > { %v1862_v41 = vld [vmem:[#allocation2 + $0x180] sm:$0xff]  ;;  %v5790_v49 = vld [vmem:[#allocation11_spill] sm:$0xff]  ;;  %v1886_v60 = vpack.c.bf16 %v1831_v54, %v1830_v46  ;;  %v1833_v45 = vld [vmem:[#allocation2 + $0x98] sm:$0xff] }
 0x394   : > { %v5791_v44 = vld [vmem:[#allocation10_spill] sm:$0xff]  ;;  %v1863_v61 = vld [vmem:[#allocation2 + $0x188] sm:$0xff]  ;;  %2269 = vmatprep.mubr.bf16.mxu0 %v3205_v55  ;;  %v1864_v3 = vld [vmem:[#allocation2 + $0x190] sm:$0xff]  ;;  %v1887_v59 = vpack.c.bf16 %v1833_v45, %v1832_v1 }
 0x395   : > { %v3207_v57 = vcombine.high %v5791_v44, %v5790_v49  ;;  %v1814_v50 = vld [vmem:[#allocation2] sm:$0xff]  ;;  %v1815_v63 = vld [vmem:[#allocation2 + $0x8] sm:$0xff]  ;;  %v1902_v51 = vpack.c.bf16 %v1863_v61, %v1862_v41  ;;  %3540 = vmatprep.subr.bf16.mxu0 %v1886_v60  ;;  %v1865_v58 = vld [vmem:[#allocation2 + $0x198] sm:$0xff] }
 0x396   : > { %v1878_v48 = vpack.c.bf16 %v1815_v63, %v1814_v50  ;;  %v1846_v53 = vld [vmem:[#allocation2 + $0x100] sm:$0xff]  ;;  %v1847_v47 = vld [vmem:[#allocation2 + $0x108] sm:$0xff]  ;;  %v1903_v56 = vpack.c.bf16 %v1865_v58, %v1864_v3  ;;  %v1816_v62 = vld [vmem:[#allocation2 + $0x10] sm:$0xff] }
 0x397   : > { %2430 = vmatprep.mubr.bf16.mxu1 %v3207_v57  ;;  %v1894_v52 = vpack.c.bf16 %v1847_v47, %v1846_v53  ;;  %3652 = vmatprep.subr.bf16.mxu1 %v1902_v51  ;;  %v1817_v46 = vld [vmem:[#allocation2 + $0x18] sm:$0xff]  ;;  %v1848_v54 = vld [vmem:[#allocation2 + $0x110] sm:$0xff]  ;;  %v1834_v50 = vld [vmem:[#allocation2 + $0xa0] sm:$0xff] }
 0x398   : > { %3541 = vmatpush3.bf16.msra.mxu0 %v1878_v48  ;;  %v1879_v41 = vpack.c.bf16 %v1817_v46, %v1816_v62  ;;  %v1849_v61 = vld [vmem:[#allocation2 + $0x118] sm:$0xff]  ;;  %v1835_v63 = vld [vmem:[#allocation2 + $0xa8] sm:$0xff]  ;;  %v1866_v60 = vld [vmem:[#allocation2 + $0x1a0] sm:$0xff] }
 0x399   : > { %3653 = vmatpush3.bf16.msra.mxu1 %v1894_v52  ;;  %3542 = vmatprep.subr.bf16.mxu0 %v1887_v59  ;;  %v1895_v55 = vpack.c.bf16 %v1849_v61, %v1848_v54  ;;  %v1888_v57 = vpack.c.bf16 %v1835_v63, %v1834_v50  ;;  %v1867_v53 = vld [vmem:[#allocation2 + $0x1a8] sm:$0xff]  ;;  %v1818_v47 = vld [vmem:[#allocation2 + $0x20] sm:$0xff]  ;;  %v1836_v3 = vld [vmem:[#allocation2 + $0xb0] sm:$0xff] }
 0x39a   : > { %3654 = vmatprep.subr.bf16.mxu1 %v1903_v56  ;;  %v1904_v43 = vpack.c.bf16 %v1867_v53, %v1866_v60  ;;  %v1819_v51 = vld [vmem:[#allocation2 + $0x28] sm:$0xff]  ;;  %v1850_v48 = vld [vmem:[#allocation2 + $0x120] sm:$0xff]  ;;  %v1837_v58 = vld [vmem:[#allocation2 + $0xb8] sm:$0xff] }
 0x39b   : > { %v1851_v1 = vld [vmem:[#allocation2 + $0x128] sm:$0xff]  ;;  %v1880_v45 = vpack.c.bf16 %v1819_v51, %v1818_v47  ;;  %v1868_v52 = vld [vmem:[#allocation2 + $0x1b0] sm:$0xff]  ;;  %v1889_v46 = vpack.c.bf16 %v1837_v58, %v1836_v3  ;;  %v1869_v59 = vld [vmem:[#allocation2 + $0x1b8] sm:$0xff] }
 0x39c   : > { %3543 = vmatpush3.bf16.msra.mxu0 %v1879_v41  ;;  %v1896_v62 = vpack.c.bf16 %v1851_v1, %v1850_v48  ;;  %v1820_v56 = vld [vmem:[#allocation2 + $0x30] sm:$0xff]  ;;  %v1821_v54 = vld [vmem:[#allocation2 + $0x38] sm:$0xff]  ;;  %v1905_v61 = vpack.c.bf16 %v1869_v59, %v1868_v52  ;;  %v1838_v60 = vld [vmem:[#allocation2 + $0xc0] sm:$0xff] }
 0x39d   : > { %3655 = vmatpush3.bf16.msra.mxu1 %v1895_v55  ;;  %3544 = vmatprep.subr.bf16.mxu0 %v1888_v57  ;;  %v1852_v50 = vld [vmem:[#allocation2 + $0x130] sm:$0xff]  ;;  %v1853_v63 = vld [vmem:[#allocation2 + $0x138] sm:$0xff]  ;;  %v1839_v53 = vld [vmem:[#allocation2 + $0xc8] sm:$0xff]  ;;  %v1881_v41 = vpack.c.bf16 %v1821_v54, %v1820_v56 }
 0x39e   : > { %3656 = vmatprep.subr.bf16.mxu1 %v1904_v43  ;;  %v1870_v40 = vld [vmem:[#allocation2 + $0x1c0] sm:$0xff]  ;;  %v1871_v42 = vld [vmem:[#allocation2 + $0x1c8] sm:$0xff]  ;;  %v1897_v47 = vpack.c.bf16 %v1853_v63, %v1852_v50  ;;  %v1890_v55 = vpack.c.bf16 %v1839_v53, %v1838_v60  ;;  %v1840_v43 = vld [vmem:[#allocation2 + $0xd0] sm:$0xff] }
 0x39f   : > { %v1822_v57 = vld [vmem:[#allocation2 + $0x40] sm:$0xff]  ;;  %v1823_v51 = vld [vmem:[#allocation2 + $0x48] sm:$0xff]  ;;  %v1906_v1 = vpack.c.bf16 %v1871_v42, %v1870_v40  ;;  %v1841_v58 = vld [vmem:[#allocation2 + $0xd8] sm:$0xff] }
 0x3a0   : > { %3545 = vmatpush3.bf16.msra.mxu0 %v1880_v45  ;;  %v1854_v48 = vld [vmem:[#allocation2 + $0x140] sm:$0xff]  ;;  %v1855_v3 = vld [vmem:[#allocation2 + $0x148] sm:$0xff]  ;;  %v1872_v52 = vld [vmem:[#allocation2 + $0x1d0] sm:$0xff]  ;;  %v1882_v37 = vpack.c.bf16 %v1823_v51, %v1822_v57  ;;  %v1891_v56 = vpack.c.bf16 %v1841_v58, %v1840_v43 }
 0x3a1   : > { %3657 = vmatpush3.bf16.msra.mxu1 %v1896_v62  ;;  %3546 = vmatprep.subr.bf16.mxu0 %v1889_v46  ;;  %v1873_v59 = vld [vmem:[#allocation2 + $0x1d8] sm:$0xff]  ;;  %v1898_v45 = vpack.c.bf16 %v1855_v3, %v1854_v48  ;;  %v1824_v62 = vld [vmem:[#allocation2 + $0x50] sm:$0xff]  ;;  %v1842_v60 = vld [vmem:[#allocation2 + $0xe0] sm:$0xff] }
 0x3a2   : > { %3658 = vmatprep.subr.bf16.mxu1 %v1905_v61  ;;  %v1825_v46 = vld [vmem:[#allocation2 + $0x58] sm:$0xff]  ;;  %v1856_v54 = vld [vmem:[#allocation2 + $0x150] sm:$0xff]  ;;  %v1907_v50 = vpack.c.bf16 %v1873_v59, %v1872_v52  ;;  %v1843_v61 = vld [vmem:[#allocation2 + $0xe8] sm:$0xff] }
 0x3a3   : > { %v1857_v63 = vld [vmem:[#allocation2 + $0x158] sm:$0xff]  ;;  %v1874_v40 = vld [vmem:[#allocation2 + $0x1e0] sm:$0xff]  ;;  %v1875_v42 = vld [vmem:[#allocation2 + $0x1e8] sm:$0xff]  ;;  %v1883_v53 = vpack.c.bf16 %v1825_v46, %v1824_v62  ;;  %v1892_v57 = vpack.c.bf16 %v1843_v61, %v1842_v60  ;;  %v3204_v61 = vcombine.low %v4390_v0, %v4396_v2  ;;  %v3210_v0 = vcombine.low %v4405_v5, %v4411_v7 }
 0x3a4   : > { %3547 = vmatpush3.bf16.msra.mxu0 %v1881_v41  ;;  %v1899_v41 = vpack.c.bf16 %v1857_v63, %v1856_v54  ;;  %v1858_v51 = vld [vmem:[#allocation2 + $0x160] sm:$0xff]  ;;  %v1908_v48 = vpack.c.bf16 %v1875_v42, %v1874_v40  ;;  %v1859_v3 = vld [vmem:[#allocation2 + $0x168] sm:$0xff]  ;;  %v1844_v43 = vld [vmem:[#allocation2 + $0xf0] sm:$0xff]  ;;  %v3206_v40 = vcombine.low %v5791_v44, %v5790_v49  ;;  %v3209_v42 = vcombine.high %v4402_v4, %v4408_v6 }
 0x3a5   : > { %3659 = vmatpush3.bf16.msra.mxu1 %v1897_v47  ;;  %3548 = vmatprep.subr.bf16.mxu0 %v1890_v55  ;;  %v1826_v47 = vld [vmem:[#allocation2 + $0x60] sm:$0xff]  ;;  %v1827_v55 = vld [vmem:[#allocation2 + $0x68] sm:$0xff]  ;;  %v1876_v58 = vld [vmem:[#allocation2 + $0x1f0] sm:$0xff]  ;;  %v3213_v2 = vcombine.high %v4414_v8, %v4420_v10  ;;  %v3215_v49 = vcombine.high %v4417_v9, %v4423_v11  ;;  %v3212_v44 = vcombine.low %v4414_v8, %v4420_v10 }
 0x3a6   : > { %3660 = vmatprep.subr.bf16.mxu1 %v1906_v1  ;;  %v1845_v1 = vld [vmem:[#allocation2 + $0xf8] sm:$0xff]  ;;  %v1884_v59 = vpack.c.bf16 %v1827_v55, %v1826_v47  ;;  %v1860_v54 = vld [vmem:[#allocation2 + $0x170] sm:$0xff]  ;;  %v3221_v8 = vcombine.high %v4438_v16, %v4444_v18  ;;  %v3220_v10 = vcombine.low %v4438_v16, %v4444_v18  ;;  %v3229_v16 = vcombine.high %v4462_v24, %v4468_v26 }
 0x3a7   : > { %v1877_v52 = vld [vmem:[#allocation2 + $0x1f8] sm:$0xff]  ;;  %v1893_v62 = vpack.c.bf16 %v1845_v1, %v1844_v43  ;;  %v3228_v18 = vcombine.low %v4462_v24, %v4468_v26  ;;  %v3237_v24 = vcombine.high %v4486_v32, %v4492_v34  ;;  %v3236_v26 = vcombine.low %v4486_v32, %v4492_v34  ;;  %v5793_v32 = vld [vmem:[#allocation15_spill] sm:$0xff]  ;;  %v5800_v1 = vld [vmem:[#allocation18_spill] sm:$0xff] }
 0x3a8   : > { %3549 = vmatpush3.bf16.msra.mxu0 %v1882_v37  ;;  %v1900_v37 = vpack.c.bf16 %v1859_v3, %v1858_v51  ;;  %v1909_v46 = vpack.c.bf16 %v1877_v52, %v1876_v58  ;;  %v1861_v63 = vld [vmem:[#allocation2 + $0x178] sm:$0xff] }
 0x3a9   : > { %3661 = vmatpush3.bf16.msra.mxu1 %v1898_v45  ;;  %3550 = vmatprep.subr.bf16.mxu0 %v1891_v56  ;;  %v1828_v45 = vld [vmem:[#allocation2 + $0x70] sm:$0xff]  ;;  %v1829_v56 = vld [vmem:[#allocation2 + $0x78] sm:$0xff]  ;;  %v1901_v60 = vpack.c.bf16 %v1861_v63, %v1860_v54 }
 0x3aa   : > { %3662 = vmatprep.subr.bf16.mxu1 %v1907_v50  ;;  %v1885_v50 = vpack.c.bf16 %v1829_v56, %v1828_v45  ;;  %v5794_v34 = vld [vmem:[#allocation13_spill] sm:$0xff]  ;;  %v5803_v56 = vld [vmem:[#allocation24_spill] sm:$0xff] }
 0x3ab   : > { %v3245_v55 = vcombine.high %v5794_v34, %v5793_v32 }
 0x3ac   : > { %3551 = vmatpush3.bf16.msra.mxu0 %v1883_v53  ;;  %v3211_v53 = vcombine.high %v4405_v5, %v4411_v7  ;;  %v3219_v5 = vcombine.high %v4429_v13, %v4435_v15  ;;  %v3218_v7 = vcombine.low %v4429_v13, %v4435_v15  ;;  %v3227_v13 = vcombine.high %v4453_v21, %v4459_v23 }
 0x3ad   : > { %3663 = vmatpush3.bf16.msra.mxu1 %v1899_v41  ;;  %3552 = vmatprep.subr.bf16.mxu0 %v1892_v57  ;;  %v3208_v41 = vcombine.low %v4402_v4, %v4408_v6  ;;  %v3214_v57 = vcombine.low %v4417_v9, %v4423_v11  ;;  %v3217_v4 = vcombine.high %v4426_v12, %v4432_v14 }
 0x3ae   : > { %3664 = vmatprep.subr.bf16.mxu1 %v1908_v48  ;;  %v3216_v6 = vcombine.low %v4426_v12, %v4432_v14  ;;  %v3223_v9 = vcombine.high %v4441_v17, %v4447_v19  ;;  %v3222_v11 = vcombine.low %v4441_v17, %v4447_v19  ;;  %v3225_v12 = vcombine.high %v4450_v20, %v4456_v22 }
 0x3af   : > { %v3224_v14 = vcombine.low %v4450_v20, %v4456_v22  ;;  %v3226_v15 = vcombine.low %v4453_v21, %v4459_v23  ;;  %v3231_v17 = vcombine.high %v4465_v25, %v4471_v27  ;;  %v3230_v19 = vcombine.low %v4465_v25, %v4471_v27 }
 0x3b0   : > { %3553 = vmatpush3.bf16.msra.mxu0 %v1884_v59  ;;  %v3233_v20 = vcombine.high %v4474_v28, %v4480_v30  ;;  %v3235_v21 = vcombine.high %v4477_v29, %v4483_v31  ;;  %v3232_v22 = vcombine.low %v4474_v28, %v4480_v30  ;;  %v3234_v23 = vcombine.low %v4477_v29, %v4483_v31  ;;  %v5792_v29 = vld [vmem:[#allocation12_spill] sm:$0xff] }
 0x3b1   : > { %3665 = vmatpush3.bf16.msra.mxu1 %v1900_v37  ;;  %3554 = vmatprep.subr.bf16.mxu0 %v1893_v62  ;;  %v3239_v25 = vcombine.high %v4489_v33, %v4495_v35  ;;  %v3238_v27 = vcombine.low %v4489_v33, %v4495_v35  ;;  %v3241_v28 = vcombine.high %v4498_v36, %v4504_v38  ;;  %v5795_v33 = vld [vmem:[#allocation16_spill] sm:$0xff]  ;;  %v5796_v35 = vld [vmem:[#allocation14_spill] sm:$0xff]  ;;  %v5801_v37 = vld [vmem:[#allocation23_spill] sm:$0xff] }
 0x3b2   : > { %3666 = vmatprep.subr.bf16.mxu1 %v1909_v46  ;;  %v3243_v30 = vcombine.high %v5792_v29, %v4507_v39  ;;  %v3240_v31 = vcombine.low %v4498_v36, %v4504_v38  ;;  %v3242_v47 = vcombine.low %v5792_v29, %v4507_v39  ;;  %v3247_v51 = vcombine.high %v5796_v35, %v5795_v33  ;;  %v5797_v36 = vld [vmem:[#allocation19_spill] sm:$0xff]  ;;  %v5798_v38 = vld [vmem:[#allocation17_spill] sm:$0xff]  ;;  %v5799_v39 = vld [vmem:[#allocation20_spill] sm:$0xff] }
 0x3b3   : > { %v3244_v48 = vcombine.low %v5794_v34, %v5793_v32  ;;  %v3246_v3 = vcombine.low %v5796_v35, %v5795_v33  ;;  %v3249_v43 = vcombine.high %v5798_v38, %v5797_v36  ;;  %v3251_v58 = vcombine.high %v5800_v1, %v5799_v39  ;;  %v5802_v62 = vld [vmem:[#allocation21_spill] sm:$0xff]  ;;  %v5804_v46 = vld [vmem:[#allocation22_spill] sm:$0xff] }
 0x3b4   : > { %3555 = vmatpush3.bf16.msra.mxu0 %v1885_v50  ;;  %v3248_v52 = vcombine.low %v5798_v38, %v5797_v36  ;;  %v3250_v59 = vcombine.low %v5800_v1, %v5799_v39  ;;  %v3253_v45 = vcombine.high %v5802_v62, %v5801_v37  ;;  %v3255_v54 = vcombine.high %v5804_v46, %v5803_v56 }
 0x3b5   : > { %3667 = vmatpush3.bf16.msra.mxu1 %v1901_v60  ;;  %v3252_v63 = vcombine.low %v5802_v62, %v5801_v37  ;;  %v3254_v50 = vcombine.low %v5804_v46, %v5803_v56  ;;  %v5805_v60 = vld [vmem:[#allocation27_spill] sm:$0xff] }
 0x3b7   : > { %2270 = vmatmul.mubr.bf16.vlgmr.msra.gmra.mrb[0].mxu0 %v3204_v61  ;;  %v5806_v61 = vld [vmem:[#allocation25_spill] sm:$0xff] }
 0x3b8   : > { %2431 = vmatmul.mubr.bf16.vlgmr.msra.gmra.mrb[0].mxu1 %v3206_v40  ;;  %2277 = vmatprep.mubr.bf16.mxu0 %v3209_v42  ;;  %v3257_v40 = vcombine.high %v5806_v61, %v5805_v60  ;;  %v5807_v42 = vld [vmem:[#allocation28_spill] sm:$0xff] }
 0x3b9   : > { %2438 = vmatprep.mubr.bf16.mxu1 %v3211_v53  ;;  %v5808_v53 = vld [vmem:[#allocation26_spill] sm:$0xff] }
 0x3bf   : > { %2278 = vmatmul.mubr.bf16.gmra.mrb[4].mxu0 %v3208_v41  ;;  %v3259_v41 = vcombine.high %v5808_v53, %v5807_v42 }
 0x3c0   : > { %2439 = vmatmul.mubr.bf16.gmra.mrb[4].mxu1 %v3210_v0  ;;  %2285 = vmatprep.mubr.bf16.mxu0 %v3213_v2  ;;  %v3256_v0 = vcombine.low %v5806_v61, %v5805_v60  ;;  %v3258_v2 = vcombine.low %v5808_v53, %v5807_v42 }
 0x3c1   : > { %2446 = vmatprep.mubr.bf16.mxu1 %v3215_v49  ;;  %v5809_v49 = vld [vmem:[#allocation31_spill] sm:$0xff] }
 0x3c7   : > { %2286 = vmatmul.mubr.bf16.gmra.mrb[8].mxu0 %v3212_v44  ;;  %v5810_v44 = vld [vmem:[#allocation29_spill] sm:$0xff] }
 0x3c8   : > { %2447 = vmatmul.mubr.bf16.gmra.mrb[8].mxu1 %v3214_v57  ;;  %2293 = vmatprep.mubr.bf16.mxu0 %v3217_v4  ;;  %v3261_v57 = vcombine.high %v5810_v44, %v5809_v49  ;;  %v5811_v4 = vld [vmem:[#allocation32_spill] sm:$0xff] }
 0x3c9   : > { %2454 = vmatprep.mubr.bf16.mxu1 %v3219_v5  ;;  %v5812_v5 = vld [vmem:[#allocation30_spill] sm:$0xff] }
 0x3cf   : > { %2294 = vmatmul.mubr.bf16.gmra.mrb[12].mxu0 %v3216_v6  ;;  %v3263_v6 = vcombine.high %v5812_v5, %v5811_v4 }
 0x3d0   : > { %2455 = vmatmul.mubr.bf16.gmra.mrb[12].mxu1 %v3218_v7  ;;  %2301 = vmatprep.mubr.bf16.mxu0 %v3221_v8  ;;  %v3260_v7 = vcombine.low %v5810_v44, %v5809_v49  ;;  %v3262_v8 = vcombine.low %v5812_v5, %v5811_v4 }
 0x3d1   : > { %2462 = vmatprep.mubr.bf16.mxu1 %v3223_v9  ;;  %v5813_v9 = vld [vmem:[#allocation35_spill] sm:$0xff] }
 0x3d7   : > { %2302 = vmatmul.mubr.bf16.gmra.mrb[16].mxu0 %v3220_v10  ;;  %v5814_v10 = vld [vmem:[#allocation33_spill] sm:$0xff] }
 0x3d8   : > { %2463 = vmatmul.mubr.bf16.gmra.mrb[16].mxu1 %v3222_v11  ;;  %2309 = vmatprep.mubr.bf16.mxu0 %v3225_v12  ;;  %v3265_v11 = vcombine.high %v5814_v10, %v5813_v9  ;;  %v5815_v12 = vld [vmem:[#allocation36_spill] sm:$0xff] }
 0x3d9   : > { %2470 = vmatprep.mubr.bf16.mxu1 %v3227_v13  ;;  %v5816_v13 = vld [vmem:[#allocation34_spill] sm:$0xff] }
 0x3df   : > { %2310 = vmatmul.mubr.bf16.gmra.mrb[20].mxu0 %v3224_v14  ;;  %v3267_v14 = vcombine.high %v5816_v13, %v5815_v12 }
 0x3e0   : > { %2471 = vmatmul.mubr.bf16.gmra.mrb[20].mxu1 %v3226_v15  ;;  %2317 = vmatprep.mubr.bf16.mxu0 %v3229_v16  ;;  %v3264_v15 = vcombine.low %v5814_v10, %v5813_v9  ;;  %v3266_v16 = vcombine.low %v5816_v13, %v5815_v12 }
 0x3e1   : > { %2478 = vmatprep.mubr.bf16.mxu1 %v3231_v17  ;;  %v2559_v17 = vlaneseq }
 0x3e7   : > { %2318 = vmatmul.mubr.bf16.gmra.mrb[24].mxu0 %v3228_v18 }
 0x3e8   : > { %2479 = vmatmul.mubr.bf16.gmra.mrb[24].mxu1 %v3230_v19  ;;  %2325 = vmatprep.mubr.bf16.mxu0 %v3233_v20  ;;  %v5089_v20 = vld [vmem:[%s5674_s5] ss:$0 sm:$0xff] }
 0x3e9   : > { %2486 = vmatprep.mubr.bf16.mxu1 %v3235_v21 }
 0x3ef   : > { %2326 = vmatmul.mubr.bf16.gmra.mrb[28].mxu0 %v3232_v22  ;;  %v5091_v22 = vand.u32 127, %v2559_v17 }
 0x3f0   : > { %2487 = vmatmul.mubr.bf16.gmra.mrb[28].mxu1 %v3234_v23  ;;  %2333 = vmatprep.mubr.bf16.mxu0 %v3237_v24 }
 0x3f1   : > { %2494 = vmatprep.mubr.bf16.mxu1 %v3239_v25  ;;  %vm2561_vm1 = vcmp.lt.s32.totalorder %v5091_v22, 8 }
 0x3f7   : > { %2334 = vmatmul.mubr.bf16.gmra.mrb[32].mxu0 %v3236_v26 }
 0x3f8   : > { %2495 = vmatmul.mubr.bf16.gmra.mrb[32].mxu1 %v3238_v27  ;;  %2341 = vmatprep.mubr.bf16.mxu0 %v3241_v28 }
 0x3f9   : > { %2502 = vmatprep.mubr.bf16.mxu1 %v3243_v30 }
 0x3ff   : > { %2342 = vmatmul.mubr.bf16.gmra.mrb[36].mxu0 %v3240_v31 }
 0x400   : > { %2503 = vmatmul.mubr.bf16.gmra.mrb[36].mxu1 %v3242_v47  ;;  %2349 = vmatprep.mubr.bf16.mxu0 %v3245_v55 }
 0x401   : > { %2510 = vmatprep.mubr.bf16.mxu1 %v3247_v51 }
 0x407   : > { %2350 = vmatmul.mubr.bf16.gmra.mrb[40].mxu0 %v3244_v48 }
 0x408   : > { %2511 = vmatmul.mubr.bf16.gmra.mrb[40].mxu1 %v3246_v3  ;;  %2357 = vmatprep.mubr.bf16.mxu0 %v3249_v43 }
 0x409   : > { %2518 = vmatprep.mubr.bf16.mxu1 %v3251_v58 }
 0x40f   : > { %2358 = vmatmul.mubr.bf16.gmra.mrb[44].mxu0 %v3248_v52 }
 0x410   : > { %2519 = vmatmul.mubr.bf16.gmra.mrb[44].mxu1 %v3250_v59  ;;  %2365 = vmatprep.mubr.bf16.mxu0 %v3253_v45 }
 0x411   : > { %2526 = vmatprep.mubr.bf16.mxu1 %v3255_v54 }
 0x417   : > { %2366 = vmatmul.mubr.bf16.gmra.mrb[48].mxu0 %v3252_v63 }
 0x418   : > { %2527 = vmatmul.mubr.bf16.gmra.mrb[48].mxu1 %v3254_v50  ;;  %2373 = vmatprep.mubr.bf16.mxu0 %v3257_v40 }
 0x419   : > { %2534 = vmatprep.mubr.bf16.mxu1 %v3259_v41 }
 0x41f   : > { %2374 = vmatmul.mubr.bf16.gmra.mrb[52].mxu0 %v3256_v0 }
 0x420   : > { %2535 = vmatmul.mubr.bf16.gmra.mrb[52].mxu1 %v3258_v2  ;;  %2381 = vmatprep.mubr.bf16.mxu0 %v3261_v57 }
 0x421   : > { %2542 = vmatprep.mubr.bf16.mxu1 %v3263_v6 }
 0x427   : > { %2382 = vmatmul.mubr.bf16.gmra.mrb[56].mxu0 %v3260_v7 }
 0x428   : > { %2543 = vmatmul.mubr.bf16.gmra.mrb[56].mxu1 %v3262_v8  ;;  %2389 = vmatprep.mubr.bf16.mxu0 %v3265_v11 }
 0x429   : > { %2550 = vmatprep.mubr.bf16.mxu1 %v3267_v14 }
 0x42f   : > { %2390 = vmatmul.mubr.bf16.gmra.mrb[60].mxu0 %v3264_v15 }
 0x430   : > { %2551 = vmatmul.mubr.bf16.gmra.mrb[60].mxu1 %v3266_v16 }
 0x48a   : > { %v3556_v18 = vpop.f32.mrb[0].mxu0 }
 0x48b   : > { %v3668_v19 = vpop.f32.mrb[0].mxu1  ;;  %v3557_v21 = vpop.f32.mrb[1].mxu0 }
 0x48c   : > { %v3558_v23 = vadd.f32 %v3557_v21, %v3556_v18  ;;  %v3669_v24 = vpop.f32.mrb[1].mxu1  ;;  %v3559_v25 = vpop.f32.mrb[2].mxu0 }
 0x48d   : > { %v3670_v26 = vadd.f32 %v3669_v24, %v3668_v19  ;;  %v3671_v27 = vpop.f32.mrb[2].mxu1  ;;  %v3560_v28 = vpop.f32.mrb[3].mxu0 }
 0x48e   : > { %v2272_v29 = vadd.f32 %v3558_v23, %v5089_v20  ;;  %v3561_v30 = vadd.f32 %v3560_v28, %v3559_v25  ;;  %v3672_v31 = vpop.f32.mrb[3].mxu1 }
 0x48f   : > { %v3673_v47 = vadd.f32 %v3672_v31, %v3671_v27 }
 0x490   : > { %v2275_v32 = vadd.f32 %v3561_v30, %v5089_v20  ;;  %v5096_v34 = vadd.f32 %v3670_v26, %v2272_v29 }
 0x492   : > { %v3562_v55 = vpop.f32.mrb[4].mxu0  ;;  %v5101_v33 = vsel %vm2561_vm1, %v5096_v34, -1e+30  ;;  %v5103_v35 = vadd.f32 %v3673_v47, %v2275_v32 }
 0x493   : > { %v3674_v51 = vpop.f32.mrb[4].mxu1  ;;  %v3563_v48 = vpop.f32.mrb[5].mxu0  ;;  %2594 = vmax.xlane.f32.xlu0 %v5101_v33 }
 0x494   : > { %v3564_v3 = vadd.f32 %v3563_v48, %v3562_v55  ;;  %v3675_v36 = vpop.f32.mrb[5].mxu1  ;;  %v3565_v38 = vpop.f32.mrb[6].mxu0  ;;  %v5110_v37 = vsel %vm2561_vm1, %v5103_v35, -1e+30 }
 0x495   : > { %v3676_v43 = vadd.f32 %v3675_v36, %v3674_v51  ;;  %v3677_v39 = vpop.f32.mrb[6].mxu1  ;;  %v3566_v1 = vpop.f32.mrb[7].mxu0 }
 0x496   : > { %v2280_v58 = vadd.f32 %v3564_v3, %v5089_v20  ;;  %v3567_v52 = vadd.f32 %v3566_v1, %v3565_v38  ;;  %v3678_v59 = vpop.f32.mrb[7].mxu1 }
 0x497   : > { %v3679_v62 = vadd.f32 %v3678_v59, %v3677_v39  ;;  %2596 = vmax.xlane.f32.xlu0 %v5110_v37 }
 0x498   : > { %v2283_v45 = vadd.f32 %v3567_v52, %v5089_v20  ;;  %v5114_v56 = vadd.f32 %v3676_v43, %v2280_v58 }
 0x49a   : > { %v3568_v46 = vpop.f32.mrb[8].mxu0  ;;  %v5119_v54 = vsel %vm2561_vm1, %v5114_v56, -1e+30  ;;  %v5121_v63 = vadd.f32 %v3679_v62, %v2283_v45 }
 0x49b   : > { %v3680_v50 = vpop.f32.mrb[8].mxu1  ;;  %v3569_v60 = vpop.f32.mrb[9].mxu0  ;;  %2598 = vmax.xlane.f32.xlu1 %v5119_v54 }
 0x49c   : > { %v3570_v61 = vadd.f32 %v3569_v60, %v3568_v46  ;;  %v3681_v40 = vpop.f32.mrb[9].mxu1  ;;  %v3571_v42 = vpop.f32.mrb[10].mxu0  ;;  %v5128_v57 = vsel %vm2561_vm1, %v5121_v63, -1e+30 }
 0x49d   : > { %v3682_v53 = vadd.f32 %v3681_v40, %v3680_v50  ;;  %v3683_v41 = vpop.f32.mrb[10].mxu1  ;;  %v3572_v0 = vpop.f32.mrb[11].mxu0 }
 0x49e   : > { %v2288_v2 = vadd.f32 %v3570_v61, %v5089_v20  ;;  %v3573_v49 = vadd.f32 %v3572_v0, %v3571_v42  ;;  %v3684_v44 = vpop.f32.mrb[11].mxu1 }
 0x49f   : > { %v3685_v4 = vadd.f32 %v3684_v44, %v3683_v41  ;;  %2600 = vmax.xlane.f32.xlu1 %v5128_v57 }
 0x4a0   : > { %v2291_v5 = vadd.f32 %v3573_v49, %v5089_v20  ;;  %v5132_v6 = vadd.f32 %v3682_v53, %v2288_v2 }
 0x4a2   : > { %v3574_v7 = vpop.f32.mrb[12].mxu0  ;;  %v5137_v8 = vsel %vm2561_vm1, %v5132_v6, -1e+30  ;;  %v5139_v9 = vadd.f32 %v3685_v4, %v2291_v5 }
 0x4a3   : > { %v3686_v10 = vpop.f32.mrb[12].mxu1  ;;  %v3575_v11 = vpop.f32.mrb[13].mxu0  ;;  %2602 = vmax.xlane.f32.xlu0 %v5137_v8 }
 0x4a4   : > { %v3576_v12 = vadd.f32 %v3575_v11, %v3574_v7  ;;  %v3687_v13 = vpop.f32.mrb[13].mxu1  ;;  %v3577_v14 = vpop.f32.mrb[14].mxu0  ;;  %v5145_v15 = vsel %vm2561_vm1, %v5139_v9, -1e+30 }
 0x4a5   : > { %v3688_v16 = vadd.f32 %v3687_v13, %v3686_v10  ;;  %v3689_v17 = vpop.f32.mrb[14].mxu1  ;;  %v3578_v18 = vpop.f32.mrb[15].mxu0  ;;  %2604 = vmax.xlane.f32.xlu1 %v5145_v15 }
 0x4a6   : > { %v2296_v19 = vadd.f32 %v3576_v12, %v5089_v20  ;;  %v3579_v21 = vadd.f32 %v3578_v18, %v3577_v14  ;;  %v3690_v23 = vpop.f32.mrb[15].mxu1 }
 0x4a7   : > { %v3691_v24 = vadd.f32 %v3690_v23, %v3689_v17 }
 0x4a8   : > { %v2299_v25 = vadd.f32 %v3579_v21, %v5089_v20  ;;  %v5150_v26 = vadd.f32 %v3688_v16, %v2296_v19 }
 0x4aa   : > { %v3580_v27 = vpop.f32.mrb[16].mxu0  ;;  %v5155_v28 = vsel %vm2561_vm1, %v5150_v26, -1e+30  ;;  %v5157_v29 = vadd.f32 %v3691_v24, %v2299_v25 }
 0x4ab   : > { %v3692_v30 = vpop.f32.mrb[16].mxu1  ;;  %v3581_v31 = vpop.f32.mrb[17].mxu0  ;;  %2606 = vmax.xlane.f32.xlu0 %v5155_v28 }
 0x4ac   : > { %v3582_v47 = vadd.f32 %v3581_v31, %v3580_v27  ;;  %v3693_v32 = vpop.f32.mrb[17].mxu1  ;;  %v3583_v55 = vpop.f32.mrb[18].mxu0  ;;  %v5163_v51 = vsel %vm2561_vm1, %v5157_v29, -1e+30 }
 0x4ad   : > { %v3694_v48 = vadd.f32 %v3693_v32, %v3692_v30  ;;  %v3695_v3 = vpop.f32.mrb[18].mxu1  ;;  %v3584_v36 = vpop.f32.mrb[19].mxu0  ;;  %2608 = vmax.xlane.f32.xlu1 %v5163_v51 }
 0x4ae   : > { %v2304_v38 = vadd.f32 %v3582_v47, %v5089_v20  ;;  %v3585_v43 = vadd.f32 %v3584_v36, %v3583_v55  ;;  %v3696_v39 = vpop.f32.mrb[19].mxu1 }
 0x4af   : > { %v3697_v1 = vadd.f32 %v3696_v39, %v3695_v3 }
 0x4b0   : > { %v2307_v58 = vadd.f32 %v3585_v43, %v5089_v20  ;;  %v5168_v52 = vadd.f32 %v3694_v48, %v2304_v38 }
 0x4b2   : > { %v3586_v59 = vpop.f32.mrb[20].mxu0  ;;  %v5173_v62 = vsel %vm2561_vm1, %v5168_v52, -1e+30  ;;  %v5175_v45 = vadd.f32 %v3697_v1, %v2307_v58 }
 0x4b3   : > { %v3698_v46 = vpop.f32.mrb[20].mxu1  ;;  %v3587_v50 = vpop.f32.mrb[21].mxu0  ;;  %2610 = vmax.xlane.f32.xlu0 %v5173_v62 }
 0x4b4   : > { %v3588_v60 = vadd.f32 %v3587_v50, %v3586_v59  ;;  %v3699_v61 = vpop.f32.mrb[21].mxu1  ;;  %v3589_v40 = vpop.f32.mrb[22].mxu0  ;;  %v5181_v42 = vsel %vm2561_vm1, %v5175_v45, -1e+30 }
 0x4b5   : > { %v3700_v53 = vadd.f32 %v3699_v61, %v3698_v46  ;;  %v3701_v41 = vpop.f32.mrb[22].mxu1  ;;  %v3590_v0 = vpop.f32.mrb[23].mxu0  ;;  %2612 = vmax.xlane.f32.xlu1 %v5181_v42 }
 0x4b6   : > { %v2312_v2 = vadd.f32 %v3588_v60, %v5089_v20  ;;  %v3591_v49 = vadd.f32 %v3590_v0, %v3589_v40  ;;  %v3702_v44 = vpop.f32.mrb[23].mxu1 }
 0x4b7   : > { %v3703_v4 = vadd.f32 %v3702_v44, %v3701_v41 }
 0x4b8   : > { %v2315_v5 = vadd.f32 %v3591_v49, %v5089_v20  ;;  %v5186_v7 = vadd.f32 %v3700_v53, %v2312_v2 }
 0x4ba   : > { %v3592_v10 = vpop.f32.mrb[24].mxu0  ;;  %v5191_v11 = vsel %vm2561_vm1, %v5186_v7, -1e+30  ;;  %v5193_v12 = vadd.f32 %v3703_v4, %v2315_v5 }
 0x4bb   : > { %v3704_v13 = vpop.f32.mrb[24].mxu1  ;;  %v3593_v14 = vpop.f32.mrb[25].mxu0  ;;  %2614 = vmax.xlane.f32.xlu0 %v5191_v11 }
 0x4bc   : > { %v3594_v16 = vadd.f32 %v3593_v14, %v3592_v10  ;;  %v3705_v17 = vpop.f32.mrb[25].mxu1  ;;  %v3595_v18 = vpop.f32.mrb[26].mxu0  ;;  %v5199_v19 = vsel %vm2561_vm1, %v5193_v12, -1e+30 }
 0x4bd   : > { %v3706_v21 = vadd.f32 %v3705_v17, %v3704_v13  ;;  %v3707_v23 = vpop.f32.mrb[26].mxu1  ;;  %v3596_v24 = vpop.f32.mrb[27].mxu0  ;;  %2616 = vmax.xlane.f32.xlu1 %v5199_v19 }
 0x4be   : > { %v2320_v25 = vadd.f32 %v3594_v16, %v5089_v20  ;;  %v3597_v27 = vadd.f32 %v3596_v24, %v3595_v18  ;;  %v3708_v30 = vpop.f32.mrb[27].mxu1 }
 0x4bf   : > { %v3709_v31 = vadd.f32 %v3708_v30, %v3707_v23 }
 0x4c0   : > { %v2323_v47 = vadd.f32 %v3597_v27, %v5089_v20  ;;  %v5204_v32 = vadd.f32 %v3706_v21, %v2320_v25 }
 0x4c2   : > { %v3598_v55 = vpop.f32.mrb[28].mxu0  ;;  %v5209_v48 = vsel %vm2561_vm1, %v5204_v32, -1e+30  ;;  %v5211_v3 = vadd.f32 %v3709_v31, %v2323_v47 }
 0x4c3   : > { %v3710_v36 = vpop.f32.mrb[28].mxu1  ;;  %v3599_v38 = vpop.f32.mrb[29].mxu0  ;;  %2618 = vmax.xlane.f32.xlu0 %v5209_v48 }
 0x4c4   : > { %v3600_v43 = vadd.f32 %v3599_v38, %v3598_v55  ;;  %v3711_v39 = vpop.f32.mrb[29].mxu1  ;;  %v3601_v1 = vpop.f32.mrb[30].mxu0  ;;  %v5217_v58 = vsel %vm2561_vm1, %v5211_v3, -1e+30 }
 0x4c5   : > { %v3712_v59 = vadd.f32 %v3711_v39, %v3710_v36  ;;  %v3713_v46 = vpop.f32.mrb[30].mxu1  ;;  %v3602_v50 = vpop.f32.mrb[31].mxu0  ;;  %2620 = vmax.xlane.f32.xlu1 %v5217_v58 }
 0x4c6   : > { %v2328_v60 = vadd.f32 %v3600_v43, %v5089_v20  ;;  %v3603_v61 = vadd.f32 %v3602_v50, %v3601_v1  ;;  %v3714_v40 = vpop.f32.mrb[31].mxu1 }
 0x4c7   : > { %v3715_v53 = vadd.f32 %v3714_v40, %v3713_v46 }
 0x4c8   : > { %v2331_v41 = vadd.f32 %v3603_v61, %v5089_v20  ;;  %v5222_v0 = vadd.f32 %v3712_v59, %v2328_v60 }
 0x4ca   : > { %v3604_v2 = vpop.f32.mrb[32].mxu0  ;;  %v5227_v49 = vsel %vm2561_vm1, %v5222_v0, -1e+30  ;;  %v5229_v44 = vadd.f32 %v3715_v53, %v2331_v41 }
 0x4cb   : > { %v3716_v4 = vpop.f32.mrb[32].mxu1  ;;  %v3605_v5 = vpop.f32.mrb[33].mxu0  ;;  %2622 = vmax.xlane.f32.xlu0 %v5227_v49 }
 0x4cc   : > { %v3606_v10 = vadd.f32 %v3605_v5, %v3604_v2  ;;  %v3717_v13 = vpop.f32.mrb[33].mxu1  ;;  %v3607_v14 = vpop.f32.mrb[34].mxu0  ;;  %v5235_v16 = vsel %vm2561_vm1, %v5229_v44, -1e+30 }
 0x4cd   : > { %v3718_v17 = vadd.f32 %v3717_v13, %v3716_v4  ;;  %v3719_v18 = vpop.f32.mrb[34].mxu1  ;;  %v3608_v21 = vpop.f32.mrb[35].mxu0  ;;  %2624 = vmax.xlane.f32.xlu1 %v5235_v16 }
 0x4ce   : > { %v2336_v23 = vadd.f32 %v3606_v10, %v5089_v20  ;;  %v3609_v24 = vadd.f32 %v3608_v21, %v3607_v14  ;;  %v3720_v25 = vpop.f32.mrb[35].mxu1 }
 0x4cf   : > { %v3721_v27 = vadd.f32 %v3720_v25, %v3719_v18 }
 0x4d0   : > { %v2339_v30 = vadd.f32 %v3609_v24, %v5089_v20  ;;  %v5240_v31 = vadd.f32 %v3718_v17, %v2336_v23 }
 0x4d2   : > { %v3610_v47 = vpop.f32.mrb[36].mxu0  ;;  %v5245_v55 = vsel %vm2561_vm1, %v5240_v31, -1e+30  ;;  %v5247_v36 = vadd.f32 %v3721_v27, %v2339_v30 }
 0x4d3   : > { %v3722_v38 = vpop.f32.mrb[36].mxu1  ;;  %v3611_v43 = vpop.f32.mrb[37].mxu0  ;;  %2626 = vmax.xlane.f32.xlu0 %v5245_v55 }
 0x4d4   : > { %5817 = vst [vmem:[#allocation37_spill] sm:$0xff] %v5247_v36  ;;  %v3612_v39 = vadd.f32 %v3611_v43, %v3610_v47  ;;  %v3723_v1 = vpop.f32.mrb[37].mxu1  ;;  %v3613_v59 = vpop.f32.mrb[38].mxu0  ;;  %v5253_v46 = vsel %vm2561_vm1, %v5247_v36, -1e+30 }
 0x4d5   : > { %v3724_v50 = vadd.f32 %v3723_v1, %v3722_v38  ;;  %v3725_v60 = vpop.f32.mrb[38].mxu1  ;;  %v3614_v61 = vpop.f32.mrb[39].mxu0  ;;  %2628 = vmax.xlane.f32.xlu1 %v5253_v46 }
 0x4d6   : > { %v2344_v40 = vadd.f32 %v3612_v39, %v5089_v20  ;;  %v3615_v53 = vadd.f32 %v3614_v61, %v3613_v59  ;;  %v3726_v41 = vpop.f32.mrb[39].mxu1 }
 0x4d7   : > { %v3727_v2 = vadd.f32 %v3726_v41, %v3725_v60 }
 0x4d8   : > { %v2347_v4 = vadd.f32 %v3615_v53, %v5089_v20  ;;  %v5258_v5 = vadd.f32 %v3724_v50, %v2344_v40 }
 0x4da   : > { %5818 = vst [vmem:[#allocation38_spill] sm:$0xff] %v5258_v5  ;;  %v3616_v10 = vpop.f32.mrb[40].mxu0  ;;  %v5263_v13 = vsel %vm2561_vm1, %v5258_v5, -1e+30  ;;  %v5265_v14 = vadd.f32 %v3727_v2, %v2347_v4 }
 0x4db   : > { %v3728_v17 = vpop.f32.mrb[40].mxu1  ;;  %v3617_v18 = vpop.f32.mrb[41].mxu0  ;;  %2630 = vmax.xlane.f32.xlu0 %v5263_v13 }
 0x4dc   : > { %5819 = vst [vmem:[#allocation39_spill] sm:$0xff] %v5265_v14  ;;  %v3618_v21 = vadd.f32 %v3617_v18, %v3616_v10  ;;  %v3729_v23 = vpop.f32.mrb[41].mxu1  ;;  %v3619_v24 = vpop.f32.mrb[42].mxu0  ;;  %v5271_v25 = vsel %vm2561_vm1, %v5265_v14, -1e+30 }
 0x4dd   : > { %v3730_v27 = vadd.f32 %v3729_v23, %v3728_v17  ;;  %v3731_v30 = vpop.f32.mrb[42].mxu1  ;;  %v3620_v47 = vpop.f32.mrb[43].mxu0  ;;  %2632 = vmax.xlane.f32.xlu1 %v5271_v25 }
 0x4de   : > { %v2352_v38 = vadd.f32 %v3618_v21, %v5089_v20  ;;  %v3621_v43 = vadd.f32 %v3620_v47, %v3619_v24  ;;  %v3732_v39 = vpop.f32.mrb[43].mxu1 }
 0x4df   : > { %v3733_v1 = vadd.f32 %v3732_v39, %v3731_v30 }
 0x4e0   : > { %v2355_v59 = vadd.f32 %v3621_v43, %v5089_v20  ;;  %v5276_v50 = vadd.f32 %v3730_v27, %v2352_v38 }
 0x4e2   : > { %5820 = vst [vmem:[#allocation40_spill] sm:$0xff] %v5276_v50  ;;  %v3622_v60 = vpop.f32.mrb[44].mxu0  ;;  %v5281_v61 = vsel %vm2561_vm1, %v5276_v50, -1e+30  ;;  %v5283_v40 = vadd.f32 %v3733_v1, %v2355_v59 }
 0x4e3   : > { %v3734_v53 = vpop.f32.mrb[44].mxu1  ;;  %v3623_v41 = vpop.f32.mrb[45].mxu0  ;;  %2634 = vmax.xlane.f32.xlu0 %v5281_v61 }
 0x4e4   : > { %5821 = vst [vmem:[#allocation41_spill] sm:$0xff] %v5283_v40  ;;  %v3624_v2 = vadd.f32 %v3623_v41, %v3622_v60  ;;  %v3735_v4 = vpop.f32.mrb[45].mxu1  ;;  %v3625_v10 = vpop.f32.mrb[46].mxu0  ;;  %v5289_v17 = vsel %vm2561_vm1, %v5283_v40, -1e+30 }
 0x4e5   : > { %v3736_v18 = vadd.f32 %v3735_v4, %v3734_v53  ;;  %v3737_v21 = vpop.f32.mrb[46].mxu1  ;;  %v3626_v23 = vpop.f32.mrb[47].mxu0  ;;  %2636 = vmax.xlane.f32.xlu1 %v5289_v17 }
 0x4e6   : > { %v2360_v24 = vadd.f32 %v3624_v2, %v5089_v20  ;;  %v3627_v27 = vadd.f32 %v3626_v23, %v3625_v10  ;;  %v3738_v30 = vpop.f32.mrb[47].mxu1 }
 0x4e7   : > { %v3739_v47 = vadd.f32 %v3738_v30, %v3737_v21 }
 0x4e8   : > { %v2363_v38 = vadd.f32 %v3627_v27, %v5089_v20  ;;  %v5294_v43 = vadd.f32 %v3736_v18, %v2360_v24 }
 0x4ea   : > { %5822 = vst [vmem:[#allocation42_spill] sm:$0xff] %v5294_v43  ;;  %v3628_v39 = vpop.f32.mrb[48].mxu0  ;;  %v5299_v1 = vsel %vm2561_vm1, %v5294_v43, -1e+30  ;;  %v5301_v59 = vadd.f32 %v3739_v47, %v2363_v38 }
 0x4eb   : > { %v3740_v60 = vpop.f32.mrb[48].mxu1  ;;  %v3629_v53 = vpop.f32.mrb[49].mxu0  ;;  %2638 = vmax.xlane.f32.xlu0 %v5299_v1 }
 0x4ec   : > { %5823 = vst [vmem:[#allocation43_spill] sm:$0xff] %v5301_v59  ;;  %v3630_v41 = vadd.f32 %v3629_v53, %v3628_v39  ;;  %v3741_v2 = vpop.f32.mrb[49].mxu1  ;;  %v3631_v4 = vpop.f32.mrb[50].mxu0  ;;  %v5307_v10 = vsel %vm2561_vm1, %v5301_v59, -1e+30 }
 0x4ed   : > { %v3742_v18 = vadd.f32 %v3741_v2, %v3740_v60  ;;  %v3743_v21 = vpop.f32.mrb[50].mxu1  ;;  %v3632_v23 = vpop.f32.mrb[51].mxu0  ;;  %2640 = vmax.xlane.f32.xlu1 %v5307_v10 }
 0x4ee   : > { %v2368_v24 = vadd.f32 %v3630_v41, %v5089_v20  ;;  %v3633_v27 = vadd.f32 %v3632_v23, %v3631_v4  ;;  %v3744_v30 = vpop.f32.mrb[51].mxu1 }
 0x4ef   : > { %v3745_v47 = vadd.f32 %v3744_v30, %v3743_v21 }
 0x4f0   : > { %v2371_v38 = vadd.f32 %v3633_v27, %v5089_v20  ;;  %v5312_v39 = vadd.f32 %v3742_v18, %v2368_v24 }
 0x4f2   : > { %5824 = vst [vmem:[#allocation44_spill] sm:$0xff] %v5312_v39  ;;  %v3634_v53 = vpop.f32.mrb[52].mxu0  ;;  %v5317_v59 = vsel %vm2561_vm1, %v5312_v39, -1e+30  ;;  %v5319_v60 = vadd.f32 %v3745_v47, %v2371_v38 }
 0x4f3   : > { %v3746_v2 = vpop.f32.mrb[52].mxu1  ;;  %v3635_v43 = vpop.f32.mrb[53].mxu0  ;;  %2642 = vmax.xlane.f32.xlu0 %v5317_v59 }
 0x4f4   : > { %5825 = vst [vmem:[#allocation45_spill] sm:$0xff] %v5319_v60  ;;  %v3636_v41 = vadd.f32 %v3635_v43, %v3634_v53  ;;  %v3747_v4 = vpop.f32.mrb[53].mxu1  ;;  %v3637_v23 = vpop.f32.mrb[54].mxu0  ;;  %v5325_v18 = vsel %vm2561_vm1, %v5319_v60, -1e+30 }
 0x4f5   : > { %v3748_v21 = vadd.f32 %v3747_v4, %v3746_v2  ;;  %v3749_v24 = vpop.f32.mrb[54].mxu1  ;;  %v3638_v27 = vpop.f32.mrb[55].mxu0  ;;  %2644 = vmax.xlane.f32.xlu1 %v5325_v18 }
 0x4f6   : > { %v2376_v30 = vadd.f32 %v3636_v41, %v5089_v20  ;;  %v3639_v47 = vadd.f32 %v3638_v27, %v3637_v23  ;;  %v3750_v38 = vpop.f32.mrb[55].mxu1 }
 0x4f7   : > { %v3751_v39 = vadd.f32 %v3750_v38, %v3749_v24 }
 0x4f8   : > { %v2379_v40 = vadd.f32 %v3639_v47, %v5089_v20  ;;  %v5330_v43 = vadd.f32 %v3748_v21, %v2376_v30 }
 0x4fa   : > { %5826 = vst [vmem:[#allocation46_spill] sm:$0xff] %v5330_v43  ;;  %v3640_v53 = vpop.f32.mrb[56].mxu0  ;;  %v5335_v60 = vsel %vm2561_vm1, %v5330_v43, -1e+30  ;;  %v5337_v2 = vadd.f32 %v3751_v39, %v2379_v40 }
 0x4fb   : > { %v3752_v4 = vpop.f32.mrb[56].mxu1  ;;  %v3641_v50 = vpop.f32.mrb[57].mxu0  ;;  %2646 = vmax.xlane.f32.xlu0 %v5335_v60 }
 0x4fc   : > { %5827 = vst [vmem:[#allocation47_spill] sm:$0xff] %v5337_v2  ;;  %v3642_v41 = vadd.f32 %v3641_v50, %v3640_v53  ;;  %v3753_v23 = vpop.f32.mrb[57].mxu1  ;;  %v3643_v27 = vpop.f32.mrb[58].mxu0  ;;  %v5343_v21 = vsel %vm2561_vm1, %v5337_v2, -1e+30 }
 0x4fd   : > { %v3754_v24 = vadd.f32 %v3753_v23, %v3752_v4  ;;  %v3755_v30 = vpop.f32.mrb[58].mxu1  ;;  %v3644_v47 = vpop.f32.mrb[59].mxu0  ;;  %2648 = vmax.xlane.f32.xlu1 %v5343_v21 }
 0x4fe   : > { %v2384_v40 = vadd.f32 %v3642_v41, %v5089_v20  ;;  %v3645_v39 = vadd.f32 %v3644_v47, %v3643_v27  ;;  %v3756_v38 = vpop.f32.mrb[59].mxu1 }
 0x4ff   : > { %v3757_v43 = vadd.f32 %v3756_v38, %v3755_v30 }
 0x500   : > { %v2387_v14 = vadd.f32 %v3645_v39, %v5089_v20  ;;  %v5348_v50 = vadd.f32 %v3754_v24, %v2384_v40 }
 0x502   : > { %5828 = vst [vmem:[#allocation48_spill] sm:$0xff] %v5348_v50  ;;  %v3646_v53 = vpop.f32.mrb[60].mxu0  ;;  %v5353_v2 = vsel %vm2561_vm1, %v5348_v50, -1e+30  ;;  %v5355_v4 = vadd.f32 %v3757_v43, %v2387_v14 }
 0x503   : > { %v3758_v23 = vpop.f32.mrb[60].mxu1  ;;  %v3647_v5 = vpop.f32.mrb[61].mxu0  ;;  %2650 = vmax.xlane.f32.xlu0 %v5353_v2 }
 0x504   : > { %5829 = vst [vmem:[#allocation49_spill] sm:$0xff] %v5355_v4  ;;  %v3648_v41 = vadd.f32 %v3647_v5, %v3646_v53  ;;  %v3759_v27 = vpop.f32.mrb[61].mxu1  ;;  %v3649_v47 = vpop.f32.mrb[62].mxu0  ;;  %v5361_v24 = vsel %vm2561_vm1, %v5355_v4, -1e+30 }
 0x505   : > { %v3760_v30 = vadd.f32 %v3759_v27, %v3758_v23  ;;  %v3761_v40 = vpop.f32.mrb[62].mxu1  ;;  %v3650_v39 = vpop.f32.mrb[63].mxu0  ;;  %2652 = vmax.xlane.f32.xlu1 %v5361_v24 }
 0x506   : > { %v2392_v14 = vadd.f32 %v3648_v41, %v5089_v20  ;;  %v3651_v43 = vadd.f32 %v3650_v39, %v3649_v47  ;;  %v3762_v38 = vpop.f32.mrb[63].mxu1 }
 0x507   : > { %v3763_v50 = vadd.f32 %v3762_v38, %v3761_v40 }
 0x508   : > { %v2395_v36 = vadd.f32 %v3651_v43, %v5089_v20  ;;  %v5366_v5 = vadd.f32 %v3760_v30, %v2392_v14 }
 0x50a   : > { %v5371_v53 = vsel %vm2561_vm1, %v5366_v5, -1e+30  ;;  %v5373_v4 = vadd.f32 %v3763_v50, %v2395_v36 }
 0x50b   : > { %2654 = vmax.xlane.f32.xlu0 %v5371_v53 }
 0x50c   : > { %v5379_v23 = vsel %vm2561_vm1, %v5373_v4, -1e+30 }
 0x50d   : > { %2656 = vmax.xlane.f32.xlu1 %v5379_v23 }
 0x520   : > { %v5382_v41 = vpop.xlane.xlu0 %2594 }
 0x521   : > { %v2658_v20 = vsub.f32 %v5101_v33, %v5382_v41 }
 0x523   : > { %v2690_v27 = vmul.f32 1.442695, %v2658_v20 }
 0x524   : > { %v5386_v47 = vpop.xlane.xlu0 %2596 }
 0x525   : > { %3974 = vpow2.f32 %v2690_v27  ;;  %v2659_v36 = vsub.f32 %v5110_v37, %v5386_v47 }
 0x527   : > { %v2692_v50 = vmul.f32 1.442695, %v2659_v36 }
 0x528   : > { %v5390_v30 = vpop.xlane.xlu1 %2598 }
 0x529   : > { %3976 = vpow2.f32 %v2692_v50  ;;  %v2660_v22 = vsub.f32 %v5119_v54, %v5390_v30 }
 0x52b   : > { %v2694_v40 = vmul.f32 1.442695, %v2660_v22 }
 0x52c   : > { %v5394_v39 = vpop.xlane.xlu1 %2600 }
 0x52d   : > { %3978 = vpow2.f32 %v2694_v40  ;;  %v2661_v33 = vsub.f32 %v5128_v57, %v5394_v39 }
 0x52f   : > { %v3975_v14 = vpop.eup %3974  ;;  %v2696_v43 = vmul.f32 1.442695, %v2661_v33 }
 0x530   : > { %2754 = vadd.xlane.f32.xlu0 %v3975_v14  ;;  %v5398_v38 = vpop.xlane.xlu0 %2602 }
 0x531   : > { %3980 = vpow2.f32 %v2696_v43  ;;  %v2662_v37 = vsub.f32 %v5137_v8, %v5398_v38 }
 0x532   : > { %v5402_v20 = vpop.xlane.xlu1 %2604 }
 0x533   : > { %v3977_v27 = vpop.eup %3976  ;;  %v2698_v54 = vmul.f32 1.442695, %v2662_v37  ;;  %v2663_v36 = vsub.f32 %v5145_v15, %v5402_v20 }
 0x534   : > { %2756 = vadd.xlane.f32.xlu1 %v3977_v27 }
 0x535   : > { %3982 = vpow2.f32 %v2698_v54  ;;  %v2700_v50 = vmul.f32 1.442695, %v2663_v36 }
 0x537   : > { %v3979_v57 = vpop.eup %3978  ;;  %3984 = vpow2.f32 %v2700_v50 }
 0x538   : > { %2758 = vadd.xlane.f32.xlu0 %v3979_v57  ;;  %v5406_v22 = vpop.xlane.xlu0 %2606 }
 0x539   : > { %v2664_v40 = vsub.f32 %v5155_v28, %v5406_v22 }
 0x53a   : > { %v5410_v33 = vpop.xlane.xlu1 %2608 }
 0x53b   : > { %v3981_v8 = vpop.eup %3980  ;;  %v2702_v14 = vmul.f32 1.442695, %v2664_v40  ;;  %v2665_v43 = vsub.f32 %v5163_v51, %v5410_v33 }
 0x53c   : > { %2760 = vadd.xlane.f32.xlu1 %v3981_v8 }
 0x53d   : > { %3986 = vpow2.f32 %v2702_v14  ;;  %v2704_v15 = vmul.f32 1.442695, %v2665_v43 }
 0x53f   : > { %v3983_v37 = vpop.eup %3982  ;;  %3988 = vpow2.f32 %v2704_v15 }
 0x540   : > { %2762 = vadd.xlane.f32.xlu0 %v3983_v37  ;;  %v5414_v27 = vpop.xlane.xlu0 %2610 }
 0x541   : > { %v3985_v54 = vpop.eup %3984  ;;  %v2666_v36 = vsub.f32 %v5173_v62, %v5414_v27 }
 0x542   : > { %v5418_v28 = vpop.xlane.xlu1 %2612  ;;  %2764 = vadd.xlane.f32.xlu1 %v3985_v54 }
 0x543   : > { %v2706_v50 = vmul.f32 1.442695, %v2666_v36  ;;  %v2667_v57 = vsub.f32 %v5181_v42, %v5418_v28 }
 0x545   : > { %3990 = vpow2.f32 %v2706_v50  ;;  %v2708_v51 = vmul.f32 1.442695, %v2667_v57 }
 0x547   : > { %v3987_v40 = vpop.eup %3986  ;;  %3992 = vpow2.f32 %v2708_v51 }
 0x548   : > { %2766 = vadd.xlane.f32.xlu0 %v3987_v40  ;;  %v5422_v8 = vpop.xlane.xlu0 %2614 }
 0x549   : > { %v3989_v14 = vpop.eup %3988  ;;  %v2668_v43 = vsub.f32 %v5191_v11, %v5422_v8 }
 0x54a   : > { %v5426_v15 = vpop.xlane.xlu1 %2616  ;;  %2768 = vadd.xlane.f32.xlu1 %v3989_v14 }
 0x54b   : > { %v2710_v62 = vmul.f32 1.442695, %v2668_v43  ;;  %v2669_v37 = vsub.f32 %v5199_v19, %v5426_v15 }
 0x54d   : > { %3994 = vpow2.f32 %v2710_v62  ;;  %v2712_v42 = vmul.f32 1.442695, %v2669_v37 }
 0x54f   : > { %v3991_v54 = vpop.eup %3990  ;;  %3996 = vpow2.f32 %v2712_v42 }
 0x550   : > { %2770 = vadd.xlane.f32.xlu0 %v3991_v54  ;;  %v5430_v36 = vpop.xlane.xlu0 %2618 }
 0x551   : > { %v3993_v50 = vpop.eup %3992  ;;  %v2670_v57 = vsub.f32 %v5209_v48, %v5430_v36 }
 0x552   : > { %v5434_v51 = vpop.xlane.xlu1 %2620  ;;  %2772 = vadd.xlane.f32.xlu1 %v3993_v50 }
 0x553   : > { %v2714_v11 = vmul.f32 1.442695, %v2670_v57  ;;  %v2671_v40 = vsub.f32 %v5217_v58, %v5434_v51 }
 0x555   : > { %3998 = vpow2.f32 %v2714_v11  ;;  %v2716_v19 = vmul.f32 1.442695, %v2671_v40 }
 0x557   : > { %v3995_v14 = vpop.eup %3994  ;;  %4000 = vpow2.f32 %v2716_v19 }
 0x558   : > { %2774 = vadd.xlane.f32.xlu0 %v3995_v14  ;;  %v5438_v43 = vpop.xlane.xlu0 %2622 }
 0x559   : > { %v3997_v62 = vpop.eup %3996  ;;  %v2672_v37 = vsub.f32 %v5227_v49, %v5438_v43 }
 0x55a   : > { %v5442_v42 = vpop.xlane.xlu1 %2624  ;;  %2776 = vadd.xlane.f32.xlu1 %v3997_v62 }
 0x55b   : > { %v2718_v48 = vmul.f32 1.442695, %v2672_v37  ;;  %v2673_v54 = vsub.f32 %v5235_v16, %v5442_v42 }
 0x55d   : > { %4002 = vpow2.f32 %v2718_v48  ;;  %v2720_v58 = vmul.f32 1.442695, %v2673_v54 }
 0x55f   : > { %v3999_v50 = vpop.eup %3998  ;;  %4004 = vpow2.f32 %v2720_v58 }
 0x560   : > { %2778 = vadd.xlane.f32.xlu0 %v3999_v50  ;;  %v5446_v57 = vpop.xlane.xlu0 %2626 }
 0x561   : > { %v4001_v11 = vpop.eup %4000  ;;  %v2674_v40 = vsub.f32 %v5245_v55, %v5446_v57 }
 0x562   : > { %v5450_v19 = vpop.xlane.xlu1 %2628  ;;  %2780 = vadd.xlane.f32.xlu1 %v4001_v11 }
 0x563   : > { %v2722_v49 = vmul.f32 1.442695, %v2674_v40  ;;  %v2675_v14 = vsub.f32 %v5253_v46, %v5450_v19 }
 0x565   : > { %4006 = vpow2.f32 %v2722_v49  ;;  %v2724_v16 = vmul.f32 1.442695, %v2675_v14 }
 0x567   : > { %v4003_v62 = vpop.eup %4002  ;;  %4008 = vpow2.f32 %v2724_v16 }
 0x568   : > { %2782 = vadd.xlane.f32.xlu0 %v4003_v62  ;;  %v5454_v37 = vpop.xlane.xlu0 %2630 }
 0x569   : > { %v4005_v48 = vpop.eup %4004  ;;  %v2676_v54 = vsub.f32 %v5263_v13, %v5454_v37 }
 0x56a   : > { %v5458_v58 = vpop.xlane.xlu1 %2632  ;;  %2784 = vadd.xlane.f32.xlu1 %v4005_v48 }
 0x56b   : > { %v2726_v55 = vmul.f32 1.442695, %v2676_v54  ;;  %v2677_v50 = vsub.f32 %v5271_v25, %v5458_v58 }
 0x56d   : > { %4010 = vpow2.f32 %v2726_v55  ;;  %v2728_v46 = vmul.f32 1.442695, %v2677_v50 }
 0x56f   : > { %v4007_v11 = vpop.eup %4006  ;;  %4012 = vpow2.f32 %v2728_v46 }
 0x570   : > { %2786 = vadd.xlane.f32.xlu0 %v4007_v11  ;;  %v5462_v40 = vpop.xlane.xlu0 %2634 }
 0x571   : > { %v4009_v49 = vpop.eup %4008  ;;  %v2678_v14 = vsub.f32 %v5281_v61, %v5462_v40 }
 0x572   : > { %v5466_v16 = vpop.xlane.xlu1 %2636  ;;  %2788 = vadd.xlane.f32.xlu1 %v4009_v49 }
 0x573   : > { %v2730_v13 = vmul.f32 1.442695, %v2678_v14  ;;  %v2679_v62 = vsub.f32 %v5289_v17, %v5466_v16 }
 0x575   : > { %4014 = vpow2.f32 %v2730_v13  ;;  %v2732_v25 = vmul.f32 1.442695, %v2679_v62 }
 0x577   : > { %v4011_v48 = vpop.eup %4010  ;;  %4016 = vpow2.f32 %v2732_v25 }
 0x578   : > { %2790 = vadd.xlane.f32.xlu0 %v4011_v48  ;;  %v5470_v54 = vpop.xlane.xlu0 %2638 }
 0x579   : > { %v4013_v55 = vpop.eup %4012  ;;  %v2680_v50 = vsub.f32 %v5299_v1, %v5470_v54 }
 0x57a   : > { %v5474_v46 = vpop.xlane.xlu1 %2640  ;;  %2792 = vadd.xlane.f32.xlu1 %v4013_v55 }
 0x57b   : > { %v2734_v61 = vmul.f32 1.442695, %v2680_v50  ;;  %v2681_v11 = vsub.f32 %v5307_v10, %v5474_v46 }
 0x57d   : > { %4018 = vpow2.f32 %v2734_v61  ;;  %v2736_v17 = vmul.f32 1.442695, %v2681_v11 }
 0x57f   : > { %v4015_v49 = vpop.eup %4014  ;;  %4020 = vpow2.f32 %v2736_v17 }
 0x580   : > { %2794 = vadd.xlane.f32.xlu0 %v4015_v49  ;;  %v5478_v14 = vpop.xlane.xlu0 %2642 }
 0x581   : > { %v4017_v13 = vpop.eup %4016  ;;  %v2682_v62 = vsub.f32 %v5317_v59, %v5478_v14 }
 0x582   : > { %v5482_v25 = vpop.xlane.xlu1 %2644  ;;  %2796 = vadd.xlane.f32.xlu1 %v4017_v13 }
 0x583   : > { %v2738_v1 = vmul.f32 1.442695, %v2682_v62  ;;  %v2683_v48 = vsub.f32 %v5325_v18, %v5482_v25 }
 0x585   : > { %4022 = vpow2.f32 %v2738_v1  ;;  %v2740_v10 = vmul.f32 1.442695, %v2683_v48 }
 0x587   : > { %v4019_v55 = vpop.eup %4018  ;;  %4024 = vpow2.f32 %v2740_v10 }
 0x588   : > { %2798 = vadd.xlane.f32.xlu0 %v4019_v55  ;;  %v5486_v50 = vpop.xlane.xlu0 %2646 }
 0x589   : > { %v4021_v61 = vpop.eup %4020  ;;  %v2684_v11 = vsub.f32 %v5335_v60, %v5486_v50 }
 0x58a   : > { %v5490_v17 = vpop.xlane.xlu1 %2648  ;;  %2800 = vadd.xlane.f32.xlu1 %v4021_v61 }
 0x58b   : > { %v2742_v59 = vmul.f32 1.442695, %v2684_v11  ;;  %v2685_v49 = vsub.f32 %v5343_v21, %v5490_v17 }
 0x58d   : > { %4026 = vpow2.f32 %v2742_v59  ;;  %v2744_v18 = vmul.f32 1.442695, %v2685_v49 }
 0x58f   : > { %v4023_v13 = vpop.eup %4022  ;;  %4028 = vpow2.f32 %v2744_v18 }
 0x590   : > { %2802 = vadd.xlane.f32.xlu0 %v4023_v13  ;;  %v5494_v62 = vpop.xlane.xlu0 %2650 }
 0x591   : > { %v4025_v1 = vpop.eup %4024  ;;  %v2686_v48 = vsub.f32 %v5353_v2, %v5494_v62 }
 0x592   : > { %v5498_v10 = vpop.xlane.xlu1 %2652  ;;  %2804 = vadd.xlane.f32.xlu1 %v4025_v1 }
 0x593   : > { %v2746_v60 = vmul.f32 1.442695, %v2686_v48  ;;  %v2687_v55 = vsub.f32 %v5361_v24, %v5498_v10 }
 0x595   : > { %4030 = vpow2.f32 %v2746_v60  ;;  %v2748_v21 = vmul.f32 1.442695, %v2687_v55 }
 0x597   : > { %v4027_v61 = vpop.eup %4026  ;;  %4032 = vpow2.f32 %v2748_v21 }
 0x598   : > { %2806 = vadd.xlane.f32.xlu0 %v4027_v61  ;;  %v5502_v11 = vpop.xlane.xlu0 %2654 }
 0x599   : > { %v4029_v59 = vpop.eup %4028  ;;  %v2688_v49 = vsub.f32 %v5371_v53, %v5502_v11 }
 0x59a   : > { %v5506_v18 = vpop.xlane.xlu1 %2656  ;;  %2808 = vadd.xlane.f32.xlu1 %v4029_v59 }
 0x59b   : > { %v2750_v2 = vmul.f32 1.442695, %v2688_v49  ;;  %v2689_v13 = vsub.f32 %v5379_v23, %v5506_v18 }
 0x59d   : > { %4034 = vpow2.f32 %v2750_v2  ;;  %v2752_v24 = vmul.f32 1.442695, %v2689_v13 }
 0x59f   : > { %v4031_v1 = vpop.eup %4030  ;;  %4036 = vpow2.f32 %v2752_v24 }
 0x5a0   : > { %2810 = vadd.xlane.f32.xlu0 %v4031_v1 }
 0x5a1   : > { %v4033_v48 = vpop.eup %4032 }
 0x5a2   : > { %2812 = vadd.xlane.f32.xlu1 %v4033_v48 }
 0x5a7   : > { %v4035_v60 = vpop.eup %4034 }
 0x5a8   : > { %2814 = vadd.xlane.f32.xlu0 %v4035_v60 }
 0x5a9   : > { %v4037_v55 = vpop.eup %4036 }
 0x5aa   : > { %2816 = vadd.xlane.f32.xlu1 %v4037_v55 }
 0x5bd   : > { %v2755_v21 = vpop.xlane.xlu0 %2754 }
 0x5be   : > { %4038 = vlog2.f32 %v2755_v21 }
 0x5c1   : > { %v2757_v53 = vpop.xlane.xlu1 %2756 }
 0x5c2   : > { %4040 = vlog2.f32 %v2757_v53 }
 0x5c5   : > { %v2759_v61 = vpop.xlane.xlu0 %2758 }
 0x5c6   : > { %4042 = vlog2.f32 %v2759_v61 }
 0x5c8   : > { %v4039_v59 = vpop.eup %4038 }
 0x5c9   : > { %v2819_v23 = vmul.f32 0.6931472, %v4039_v59  ;;  %v2761_v49 = vpop.xlane.xlu1 %2760 }
 0x5ca   : > { %4044 = vlog2.f32 %v2761_v49 }
 0x5cb   : > { %v2882_v2 = vadd.f32 %v2819_v23, %v5382_v41 }
 0x5cc   : > { %v4041_v13 = vpop.eup %4040 }
 0x5cd   : > { %v2914_v24 = vsub.f32 %v5096_v34, %v2882_v2  ;;  %v2821_v1 = vmul.f32 0.6931472, %v4041_v13  ;;  %v2763_v48 = vpop.xlane.xlu0 %2762 }
 0x5ce   : > { %4046 = vlog2.f32 %v2763_v48 }
 0x5cf   : > { %2946 = vst [vmem:[%s4582_s14] sm:$0xff] %v2914_v24  ;;  %v2883_v60 = vadd.f32 %v2821_v1, %v5386_v47  ;;  %v2765_v55 = vpop.xlane.xlu1 %2764 }
 0x5d0   : > { %v4043_v21 = vpop.eup %4042  ;;  %4048 = vlog2.f32 %v2765_v55 }
 0x5d1   : > { %v2915_v53 = vsub.f32 %v5103_v35, %v2883_v60  ;;  %v2823_v61 = vmul.f32 0.6931472, %v4043_v21 }
 0x5d3   : > { %2947 = vst [vmem:[%s4582_s14 + $0x8] sm:$0xff] %v2915_v53  ;;  %v2884_v41 = vadd.f32 %v2823_v61, %v5390_v30 }
 0x5d4   : > { %v4045_v59 = vpop.eup %4044 }
 0x5d5   : > { %v2916_v34 = vsub.f32 %v5114_v56, %v2884_v41  ;;  %v2825_v23 = vmul.f32 0.6931472, %v4045_v59  ;;  %v2767_v49 = vpop.xlane.xlu0 %2766 }
 0x5d6   : > { %4050 = vlog2.f32 %v2767_v49 }
 0x5d7   : > { %2948 = vst [vmem:[%s4582_s14 + $0x10] sm:$0xff] %v2916_v34  ;;  %v2885_v47 = vadd.f32 %v2825_v23, %v5394_v39  ;;  %v2769_v2 = vpop.xlane.xlu1 %2768 }
 0x5d8   : > { %v4047_v13 = vpop.eup %4046  ;;  %4052 = vlog2.f32 %v2769_v2 }
 0x5d9   : > { %v2917_v35 = vsub.f32 %v5121_v63, %v2885_v47  ;;  %v2827_v24 = vmul.f32 0.6931472, %v4047_v13 }
 0x5da   : > { %v4049_v1 = vpop.eup %4048 }
 0x5db   : > { %2949 = vst [vmem:[%s4582_s14 + $0x18] sm:$0xff] %v2917_v35  ;;  %v2886_v30 = vadd.f32 %v2827_v24, %v5398_v38  ;;  %v2829_v48 = vmul.f32 0.6931472, %v4049_v1 }
 0x5dd   : > { %v2918_v56 = vsub.f32 %v5132_v6, %v2886_v30  ;;  %v2887_v60 = vadd.f32 %v2829_v48, %v5402_v20  ;;  %v2771_v55 = vpop.xlane.xlu0 %2770 }
 0x5de   : > { %4054 = vlog2.f32 %v2771_v55 }
 0x5df   : > { %2950 = vst [vmem:[%s4582_s14 + $0x20] sm:$0xff] %v2918_v56  ;;  %v2919_v39 = vsub.f32 %v5139_v9, %v2887_v60  ;;  %v2773_v21 = vpop.xlane.xlu1 %2772 }
 0x5e0   : > { %v4051_v53 = vpop.eup %4050  ;;  %4056 = vlog2.f32 %v2773_v21 }
 0x5e1   : > { %2951 = vst [vmem:[%s4582_s14 + $0x28] sm:$0xff] %v2919_v39  ;;  %v2831_v63 = vmul.f32 0.6931472, %v4051_v53 }
 0x5e2   : > { %v4053_v61 = vpop.eup %4052 }
 0x5e3   : > { %v2888_v38 = vadd.f32 %v2831_v63, %v5406_v22  ;;  %v2833_v41 = vmul.f32 0.6931472, %v4053_v61 }
 0x5e5   : > { %v2920_v6 = vsub.f32 %v5150_v26, %v2888_v38  ;;  %v2889_v20 = vadd.f32 %v2833_v41, %v5410_v33  ;;  %v2775_v59 = vpop.xlane.xlu0 %2774 }
 0x5e6   : > { %4058 = vlog2.f32 %v2775_v59 }
 0x5e7   : > { %2952 = vst [vmem:[%s4582_s14 + $0x30] sm:$0xff] %v2920_v6  ;;  %v2921_v9 = vsub.f32 %v5157_v29, %v2889_v20  ;;  %v2777_v34 = vpop.xlane.xlu1 %2776 }
 0x5e8   : > { %v4055_v23 = vpop.eup %4054  ;;  %4060 = vlog2.f32 %v2777_v34 }
 0x5e9   : > { %2953 = vst [vmem:[%s4582_s14 + $0x38] sm:$0xff] %v2921_v9  ;;  %v2835_v49 = vmul.f32 0.6931472, %v4055_v23 }
 0x5ea   : > { %v4057_v47 = vpop.eup %4056 }
 0x5eb   : > { %v2890_v22 = vadd.f32 %v2835_v49, %v5414_v27  ;;  %v2837_v2 = vmul.f32 0.6931472, %v4057_v47 }
 0x5ed   : > { %v2922_v26 = vsub.f32 %v5168_v52, %v2890_v22  ;;  %v2891_v33 = vadd.f32 %v2837_v2, %v5418_v28  ;;  %v2779_v13 = vpop.xlane.xlu0 %2778  ;;  %v5830_v2 = vld [vmem:[#allocation37_spill] sm:$0xff] }
 0x5ee   : > { %4062 = vlog2.f32 %v2779_v13 }
 0x5ef   : > { %2954 = vst [vmem:[%s4582_s14 + $0x40] sm:$0xff] %v2922_v26  ;;  %v2923_v29 = vsub.f32 %v5175_v45, %v2891_v33  ;;  %v2781_v35 = vpop.xlane.xlu1 %2780 }
 0x5f0   : > { %v4059_v24 = vpop.eup %4058  ;;  %4064 = vlog2.f32 %v2781_v35 }
 0x5f1   : > { %2955 = vst [vmem:[%s4582_s14 + $0x48] sm:$0xff] %v2923_v29  ;;  %v2839_v1 = vmul.f32 0.6931472, %v4059_v24  ;;  %v5831_v24 = vld [vmem:[#allocation38_spill] sm:$0xff] }
 0x5f2   : > { %v4061_v30 = vpop.eup %4060 }
 0x5f3   : > { %v2892_v27 = vadd.f32 %v2839_v1, %v5422_v8  ;;  %v2841_v48 = vmul.f32 0.6931472, %v4061_v30  ;;  %v5832_v30 = vld [vmem:[#allocation39_spill] sm:$0xff] }
 0x5f5   : > { %v2924_v52 = vsub.f32 %v5186_v7, %v2892_v27  ;;  %v2893_v28 = vadd.f32 %v2841_v48, %v5426_v15  ;;  %v2783_v56 = vpop.xlane.xlu0 %2782 }
 0x5f6   : > { %4066 = vlog2.f32 %v2783_v56 }
 0x5f7   : > { %2956 = vst [vmem:[%s4582_s14 + $0x50] sm:$0xff] %v2924_v52  ;;  %v2925_v45 = vsub.f32 %v5193_v12, %v2893_v28  ;;  %v2785_v60 = vpop.xlane.xlu1 %2784 }
 0x5f8   : > { %v4063_v55 = vpop.eup %4062  ;;  %4068 = vlog2.f32 %v2785_v60  ;;  %v5833_v60 = vld [vmem:[#allocation40_spill] sm:$0xff] }
 0x5f9   : > { %2957 = vst [vmem:[%s4582_s14 + $0x58] sm:$0xff] %v2925_v45  ;;  %v2843_v39 = vmul.f32 0.6931472, %v4063_v55 }
 0x5fa   : > { %v4065_v21 = vpop.eup %4064 }
 0x5fb   : > { %v2894_v8 = vadd.f32 %v2843_v39, %v5430_v36  ;;  %v2845_v53 = vmul.f32 0.6931472, %v4065_v21  ;;  %v5834_v21 = vld [vmem:[#allocation41_spill] sm:$0xff] }
 0x5fd   : > { %v2926_v7 = vsub.f32 %v5204_v32, %v2894_v8  ;;  %v2895_v15 = vadd.f32 %v2845_v53, %v5434_v51  ;;  %v2787_v63 = vpop.xlane.xlu0 %2786 }
 0x5fe   : > { %4070 = vlog2.f32 %v2787_v63 }
 0x5ff   : > { %2958 = vst [vmem:[%s4582_s14 + $0x60] sm:$0xff] %v2926_v7  ;;  %v2927_v12 = vsub.f32 %v5211_v3, %v2895_v15  ;;  %v2789_v61 = vpop.xlane.xlu1 %2788 }
 0x600   : > { %v4067_v38 = vpop.eup %4066  ;;  %4072 = vlog2.f32 %v2789_v61  ;;  %v5835_v61 = vld [vmem:[#allocation42_spill] sm:$0xff] }
 0x601   : > { %2959 = vst [vmem:[%s4582_s14 + $0x68] sm:$0xff] %v2927_v12  ;;  %v2847_v41 = vmul.f32 0.6931472, %v4067_v38 }
 0x602   : > { %v4069_v6 = vpop.eup %4068 }
 0x603   : > { %v2896_v36 = vadd.f32 %v2847_v41, %v5438_v43  ;;  %v2849_v20 = vmul.f32 0.6931472, %v4069_v6  ;;  %v5836_v6 = vld [vmem:[#allocation43_spill] sm:$0xff] }
 0x605   : > { %v2928_v32 = vsub.f32 %v5222_v0, %v2896_v36  ;;  %v2897_v51 = vadd.f32 %v2849_v20, %v5442_v42  ;;  %v2791_v59 = vpop.xlane.xlu0 %2790 }
 0x606   : > { %4074 = vlog2.f32 %v2791_v59 }
 0x607   : > { %2960 = vst [vmem:[%s4582_s14 + $0x70] sm:$0xff] %v2928_v32  ;;  %v2929_v3 = vsub.f32 %v5229_v44, %v2897_v51  ;;  %v2793_v9 = vpop.xlane.xlu1 %2792 }
 0x608   : > { %v4071_v34 = vpop.eup %4070  ;;  %4076 = vlog2.f32 %v2793_v9  ;;  %v5837_v9 = vld [vmem:[#allocation44_spill] sm:$0xff] }
 0x609   : > { %2961 = vst [vmem:[%s4582_s14 + $0x78] sm:$0xff] %v2929_v3  ;;  %v2851_v23 = vmul.f32 0.6931472, %v4071_v34 }
 0x60a   : > { %v4073_v49 = vpop.eup %4072 }
 0x60b   : > { %v2898_v43 = vadd.f32 %v2851_v23, %v5446_v57  ;;  %v2853_v47 = vmul.f32 0.6931472, %v4073_v49  ;;  %v5838_v49 = vld [vmem:[#allocation45_spill] sm:$0xff] }
 0x60d   : > { %v2930_v0 = vsub.f32 %v5240_v31, %v2898_v43  ;;  %v2899_v42 = vadd.f32 %v2853_v47, %v5450_v19  ;;  %v2795_v22 = vpop.xlane.xlu0 %2794 }
 0x60e   : > { %4078 = vlog2.f32 %v2795_v22 }
 0x60f   : > { %2962 = vst [vmem:[%s4582_s14 + $0x80] sm:$0xff] %v2930_v0  ;;  %v2931_v44 = vsub.f32 %v5830_v2, %v2899_v42  ;;  %v2797_v26 = vpop.xlane.xlu1 %2796 }
 0x610   : > { %v4075_v33 = vpop.eup %4074  ;;  %4080 = vlog2.f32 %v2797_v26 }
 0x611   : > { %2963 = vst [vmem:[%s4582_s14 + $0x88] sm:$0xff] %v2931_v44  ;;  %v2855_v13 = vmul.f32 0.6931472, %v4075_v33  ;;  %v5839_v44 = vld [vmem:[#allocation46_spill] sm:$0xff] }
 0x612   : > { %v4077_v29 = vpop.eup %4076 }
 0x613   : > { %v2900_v57 = vadd.f32 %v2855_v13, %v5454_v37  ;;  %v2857_v35 = vmul.f32 0.6931472, %v4077_v29  ;;  %v5840_v13 = vld [vmem:[#allocation47_spill] sm:$0xff] }
 0x615   : > { %v2932_v31 = vsub.f32 %v5831_v24, %v2900_v57  ;;  %v2901_v19 = vadd.f32 %v2857_v35, %v5458_v58  ;;  %v2799_v1 = vpop.xlane.xlu0 %2798 }
 0x616   : > { %4082 = vlog2.f32 %v2799_v1  ;;  %v5841_v1 = vld [vmem:[#allocation48_spill] sm:$0xff] }
 0x617   : > { %2964 = vst [vmem:[%s4582_s14 + $0x90] sm:$0xff] %v2932_v31  ;;  %v2933_v27 = vsub.f32 %v5832_v30, %v2901_v19  ;;  %v2801_v48 = vpop.xlane.xlu1 %2800 }
 0x618   : > { %v4079_v52 = vpop.eup %4078  ;;  %4084 = vlog2.f32 %v2801_v48 }
 0x619   : > { %2965 = vst [vmem:[%s4582_s14 + $0x98] sm:$0xff] %v2933_v27  ;;  %v2859_v28 = vmul.f32 0.6931472, %v4079_v52  ;;  %v5842_v27 = vld [vmem:[#allocation49_spill] sm:$0xff] }
 0x61a   : > { %v4081_v56 = vpop.eup %4080 }
 0x61b   : > { %v2902_v37 = vadd.f32 %v2859_v28, %v5462_v40  ;;  %v2861_v45 = vmul.f32 0.6931472, %v4081_v56 }
 0x61d   : > { %v2934_v55 = vsub.f32 %v5833_v60, %v2902_v37  ;;  %v2903_v58 = vadd.f32 %v2861_v45, %v5466_v16  ;;  %v2803_v39 = vpop.xlane.xlu0 %2802 }
 0x61e   : > { %4086 = vlog2.f32 %v2803_v39 }
 0x61f   : > { %2966 = vst [vmem:[%s4582_s14 + $0xa0] sm:$0xff] %v2934_v55  ;;  %v2935_v8 = vsub.f32 %v5834_v21, %v2903_v58  ;;  %v2805_v53 = vpop.xlane.xlu1 %2804 }
 0x620   : > { %v4083_v7 = vpop.eup %4082  ;;  %4088 = vlog2.f32 %v2805_v53 }
 0x621   : > { %2967 = vst [vmem:[%s4582_s14 + $0xa8] sm:$0xff] %v2935_v8  ;;  %v2863_v15 = vmul.f32 0.6931472, %v4083_v7 }
 0x622   : > { %v4085_v63 = vpop.eup %4084 }
 0x623   : > { %v2904_v40 = vadd.f32 %v2863_v15, %v5470_v54  ;;  %v2865_v12 = vmul.f32 0.6931472, %v4085_v63 }
 0x625   : > { %v2936_v38 = vsub.f32 %v5835_v61, %v2904_v40  ;;  %v2905_v16 = vadd.f32 %v2865_v12, %v5474_v46  ;;  %v2807_v41 = vpop.xlane.xlu0 %2806 }
 0x626   : > { %4090 = vlog2.f32 %v2807_v41 }
 0x627   : > { %2968 = vst [vmem:[%s4582_s14 + $0xb0] sm:$0xff] %v2936_v38  ;;  %v2937_v36 = vsub.f32 %v5836_v6, %v2905_v16  ;;  %v2809_v20 = vpop.xlane.xlu1 %2808 }
 0x628   : > { %v4087_v32 = vpop.eup %4086  ;;  %4092 = vlog2.f32 %v2809_v20 }
 0x629   : > { %2969 = vst [vmem:[%s4582_s14 + $0xb8] sm:$0xff] %v2937_v36  ;;  %v2867_v51 = vmul.f32 0.6931472, %v4087_v32 }
 0x62a   : > { %v4089_v59 = vpop.eup %4088 }
 0x62b   : > { %v2906_v54 = vadd.f32 %v2867_v51, %v5478_v14  ;;  %v2869_v3 = vmul.f32 0.6931472, %v4089_v59 }
 0x62d   : > { %v2938_v34 = vsub.f32 %v5837_v9, %v2906_v54  ;;  %v2907_v46 = vadd.f32 %v2869_v3, %v5482_v25  ;;  %v2811_v23 = vpop.xlane.xlu0 %2810 }
 0x62e   : > { %4094 = vlog2.f32 %v2811_v23 }
 0x62f   : > { %2970 = vst [vmem:[%s4582_s14 + $0xc0] sm:$0xff] %v2938_v34  ;;  %v2939_v43 = vsub.f32 %v5838_v49, %v2907_v46  ;;  %v2813_v47 = vpop.xlane.xlu1 %2812 }
 0x630   : > { %v4091_v0 = vpop.eup %4090  ;;  %4096 = vlog2.f32 %v2813_v47 }
 0x631   : > { %2971 = vst [vmem:[%s4582_s14 + $0xc8] sm:$0xff] %v2939_v43  ;;  %v2871_v42 = vmul.f32 0.6931472, %v4091_v0 }
 0x632   : > { %v4093_v22 = vpop.eup %4092 }
 0x633   : > { %v2908_v14 = vadd.f32 %v2871_v42, %v5486_v50  ;;  %v2873_v2 = vmul.f32 0.6931472, %v4093_v22 }
 0x635   : > { %v2940_v26 = vsub.f32 %v5839_v44, %v2908_v14  ;;  %v2909_v25 = vadd.f32 %v2873_v2, %v5490_v17  ;;  %v2815_v33 = vpop.xlane.xlu0 %2814 }
 0x636   : > { %4098 = vlog2.f32 %v2815_v33 }
 0x637   : > { %2972 = vst [vmem:[%s4582_s14 + $0xd0] sm:$0xff] %v2940_v26  ;;  %v2941_v29 = vsub.f32 %v5840_v13, %v2909_v25  ;;  %v2817_v57 = vpop.xlane.xlu1 %2816 }
 0x638   : > { %v4095_v35 = vpop.eup %4094  ;;  %4100 = vlog2.f32 %v2817_v57 }
 0x639   : > { %2973 = vst [vmem:[%s4582_s14 + $0xd8] sm:$0xff] %v2941_v29  ;;  %v2875_v24 = vmul.f32 0.6931472, %v4095_v35 }
 0x63a   : > { %v4097_v31 = vpop.eup %4096 }
 0x63b   : > { %v2910_v50 = vadd.f32 %v2875_v24, %v5494_v62  ;;  %v2877_v19 = vmul.f32 0.6931472, %v4097_v31 }
 0x63d   : > { %v2942_v30 = vsub.f32 %v5841_v1, %v2910_v50  ;;  %v2911_v17 = vadd.f32 %v2877_v19, %v5498_v10 }
 0x63f   : > { %2974 = vst [vmem:[%s4582_s14 + $0xe0] sm:$0xff] %v2942_v30  ;;  %v2943_v48 = vsub.f32 %v5842_v27, %v2911_v17 }
 0x640   : > { %v4099_v52 = vpop.eup %4098 }
 0x641   : > { %2975 = vst [vmem:[%s4582_s14 + $0xe8] sm:$0xff] %v2943_v48  ;;  %v2879_v28 = vmul.f32 0.6931472, %v4099_v52 }
 0x642   : > { %v4101_v56 = vpop.eup %4100 }
 0x643   : > { %v2912_v37 = vadd.f32 %v2879_v28, %v5502_v11  ;;  %v2881_v45 = vmul.f32 0.6931472, %v4101_v56 }
 0x645   : > { %v2944_v60 = vsub.f32 %v5366_v5, %v2912_v37  ;;  %v2913_v62 = vadd.f32 %v2881_v45, %v5506_v18 }
 0x647   : > { %2976 = vst [vmem:[%s4582_s14 + $0xf0] sm:$0xff] %v2944_v60  ;;  %v2945_v55 = vsub.f32 %v5373_v4, %v2913_v62 }
 0x649   : > { %2977 = vst [vmem:[%s4582_s14 + $0xf8] sm:$0xff] %v2945_v55 }
 0x64a PF: > { %s3274_s17 = sshll.u32 %s4212_s24, 12  ;;  %s2992_s16 = sshll.u32 %s4582_s14, 4  ;;  %s5613_s16 = int_to_ptr.vmem [resolvable:$true] %s2992_s16 }
 0x64b   : > { %s5610_s15 = scalar_lea.hbm %s5675_s6, %s3274_s17  ;;  %s5843_s19 = sand.u32 1, %s4204_s22  }
 0x64c   : > { %s5617_s20 = scalar_lea.sflag [#allocation5], %s5843_s19  ;;  %s4130_s30 = scalar_lea.vmem %s5613_s16, 4096 }
 0x64d   : > { %p4131_p11 = scmp.ne.s32.totalorder %s5613_s16, %s4130_s30  ;;  %p5844_p12 = scmp.ne.s32.totalorder %s5748_s11, 0 }
 0x64e   : > { %s4234_s24 = smov [#allocation6]  }
 0x64f   : > { %p4132_p0 = pnand %p4131_p11, %p5844_p12  ;;  %s4134_s9 = sshll.u32 %s4234_s24, 4  ;;  %s4135_s9 = int_to_ptr.vmem [resolvable:$false] %s4134_s9 }
 0x650   : > { %s4136_s18 = scalar_lea.vmem %s4135_s9, 8192  ;;  %p4137_p5 = scmp.lt.s32.totalorder %s5613_s16, %s4135_s9 }
 0x651   : > { %p4133_p2 = pneg %p4132_p0  ;;  %p4138_p6 = scmp.lt.s32.totalorder %s4136_s18, %s4130_s30 }
 0x653   : > { %p4139_p7 = por %p4138_p6, %p4137_p5 }
 0x655   : > { %p4140_p9 = pnand %p4139_p7, %p4133_p2 }
 0x657   : > { %4143 = shalt.err (!%p4140_p9)
}
 0x658   : > { %s4144_s14 = scalar_lea.hbm %s5610_s15, 4096  ;;  %s4148_s17 = scalar_lea.hbm %s5675_s6, 8192 }
 0x659   : > { %p4145_p10 = scmp.ne.s32.totalorder %s5610_s15, %s4144_s14  ;;  %p4149_p4 = scmp.lt.u32.totalorder %s5610_s15, %s5675_s6 }
 0x65a   : > { %p4150_p3 = scmp.lt.u32.totalorder %s4148_s17, %s4144_s14  ;;  %p4152_p11 = scmp.lt.u32.totalorder %s4144_s14, %s5610_s15 }
 0x65b   : > { %p4146_p13 = pnand %p4145_p10, %p5844_p12 }
 0x65c   : > { %p4151_p8 = por %p4150_p3, %p4149_p4 }
 0x65d   : > { %p4147_p1 = pneg %p4146_p13 }
 0x65e   : > { %p4153_p0 = por %p4152_p11, %p4151_p8 }
 0x660   : > { %p4154_p2 = pnand %p4153_p0, %p4147_p1 }
 0x662   : > { %4157 = shalt.err (!%p4154_p2)
}
 0x663   : > { %s4235_s19 = smov 128   ;;  %s4236_s30 = smov 8  }
 0x664   : > { %3850 = dma.vmem_to_hbm [thread:$0]  (%p5844_p12), %s5613_s16, 4096, %s5610_s15, %s5617_s20, %s4235_s19, %s4235_s19, %s4236_s30  }
 0x665 PF: > { %p3862_p5 = scmp.ge.s32.totalorder %s4228_s28, 2  ;;  %s3007_s24 = sand.u32 1, %s4200_s21  }
 0x666   : > { %p5845_p6 = scmp.ne.s32.totalorder %s5750_s13, 0  ;;  %s3008_s9 = scalar_lea.sflag [#allocation5], %s3007_s24 }
 0x668   : > { %p3857_p7 = pnand %p3862_p5, %p5845_p6 }
 0x66a   : > { %4195 = dma.done.wait (!%p3857_p7), %s3008_s9, 4096  }
 0x66b   : > { %4197 = vsyncadd (!%p3857_p7), %s3008_s9, 4294963200  ;;  %s20_s28 = sadd.s32 1, %s4228_s28   ;;  %s5846_s11 = sld [smem:[#allocation9_spill]] }
 0x66c   : > { %p17_p9 = scmp.ge.s32.totalorder %s20_s28, 6   ;;  %s5847_s21 = smov %s4204_s22 }
 0x66d   : > { %s5848_s22 = smov %s4208_s23  ;;  %s5849_s23 = smov %s4333_s12 }
 0x66e   : > { %s5850_s24 = smov %s4220_s26  ;;  %s5851_s25 = smov %s4224_s27 }
 0x66f   : > { %s5852_s26 = smov %s5855_s7  ;;  %19 = sbr.rel (!%p17_p9) target bundleno = 6 (0x6), region = 91 }
 0x671   : > { %s5853_s27 = smov %s5846_s11 }
 0x676   :  { %3013 = vsyncpa [#allocation4], 1 }
 0x677   :  { %3015 = vsyncpa [#allocation4 + $0x1], 1 }
 0x678   :  { %3016 = vsyncpa [#allocation5], 1 }
 0x679   :  { %3018 = vsyncpa [#allocation5 + $0x1], 1 }

</bundles_post_ra>
